<compile_context>
chip_gen: v7x
topology: tpu7x:2x2x1
jax: 0.10.0
libtpu: 0.0.40
codegen_flags: <defaults>
</compile_context>

<pallas_src>
import jax
import jax.numpy as jnp
from jax import lax
from jax.experimental import pallas as pl
from jax.experimental.pallas import tpu as pltpu

LEAKY_SLOPE = 0.2
BN_EPS = 1e-5


def _layer_config(x_dim, h_dim, z_dim):
    """[(cin, cout, has_bn, act)] for the 12 conv layers (enc then dec)."""
    cfg = []
    enc = [x_dim, h_dim, h_dim * 2, h_dim * 4, h_dim * 8, h_dim * 16, z_dim]
    for i in range(6):
        last = i == 5
        cfg.append((enc[i], enc[i + 1], not last, None if last else "leaky"))
    dec = [z_dim, h_dim * 16, h_dim * 8, h_dim * 4, h_dim * 2, h_dim, x_dim]
    for i in range(6):
        last = i == 5
        cfg.append((dec[i], dec[i + 1], not last, "tanh" if last else "relu"))
    return cfg


def _apply_act(y, act):
    if act == "leaky":
        return jnp.maximum(y, LEAKY_SLOPE * y)
    if act == "relu":
        return jnp.maximum(y, 0.0)
    if act == "tanh":
        return jnp.tanh(y)
    return y  # bare conv (end of encoder)


def _make_kernel(tb, seq_len, acts):
    n_layers = len(acts)
    # batched matmul: (tb, L, L) x (tb, L, C) -> (tb, L, C), contract over s.
    dn_shift = (((2,), (1,)), ((0,), (0,)))

    def kernel(sprev_ref, snext_ref, x_ref, *rest):
        out_ref = rest[-1]
        wb = rest[:-1]
        sprev = sprev_ref[...]                     # (tb, L, L) f32 0/1
        snext = snext_ref[...]                     # (tb, L, L) f32 0/1
        h = x_ref[...].astype(jnp.float32)         # (tb, L, x_dim)
        h = h.reshape(tb * seq_len, h.shape[-1])   # (TB*L, C), f32 between layers

        for li in range(n_layers):
            w_ref = wb[2 * li]                     # (3, cin, cout) bf16 (BN folded)
            b_ref = wb[2 * li + 1]                 # (1, cout) f32
            cin = h.shape[-1]
            h3 = h.reshape(tb, seq_len, cin)
            # exact +/-1 shifts along the sequence (zero at the boundaries)
            hp = lax.dot_general(sprev, h3, dn_shift,
                                 preferred_element_type=jnp.float32)
            hn = lax.dot_general(snext, h3, dn_shift,
                                 preferred_element_type=jnp.float32)
            hp = hp.reshape(tb * seq_len, cin).astype(jnp.bfloat16)
            hn = hn.reshape(tb * seq_len, cin).astype(jnp.bfloat16)
            hc = h.astype(jnp.bfloat16)
            # 3-tap conv = 3 bf16 MXU matmuls, f32 accumulation, folded-BN bias
            acc = (jnp.dot(hp, w_ref[0], preferred_element_type=jnp.float32)
                   + jnp.dot(hc, w_ref[1], preferred_element_type=jnp.float32)
                   + jnp.dot(hn, w_ref[2], preferred_element_type=jnp.float32)
                   + b_ref[...])
            y = _apply_act(acc, acts[li])          # f32 (TB*L, cout)
            if li == n_layers - 1:
                out_ref[...] = y.reshape(tb, seq_len,
                                         y.shape[-1]).astype(out_ref.dtype)
            else:
                h = y

    return kernel


def generator_cnn_forward(x, layers, *, batch_tile=None):
    """x: (B, seq_len, x_dim) float32.  layers: list of (w bf16 (3,cin,cout),
    b f32 (1,cout), act) with eval-mode BatchNorm already folded in."""
    B, L, x_dim = x.shape
    tb = B if batch_tile is None else min(int(batch_tile), B)
    if B % tb != 0:
        tb = B
    n_tiles = B // tb

    acts = tuple(act for (_, _, act) in layers)
    flat_params = []
    for (w, b, _) in layers:
        flat_params += [w, b]

    x_bf = x.astype(jnp.bfloat16)                   # halve input DMA bytes
    sprev = jnp.eye(L, k=-1, dtype=jnp.float32)     # picks row t-1
    snext = jnp.eye(L, k=1, dtype=jnp.float32)      # picks row t+1
    sprev_b = jnp.broadcast_to(sprev[None], (tb, L, L))
    snext_b = jnp.broadcast_to(snext[None], (tb, L, L))

    const3 = lambda i: (0, 0, 0)
    const2 = lambda i: (0, 0)
    in_specs = [
        pl.BlockSpec((tb, L, L), const3),                 # shift matrices: resident
        pl.BlockSpec((tb, L, L), const3),
        pl.BlockSpec((tb, L, x_dim), lambda i: (i, 0, 0)),  # x: tiled over batch
    ]
    for (w, b, _) in layers:                              # weights: DMA'd once
        in_specs.append(pl.BlockSpec(w.shape, const3))
        in_specs.append(pl.BlockSpec(b.shape, const2))
    out_spec = pl.BlockSpec((tb, L, x_dim), lambda i: (i, 0, 0))

    # advisory cost estimate for the XLA scheduler
    flops = 0
    bytes_accessed = x_bf.size * 2 + B * L * x_dim * 4
    for (w, b, _) in layers:
        cin, cout = int(w.shape[1]), int(w.shape[2])
        flops += 2 * B * L * (3 * cin * cout + 2 * L * cin)
        bytes_accessed += w.size * 2 + b.size * 4
    cost = pl.CostEstimate(flops=int(flops),
                           transcendentals=int(B * L * x_dim),
                           bytes_accessed=int(bytes_accessed))

    return pl.pallas_call(
        _make_kernel(tb, L, acts),
        grid=(n_tiles,),
        in_specs=in_specs,
        out_specs=out_spec,
        out_shape=jax.ShapeDtypeStruct((B, L, x_dim), jnp.float32),
        compiler_params=pltpu.CompilerParams(
            dimension_semantics=("parallel",)),
        cost_estimate=cost,
    )(sprev_b, snext_b, x_bf, *flat_params)


def init_generator_params(key, x_dim, h_dim, z_dim):
    """Deterministic random conv weights + eval-mode BN parameters."""
    raw = []
    for (cin, cout, has_bn, act) in _layer_config(x_dim, h_dim, z_dim):
        key, kw = jax.random.split(key)
        bound = 1.0 / (3.0 * cin) ** 0.5
        w = jax.random.uniform(kw, (3, cin, cout), jnp.float32, -bound, bound)
        if has_bn:
            key, k1, k2, k3, k4 = jax.random.split(key, 5)
            bn = (jax.random.uniform(k1, (cout,), jnp.float32, 0.5, 1.5),   # gamma
                  0.1 * jax.random.normal(k2, (cout,), jnp.float32),        # beta
                  0.1 * jax.random.normal(k3, (cout,), jnp.float32),        # mean
                  jax.random.uniform(k4, (cout,), jnp.float32, 0.5, 1.5))   # var
        else:
            bn = None
        raw.append((w, bn, act))
    return raw


def fold_layers(raw_layers, eps=BN_EPS):
    """Fold eval-mode BatchNorm into (W, bias); cast W to bf16 for the MXU."""
    layers = []
    for (w, bn, act) in raw_layers:
        cout = w.shape[-1]
        if bn is None:
            scale = jnp.ones((cout,), jnp.float32)
            shift = jnp.zeros((cout,), jnp.float32)
        else:
            gamma, beta, mean, var = bn
            scale = gamma / jnp.sqrt(var + eps)
            shift = beta - mean * scale
        w_f = (w * scale[None, None, :]).astype(jnp.bfloat16)
        b_f = shift.reshape(1, cout).astype(jnp.float32)
        layers.append((w_f, b_f, act))
    return layers


def reference_forward(x, layers):
    """Pure-JAX mirror of the kernel math (bf16 matmul operands, f32 accum)."""
    B, L, _ = x.shape
    h = x.astype(jnp.bfloat16)
    n = len(layers)
    for li, (w, b, act) in enumerate(layers):
        zeros = jnp.zeros((B, 1, h.shape[-1]), h.dtype)
        h_prev = jnp.concatenate([zeros, h[:, :-1, :]], axis=1)
        h_next = jnp.concatenate([h[:, 1:, :], zeros], axis=1)
        acc = (jnp.einsum("blc,cd->bld", h_prev, w[0],
                          preferred_element_type=jnp.float32)
               + jnp.einsum("blc,cd->bld", h, w[1],
                            preferred_element_type=jnp.float32)
               + jnp.einsum("blc,cd->bld", h_next, w[2],
                            preferred_element_type=jnp.float32)
               + b)
        y = _apply_act(acc, act)
        if li == n - 1:
            return y.astype(jnp.float32)
        h = y.astype(jnp.bfloat16)


if __name__ == "__main__":
    # Small shapes consistent with the module: (B, seq_len, x_dim) input.
    B, seq_len, x_dim = 2, 8, 4
    h_dim, z_dim = 16, 8   # channel ladder 4->16->32->64->128->256->8->...->4

    key = jax.random.PRNGKey(0)
    kx, kp = jax.random.split(key)
    x = jax.random.normal(kx, (B, seq_len, x_dim), jnp.float32)

    raw = init_generator_params(kp, x_dim, h_dim, z_dim)
    layers = fold_layers(raw)

    out = generator_cnn_forward(x, layers)
    out = jax.block_until_ready(out)

    ref = reference_forward(x, layers)
    assert out.shape == (B, seq_len, x_dim)
    assert bool(jnp.all(jnp.isfinite(out)))
    max_err = float(jnp.max(jnp.abs(out - ref)))
    assert jnp.allclose(out, ref, atol=2e-3, rtol=2e-3), max_err

    print("KERNEL_OK")
</pallas_src>

<mosaic_0001>
module attributes {stable_mosaic.version = 11 : i64} {
  func.func @kernel(%arg0: i32, %arg1: memref<2x8x8xf32, #tpu.memory_space<vmem>>, %arg2: memref<2x8x8xf32, #tpu.memory_space<vmem>>, %arg3: memref<2x8x4xbf16, #tpu.memory_space<vmem>>, %arg4: memref<3x4x16xbf16, #tpu.memory_space<vmem>>, %arg5: memref<1x16xf32, #tpu.memory_space<vmem>>, %arg6: memref<3x16x32xbf16, #tpu.memory_space<vmem>>, %arg7: memref<1x32xf32, #tpu.memory_space<vmem>>, %arg8: memref<3x32x64xbf16, #tpu.memory_space<vmem>>, %arg9: memref<1x64xf32, #tpu.memory_space<vmem>>, %arg10: memref<3x64x128xbf16, #tpu.memory_space<vmem>>, %arg11: memref<1x128xf32, #tpu.memory_space<vmem>>, %arg12: memref<3x128x256xbf16, #tpu.memory_space<vmem>>, %arg13: memref<1x256xf32, #tpu.memory_space<vmem>>, %arg14: memref<3x256x8xbf16, #tpu.memory_space<vmem>>, %arg15: memref<1x8xf32, #tpu.memory_space<vmem>>, %arg16: memref<3x8x256xbf16, #tpu.memory_space<vmem>>, %arg17: memref<1x256xf32, #tpu.memory_space<vmem>>, %arg18: memref<3x256x128xbf16, #tpu.memory_space<vmem>>, %arg19: memref<1x128xf32, #tpu.memory_space<vmem>>, %arg20: memref<3x128x64xbf16, #tpu.memory_space<vmem>>, %arg21: memref<1x64xf32, #tpu.memory_space<vmem>>, %arg22: memref<3x64x32xbf16, #tpu.memory_space<vmem>>, %arg23: memref<1x32xf32, #tpu.memory_space<vmem>>, %arg24: memref<3x32x16xbf16, #tpu.memory_space<vmem>>, %arg25: memref<1x16xf32, #tpu.memory_space<vmem>>, %arg26: memref<3x16x4xbf16, #tpu.memory_space<vmem>>, %arg27: memref<1x4xf32, #tpu.memory_space<vmem>>, %arg28: memref<2x8x4xf32, #tpu.memory_space<vmem>>) attributes {dimension_semantics = [#tpu.dimension_semantics<parallel>], iteration_bounds = array<i64: 1>, scalar_prefetch = 0 : i64, scratch_operands = 0 : i64, tpu.core_type = #tpu.core_type<tc>, window_params = [{pipeline_mode = #tpu.pipeline_mode<synchronous>, transform_indices = @transform_0, window_bounds = array<i64: 2, 8, 8>}, {pipeline_mode = #tpu.pipeline_mode<synchronous>, transform_indices = @transform_1, window_bounds = array<i64: 2, 8, 8>}, {transform_indices = @transform_2, window_bounds = array<i64: 2, 8, 4>}, {pipeline_mode = #tpu.pipeline_mode<synchronous>, transform_indices = @transform_3, window_bounds = array<i64: 3, 4, 16>}, {pipeline_mode = #tpu.pipeline_mode<synchronous>, transform_indices = @transform_4, window_bounds = array<i64: 1, 16>}, {pipeline_mode = #tpu.pipeline_mode<synchronous>, transform_indices = @transform_5, window_bounds = array<i64: 3, 16, 32>}, {pipeline_mode = #tpu.pipeline_mode<synchronous>, transform_indices = @transform_6, window_bounds = array<i64: 1, 32>}, {pipeline_mode = #tpu.pipeline_mode<synchronous>, transform_indices = @transform_7, window_bounds = array<i64: 3, 32, 64>}, {pipeline_mode = #tpu.pipeline_mode<synchronous>, transform_indices = @transform_8, window_bounds = array<i64: 1, 64>}, {pipeline_mode = #tpu.pipeline_mode<synchronous>, transform_indices = @transform_9, window_bounds = array<i64: 3, 64, 128>}, {pipeline_mode = #tpu.pipeline_mode<synchronous>, transform_indices = @transform_10, window_bounds = array<i64: 1, 128>}, {pipeline_mode = #tpu.pipeline_mode<synchronous>, transform_indices = @transform_11, window_bounds = array<i64: 3, 128, 256>}, {pipeline_mode = #tpu.pipeline_mode<synchronous>, transform_indices = @transform_12, window_bounds = array<i64: 1, 256>}, {pipeline_mode = #tpu.pipeline_mode<synchronous>, transform_indices = @transform_13, window_bounds = array<i64: 3, 256, 8>}, {pipeline_mode = #tpu.pipeline_mode<synchronous>, transform_indices = @transform_14, window_bounds = array<i64: 1, 8>}, {pipeline_mode = #tpu.pipeline_mode<synchronous>, transform_indices = @transform_15, window_bounds = array<i64: 3, 8, 256>}, {pipeline_mode = #tpu.pipeline_mode<synchronous>, transform_indices = @transform_16, window_bounds = array<i64: 1, 256>}, {pipeline_mode = #tpu.pipeline_mode<synchronous>, transform_indices = @transform_17, window_bounds = array<i64: 3, 256, 128>}, {pipeline_mode = #tpu.pipeline_mode<synchronous>, transform_indices = @transform_18, window_bounds = array<i64: 1, 128>}, {pipeline_mode = #tpu.pipeline_mode<synchronous>, transform_indices = @transform_19, window_bounds = array<i64: 3, 128, 64>}, {pipeline_mode = #tpu.pipeline_mode<synchronous>, transform_indices = @transform_20, window_bounds = array<i64: 1, 64>}, {pipeline_mode = #tpu.pipeline_mode<synchronous>, transform_indices = @transform_21, window_bounds = array<i64: 3, 64, 32>}, {pipeline_mode = #tpu.pipeline_mode<synchronous>, transform_indices = @transform_22, window_bounds = array<i64: 1, 32>}, {pipeline_mode = #tpu.pipeline_mode<synchronous>, transform_indices = @transform_23, window_bounds = array<i64: 3, 32, 16>}, {pipeline_mode = #tpu.pipeline_mode<synchronous>, transform_indices = @transform_24, window_bounds = array<i64: 1, 16>}, {pipeline_mode = #tpu.pipeline_mode<synchronous>, transform_indices = @transform_25, window_bounds = array<i64: 3, 16, 4>}, {pipeline_mode = #tpu.pipeline_mode<synchronous>, transform_indices = @transform_26, window_bounds = array<i64: 1, 4>}, {transform_indices = @transform_27, window_bounds = array<i64: 2, 8, 4>}]} {
    %c0 = arith.constant 0 : index
    %c0_0 = arith.constant 0 : index
    %c0_1 = arith.constant 0 : index
    %0 = vector.load %arg1[%c0, %c0_0, %c0_1] : memref<2x8x8xf32, #tpu.memory_space<vmem>>, vector<2x8x8xf32>
    %c0_2 = arith.constant 0 : index
    %c0_3 = arith.constant 0 : index
    %c0_4 = arith.constant 0 : index
    %1 = vector.load %arg2[%c0_2, %c0_3, %c0_4] : memref<2x8x8xf32, #tpu.memory_space<vmem>>, vector<2x8x8xf32>
    %c0_5 = arith.constant 0 : index
    %c0_6 = arith.constant 0 : index
    %c0_7 = arith.constant 0 : index
    %2 = vector.load %arg3[%c0_5, %c0_6, %c0_7] : memref<2x8x4xbf16, #tpu.memory_space<vmem>>, vector<2x8x4xbf16>
    %3 = arith.extf %2 : vector<2x8x4xbf16> to vector<2x8x4xf32>
    %4 = vector.shape_cast %3 : vector<2x8x4xf32> to vector<16x4xf32>
    %5 = vector.shape_cast %4 : vector<16x4xf32> to vector<2x8x4xf32>
    %cst = arith.constant dense<0.000000e+00> : vector<2x8x4xf32>
    %6 = tpu.matmul %0, %5, %cst {dimension_numbers = #tpu.dot_dimension_numbers<[2], [1], [1], [2], [0, 0, 0, 1, 1, 2], [0], [0]>} : vector<2x8x8xf32>, vector<2x8x4xf32>, vector<2x8x4xf32> -> vector<2x8x4xf32>
    %cst_8 = arith.constant dense<0.000000e+00> : vector<2x8x4xf32>
    %7 = tpu.matmul %1, %5, %cst_8 {dimension_numbers = #tpu.dot_dimension_numbers<[2], [1], [1], [2], [0, 0, 0, 1, 1, 2], [0], [0]>} : vector<2x8x8xf32>, vector<2x8x4xf32>, vector<2x8x4xf32> -> vector<2x8x4xf32>
    %8 = vector.shape_cast %6 : vector<2x8x4xf32> to vector<16x4xf32>
    %9 = arith.truncf %8 : vector<16x4xf32> to vector<16x4xbf16>
    %10 = vector.shape_cast %7 : vector<2x8x4xf32> to vector<16x4xf32>
    %11 = arith.truncf %10 : vector<16x4xf32> to vector<16x4xbf16>
    %12 = arith.truncf %4 : vector<16x4xf32> to vector<16x4xbf16>
    %c0_9 = arith.constant 0 : index
    %c0_10 = arith.constant 0 : index
    %c0_11 = arith.constant 0 : index
    %13 = vector.load %arg4[%c0_9, %c0_10, %c0_11] : memref<3x4x16xbf16, #tpu.memory_space<vmem>>, vector<1x4x16xbf16>
    %14 = vector.shape_cast %13 : vector<1x4x16xbf16> to vector<4x16xbf16>
    %cst_12 = arith.constant dense<0.000000e+00> : vector<16x16xf32>
    %15 = tpu.matmul %9, %14, %cst_12 {dimension_numbers = #tpu.dot_dimension_numbers<[1], [0], [0], [1], [0, 0, 1, 1], [], []>} : vector<16x4xbf16>, vector<4x16xbf16>, vector<16x16xf32> -> vector<16x16xf32>
    %c1 = arith.constant 1 : index
    %c0_13 = arith.constant 0 : index
    %c0_14 = arith.constant 0 : index
    %16 = vector.load %arg4[%c1, %c0_13, %c0_14] : memref<3x4x16xbf16, #tpu.memory_space<vmem>>, vector<1x4x16xbf16>
    %17 = vector.shape_cast %16 : vector<1x4x16xbf16> to vector<4x16xbf16>
    %cst_15 = arith.constant dense<0.000000e+00> : vector<16x16xf32>
    %18 = tpu.matmul %12, %17, %cst_15 {dimension_numbers = #tpu.dot_dimension_numbers<[1], [0], [0], [1], [0, 0, 1, 1], [], []>} : vector<16x4xbf16>, vector<4x16xbf16>, vector<16x16xf32> -> vector<16x16xf32>
    %19 = arith.addf %15, %18 : vector<16x16xf32>
    %c2 = arith.constant 2 : index
    %c0_16 = arith.constant 0 : index
    %c0_17 = arith.constant 0 : index
    %20 = vector.load %arg4[%c2, %c0_16, %c0_17] : memref<3x4x16xbf16, #tpu.memory_space<vmem>>, vector<1x4x16xbf16>
    %21 = vector.shape_cast %20 : vector<1x4x16xbf16> to vector<4x16xbf16>
    %cst_18 = arith.constant dense<0.000000e+00> : vector<16x16xf32>
    %22 = tpu.matmul %11, %21, %cst_18 {dimension_numbers = #tpu.dot_dimension_numbers<[1], [0], [0], [1], [0, 0, 1, 1], [], []>} : vector<16x4xbf16>, vector<4x16xbf16>, vector<16x16xf32> -> vector<16x16xf32>
    %23 = arith.addf %19, %22 : vector<16x16xf32>
    %c0_19 = arith.constant 0 : index
    %c0_20 = arith.constant 0 : index
    %24 = vector.load %arg5[%c0_19, %c0_20] : memref<1x16xf32, #tpu.memory_space<vmem>>, vector<1x16xf32>
    %25 = vector.broadcast %24 : vector<1x16xf32> to vector<16x16xf32>
    %26 = arith.addf %23, %25 : vector<16x16xf32>
    %cst_21 = arith.constant 2.000000e-01 : f32
    %27 = vector.broadcast %cst_21 : f32 to vector<16x16xf32>
    %28 = arith.mulf %27, %26 : vector<16x16xf32>
    %29 = arith.maximumf %26, %28 : vector<16x16xf32>
    %30 = vector.shape_cast %29 : vector<16x16xf32> to vector<2x8x16xf32>
    %cst_22 = arith.constant dense<0.000000e+00> : vector<2x8x16xf32>
    %31 = tpu.matmul %0, %30, %cst_22 {dimension_numbers = #tpu.dot_dimension_numbers<[2], [1], [1], [2], [0, 0, 0, 1, 1, 2], [0], [0]>} : vector<2x8x8xf32>, vector<2x8x16xf32>, vector<2x8x16xf32> -> vector<2x8x16xf32>
    %cst_23 = arith.constant dense<0.000000e+00> : vector<2x8x16xf32>
    %32 = tpu.matmul %1, %30, %cst_23 {dimension_numbers = #tpu.dot_dimension_numbers<[2], [1], [1], [2], [0, 0, 0, 1, 1, 2], [0], [0]>} : vector<2x8x8xf32>, vector<2x8x16xf32>, vector<2x8x16xf32> -> vector<2x8x16xf32>
    %33 = vector.shape_cast %31 : vector<2x8x16xf32> to vector<16x16xf32>
    %34 = arith.truncf %33 : vector<16x16xf32> to vector<16x16xbf16>
    %35 = vector.shape_cast %32 : vector<2x8x16xf32> to vector<16x16xf32>
    %36 = arith.truncf %35 : vector<16x16xf32> to vector<16x16xbf16>
    %37 = arith.truncf %29 : vector<16x16xf32> to vector<16x16xbf16>
    %c0_24 = arith.constant 0 : index
    %c0_25 = arith.constant 0 : index
    %c0_26 = arith.constant 0 : index
    %38 = vector.load %arg6[%c0_24, %c0_25, %c0_26] : memref<3x16x32xbf16, #tpu.memory_space<vmem>>, vector<1x16x32xbf16>
    %39 = vector.shape_cast %38 : vector<1x16x32xbf16> to vector<16x32xbf16>
    %cst_27 = arith.constant dense<0.000000e+00> : vector<16x32xf32>
    %40 = tpu.matmul %34, %39, %cst_27 {dimension_numbers = #tpu.dot_dimension_numbers<[1], [0], [0], [1], [0, 0, 1, 1], [], []>} : vector<16x16xbf16>, vector<16x32xbf16>, vector<16x32xf32> -> vector<16x32xf32>
    %c1_28 = arith.constant 1 : index
    %c0_29 = arith.constant 0 : index
    %c0_30 = arith.constant 0 : index
    %41 = vector.load %arg6[%c1_28, %c0_29, %c0_30] : memref<3x16x32xbf16, #tpu.memory_space<vmem>>, vector<1x16x32xbf16>
    %42 = vector.shape_cast %41 : vector<1x16x32xbf16> to vector<16x32xbf16>
    %cst_31 = arith.constant dense<0.000000e+00> : vector<16x32xf32>
    %43 = tpu.matmul %37, %42, %cst_31 {dimension_numbers = #tpu.dot_dimension_numbers<[1], [0], [0], [1], [0, 0, 1, 1], [], []>} : vector<16x16xbf16>, vector<16x32xbf16>, vector<16x32xf32> -> vector<16x32xf32>
    %44 = arith.addf %40, %43 : vector<16x32xf32>
    %c2_32 = arith.constant 2 : index
    %c0_33 = arith.constant 0 : index
    %c0_34 = arith.constant 0 : index
    %45 = vector.load %arg6[%c2_32, %c0_33, %c0_34] : memref<3x16x32xbf16, #tpu.memory_space<vmem>>, vector<1x16x32xbf16>
    %46 = vector.shape_cast %45 : vector<1x16x32xbf16> to vector<16x32xbf16>
    %cst_35 = arith.constant dense<0.000000e+00> : vector<16x32xf32>
    %47 = tpu.matmul %36, %46, %cst_35 {dimension_numbers = #tpu.dot_dimension_numbers<[1], [0], [0], [1], [0, 0, 1, 1], [], []>} : vector<16x16xbf16>, vector<16x32xbf16>, vector<16x32xf32> -> vector<16x32xf32>
    %48 = arith.addf %44, %47 : vector<16x32xf32>
    %c0_36 = arith.constant 0 : index
    %c0_37 = arith.constant 0 : index
    %49 = vector.load %arg7[%c0_36, %c0_37] : memref<1x32xf32, #tpu.memory_space<vmem>>, vector<1x32xf32>
    %50 = vector.broadcast %49 : vector<1x32xf32> to vector<16x32xf32>
    %51 = arith.addf %48, %50 : vector<16x32xf32>
    %cst_38 = arith.constant 2.000000e-01 : f32
    %52 = vector.broadcast %cst_38 : f32 to vector<16x32xf32>
    %53 = arith.mulf %52, %51 : vector<16x32xf32>
    %54 = arith.maximumf %51, %53 : vector<16x32xf32>
    %55 = vector.shape_cast %54 : vector<16x32xf32> to vector<2x8x32xf32>
    %cst_39 = arith.constant dense<0.000000e+00> : vector<2x8x32xf32>
    %56 = tpu.matmul %0, %55, %cst_39 {dimension_numbers = #tpu.dot_dimension_numbers<[2], [1], [1], [2], [0, 0, 0, 1, 1, 2], [0], [0]>} : vector<2x8x8xf32>, vector<2x8x32xf32>, vector<2x8x32xf32> -> vector<2x8x32xf32>
    %cst_40 = arith.constant dense<0.000000e+00> : vector<2x8x32xf32>
    %57 = tpu.matmul %1, %55, %cst_40 {dimension_numbers = #tpu.dot_dimension_numbers<[2], [1], [1], [2], [0, 0, 0, 1, 1, 2], [0], [0]>} : vector<2x8x8xf32>, vector<2x8x32xf32>, vector<2x8x32xf32> -> vector<2x8x32xf32>
    %58 = vector.shape_cast %56 : vector<2x8x32xf32> to vector<16x32xf32>
    %59 = arith.truncf %58 : vector<16x32xf32> to vector<16x32xbf16>
    %60 = vector.shape_cast %57 : vector<2x8x32xf32> to vector<16x32xf32>
    %61 = arith.truncf %60 : vector<16x32xf32> to vector<16x32xbf16>
    %62 = arith.truncf %54 : vector<16x32xf32> to vector<16x32xbf16>
    %c0_41 = arith.constant 0 : index
    %c0_42 = arith.constant 0 : index
    %c0_43 = arith.constant 0 : index
    %63 = vector.load %arg8[%c0_41, %c0_42, %c0_43] : memref<3x32x64xbf16, #tpu.memory_space<vmem>>, vector<1x32x64xbf16>
    %64 = vector.shape_cast %63 : vector<1x32x64xbf16> to vector<32x64xbf16>
    %cst_44 = arith.constant dense<0.000000e+00> : vector<16x64xf32>
    %65 = tpu.matmul %59, %64, %cst_44 {dimension_numbers = #tpu.dot_dimension_numbers<[1], [0], [0], [1], [0, 0, 1, 1], [], []>} : vector<16x32xbf16>, vector<32x64xbf16>, vector<16x64xf32> -> vector<16x64xf32>
    %c1_45 = arith.constant 1 : index
    %c0_46 = arith.constant 0 : index
    %c0_47 = arith.constant 0 : index
    %66 = vector.load %arg8[%c1_45, %c0_46, %c0_47] : memref<3x32x64xbf16, #tpu.memory_space<vmem>>, vector<1x32x64xbf16>
    %67 = vector.shape_cast %66 : vector<1x32x64xbf16> to vector<32x64xbf16>
    %cst_48 = arith.constant dense<0.000000e+00> : vector<16x64xf32>
    %68 = tpu.matmul %62, %67, %cst_48 {dimension_numbers = #tpu.dot_dimension_numbers<[1], [0], [0], [1], [0, 0, 1, 1], [], []>} : vector<16x32xbf16>, vector<32x64xbf16>, vector<16x64xf32> -> vector<16x64xf32>
    %69 = arith.addf %65, %68 : vector<16x64xf32>
    %c2_49 = arith.constant 2 : index
    %c0_50 = arith.constant 0 : index
    %c0_51 = arith.constant 0 : index
    %70 = vector.load %arg8[%c2_49, %c0_50, %c0_51] : memref<3x32x64xbf16, #tpu.memory_space<vmem>>, vector<1x32x64xbf16>
    %71 = vector.shape_cast %70 : vector<1x32x64xbf16> to vector<32x64xbf16>
    %cst_52 = arith.constant dense<0.000000e+00> : vector<16x64xf32>
    %72 = tpu.matmul %61, %71, %cst_52 {dimension_numbers = #tpu.dot_dimension_numbers<[1], [0], [0], [1], [0, 0, 1, 1], [], []>} : vector<16x32xbf16>, vector<32x64xbf16>, vector<16x64xf32> -> vector<16x64xf32>
    %73 = arith.addf %69, %72 : vector<16x64xf32>
    %c0_53 = arith.constant 0 : index
    %c0_54 = arith.constant 0 : index
    %74 = vector.load %arg9[%c0_53, %c0_54] : memref<1x64xf32, #tpu.memory_space<vmem>>, vector<1x64xf32>
    %75 = vector.broadcast %74 : vector<1x64xf32> to vector<16x64xf32>
    %76 = arith.addf %73, %75 : vector<16x64xf32>
    %cst_55 = arith.constant 2.000000e-01 : f32
    %77 = vector.broadcast %cst_55 : f32 to vector<16x64xf32>
    %78 = arith.mulf %77, %76 : vector<16x64xf32>
    %79 = arith.maximumf %76, %78 : vector<16x64xf32>
    %80 = vector.shape_cast %79 : vector<16x64xf32> to vector<2x8x64xf32>
    %cst_56 = arith.constant dense<0.000000e+00> : vector<2x8x64xf32>
    %81 = tpu.matmul %0, %80, %cst_56 {dimension_numbers = #tpu.dot_dimension_numbers<[2], [1], [1], [2], [0, 0, 0, 1, 1, 2], [0], [0]>} : vector<2x8x8xf32>, vector<2x8x64xf32>, vector<2x8x64xf32> -> vector<2x8x64xf32>
    %cst_57 = arith.constant dense<0.000000e+00> : vector<2x8x64xf32>
    %82 = tpu.matmul %1, %80, %cst_57 {dimension_numbers = #tpu.dot_dimension_numbers<[2], [1], [1], [2], [0, 0, 0, 1, 1, 2], [0], [0]>} : vector<2x8x8xf32>, vector<2x8x64xf32>, vector<2x8x64xf32> -> vector<2x8x64xf32>
    %83 = vector.shape_cast %81 : vector<2x8x64xf32> to vector<16x64xf32>
    %84 = arith.truncf %83 : vector<16x64xf32> to vector<16x64xbf16>
    %85 = vector.shape_cast %82 : vector<2x8x64xf32> to vector<16x64xf32>
    %86 = arith.truncf %85 : vector<16x64xf32> to vector<16x64xbf16>
    %87 = arith.truncf %79 : vector<16x64xf32> to vector<16x64xbf16>
    %c0_58 = arith.constant 0 : index
    %c0_59 = arith.constant 0 : index
    %c0_60 = arith.constant 0 : index
    %88 = vector.load %arg10[%c0_58, %c0_59, %c0_60] : memref<3x64x128xbf16, #tpu.memory_space<vmem>>, vector<1x64x128xbf16>
    %89 = vector.shape_cast %88 : vector<1x64x128xbf16> to vector<64x128xbf16>
    %cst_61 = arith.constant dense<0.000000e+00> : vector<16x128xf32>
    %90 = tpu.matmul %84, %89, %cst_61 {dimension_numbers = #tpu.dot_dimension_numbers<[1], [0], [0], [1], [0, 0, 1, 1], [], []>} : vector<16x64xbf16>, vector<64x128xbf16>, vector<16x128xf32> -> vector<16x128xf32>
    %c1_62 = arith.constant 1 : index
    %c0_63 = arith.constant 0 : index
    %c0_64 = arith.constant 0 : index
    %91 = vector.load %arg10[%c1_62, %c0_63, %c0_64] : memref<3x64x128xbf16, #tpu.memory_space<vmem>>, vector<1x64x128xbf16>
    %92 = vector.shape_cast %91 : vector<1x64x128xbf16> to vector<64x128xbf16>
    %cst_65 = arith.constant dense<0.000000e+00> : vector<16x128xf32>
    %93 = tpu.matmul %87, %92, %cst_65 {dimension_numbers = #tpu.dot_dimension_numbers<[1], [0], [0], [1], [0, 0, 1, 1], [], []>} : vector<16x64xbf16>, vector<64x128xbf16>, vector<16x128xf32> -> vector<16x128xf32>
    %94 = arith.addf %90, %93 : vector<16x128xf32>
    %c2_66 = arith.constant 2 : index
    %c0_67 = arith.constant 0 : index
    %c0_68 = arith.constant 0 : index
    %95 = vector.load %arg10[%c2_66, %c0_67, %c0_68] : memref<3x64x128xbf16, #tpu.memory_space<vmem>>, vector<1x64x128xbf16>
    %96 = vector.shape_cast %95 : vector<1x64x128xbf16> to vector<64x128xbf16>
    %cst_69 = arith.constant dense<0.000000e+00> : vector<16x128xf32>
    %97 = tpu.matmul %86, %96, %cst_69 {dimension_numbers = #tpu.dot_dimension_numbers<[1], [0], [0], [1], [0, 0, 1, 1], [], []>} : vector<16x64xbf16>, vector<64x128xbf16>, vector<16x128xf32> -> vector<16x128xf32>
    %98 = arith.addf %94, %97 : vector<16x128xf32>
    %c0_70 = arith.constant 0 : index
    %c0_71 = arith.constant 0 : index
    %99 = vector.load %arg11[%c0_70, %c0_71] : memref<1x128xf32, #tpu.memory_space<vmem>>, vector<1x128xf32>
    %100 = vector.broadcast %99 : vector<1x128xf32> to vector<16x128xf32>
    %101 = arith.addf %98, %100 : vector<16x128xf32>
    %cst_72 = arith.constant 2.000000e-01 : f32
    %102 = vector.broadcast %cst_72 : f32 to vector<16x128xf32>
    %103 = arith.mulf %102, %101 : vector<16x128xf32>
    %104 = arith.maximumf %101, %103 : vector<16x128xf32>
    %105 = vector.shape_cast %104 : vector<16x128xf32> to vector<2x8x128xf32>
    %cst_73 = arith.constant dense<0.000000e+00> : vector<2x8x128xf32>
    %106 = tpu.matmul %0, %105, %cst_73 {dimension_numbers = #tpu.dot_dimension_numbers<[2], [1], [1], [2], [0, 0, 0, 1, 1, 2], [0], [0]>} : vector<2x8x8xf32>, vector<2x8x128xf32>, vector<2x8x128xf32> -> vector<2x8x128xf32>
    %cst_74 = arith.constant dense<0.000000e+00> : vector<2x8x128xf32>
    %107 = tpu.matmul %1, %105, %cst_74 {dimension_numbers = #tpu.dot_dimension_numbers<[2], [1], [1], [2], [0, 0, 0, 1, 1, 2], [0], [0]>} : vector<2x8x8xf32>, vector<2x8x128xf32>, vector<2x8x128xf32> -> vector<2x8x128xf32>
    %108 = vector.shape_cast %106 : vector<2x8x128xf32> to vector<16x128xf32>
    %109 = arith.truncf %108 : vector<16x128xf32> to vector<16x128xbf16>
    %110 = vector.shape_cast %107 : vector<2x8x128xf32> to vector<16x128xf32>
    %111 = arith.truncf %110 : vector<16x128xf32> to vector<16x128xbf16>
    %112 = arith.truncf %104 : vector<16x128xf32> to vector<16x128xbf16>
    %c0_75 = arith.constant 0 : index
    %c0_76 = arith.constant 0 : index
    %c0_77 = arith.constant 0 : index
    %113 = vector.load %arg12[%c0_75, %c0_76, %c0_77] : memref<3x128x256xbf16, #tpu.memory_space<vmem>>, vector<1x128x256xbf16>
    %114 = vector.shape_cast %113 : vector<1x128x256xbf16> to vector<128x256xbf16>
    %cst_78 = arith.constant dense<0.000000e+00> : vector<16x256xf32>
    %115 = tpu.matmul %109, %114, %cst_78 {dimension_numbers = #tpu.dot_dimension_numbers<[1], [0], [0], [1], [0, 0, 1, 1], [], []>} : vector<16x128xbf16>, vector<128x256xbf16>, vector<16x256xf32> -> vector<16x256xf32>
    %c1_79 = arith.constant 1 : index
    %c0_80 = arith.constant 0 : index
    %c0_81 = arith.constant 0 : index
    %116 = vector.load %arg12[%c1_79, %c0_80, %c0_81] : memref<3x128x256xbf16, #tpu.memory_space<vmem>>, vector<1x128x256xbf16>
    %117 = vector.shape_cast %116 : vector<1x128x256xbf16> to vector<128x256xbf16>
    %cst_82 = arith.constant dense<0.000000e+00> : vector<16x256xf32>
    %118 = tpu.matmul %112, %117, %cst_82 {dimension_numbers = #tpu.dot_dimension_numbers<[1], [0], [0], [1], [0, 0, 1, 1], [], []>} : vector<16x128xbf16>, vector<128x256xbf16>, vector<16x256xf32> -> vector<16x256xf32>
    %119 = arith.addf %115, %118 : vector<16x256xf32>
    %c2_83 = arith.constant 2 : index
    %c0_84 = arith.constant 0 : index
    %c0_85 = arith.constant 0 : index
    %120 = vector.load %arg12[%c2_83, %c0_84, %c0_85] : memref<3x128x256xbf16, #tpu.memory_space<vmem>>, vector<1x128x256xbf16>
    %121 = vector.shape_cast %120 : vector<1x128x256xbf16> to vector<128x256xbf16>
    %cst_86 = arith.constant dense<0.000000e+00> : vector<16x256xf32>
    %122 = tpu.matmul %111, %121, %cst_86 {dimension_numbers = #tpu.dot_dimension_numbers<[1], [0], [0], [1], [0, 0, 1, 1], [], []>} : vector<16x128xbf16>, vector<128x256xbf16>, vector<16x256xf32> -> vector<16x256xf32>
    %123 = arith.addf %119, %122 : vector<16x256xf32>
    %c0_87 = arith.constant 0 : index
    %c0_88 = arith.constant 0 : index
    %124 = vector.load %arg13[%c0_87, %c0_88] : memref<1x256xf32, #tpu.memory_space<vmem>>, vector<1x256xf32>
    %125 = vector.broadcast %124 : vector<1x256xf32> to vector<16x256xf32>
    %126 = arith.addf %123, %125 : vector<16x256xf32>
    %cst_89 = arith.constant 2.000000e-01 : f32
    %127 = vector.broadcast %cst_89 : f32 to vector<16x256xf32>
    %128 = arith.mulf %127, %126 : vector<16x256xf32>
    %129 = arith.maximumf %126, %128 : vector<16x256xf32>
    %130 = vector.shape_cast %129 : vector<16x256xf32> to vector<2x8x256xf32>
    %cst_90 = arith.constant dense<0.000000e+00> : vector<2x8x256xf32>
    %131 = tpu.matmul %0, %130, %cst_90 {dimension_numbers = #tpu.dot_dimension_numbers<[2], [1], [1], [2], [0, 0, 0, 1, 1, 2], [0], [0]>} : vector<2x8x8xf32>, vector<2x8x256xf32>, vector<2x8x256xf32> -> vector<2x8x256xf32>
    %cst_91 = arith.constant dense<0.000000e+00> : vector<2x8x256xf32>
    %132 = tpu.matmul %1, %130, %cst_91 {dimension_numbers = #tpu.dot_dimension_numbers<[2], [1], [1], [2], [0, 0, 0, 1, 1, 2], [0], [0]>} : vector<2x8x8xf32>, vector<2x8x256xf32>, vector<2x8x256xf32> -> vector<2x8x256xf32>
    %133 = vector.shape_cast %131 : vector<2x8x256xf32> to vector<16x256xf32>
    %134 = arith.truncf %133 : vector<16x256xf32> to vector<16x256xbf16>
    %135 = vector.shape_cast %132 : vector<2x8x256xf32> to vector<16x256xf32>
    %136 = arith.truncf %135 : vector<16x256xf32> to vector<16x256xbf16>
    %137 = arith.truncf %129 : vector<16x256xf32> to vector<16x256xbf16>
    %c0_92 = arith.constant 0 : index
    %c0_93 = arith.constant 0 : index
    %c0_94 = arith.constant 0 : index
    %138 = vector.load %arg14[%c0_92, %c0_93, %c0_94] : memref<3x256x8xbf16, #tpu.memory_space<vmem>>, vector<1x256x8xbf16>
    %139 = vector.shape_cast %138 : vector<1x256x8xbf16> to vector<256x8xbf16>
    %cst_95 = arith.constant dense<0.000000e+00> : vector<16x8xf32>
    %140 = tpu.matmul %134, %139, %cst_95 {dimension_numbers = #tpu.dot_dimension_numbers<[1], [0], [0], [1], [0, 0, 1, 1], [], []>} : vector<16x256xbf16>, vector<256x8xbf16>, vector<16x8xf32> -> vector<16x8xf32>
    %c1_96 = arith.constant 1 : index
    %c0_97 = arith.constant 0 : index
    %c0_98 = arith.constant 0 : index
    %141 = vector.load %arg14[%c1_96, %c0_97, %c0_98] : memref<3x256x8xbf16, #tpu.memory_space<vmem>>, vector<1x256x8xbf16>
    %142 = vector.shape_cast %141 : vector<1x256x8xbf16> to vector<256x8xbf16>
    %cst_99 = arith.constant dense<0.000000e+00> : vector<16x8xf32>
    %143 = tpu.matmul %137, %142, %cst_99 {dimension_numbers = #tpu.dot_dimension_numbers<[1], [0], [0], [1], [0, 0, 1, 1], [], []>} : vector<16x256xbf16>, vector<256x8xbf16>, vector<16x8xf32> -> vector<16x8xf32>
    %144 = arith.addf %140, %143 : vector<16x8xf32>
    %c2_100 = arith.constant 2 : index
    %c0_101 = arith.constant 0 : index
    %c0_102 = arith.constant 0 : index
    %145 = vector.load %arg14[%c2_100, %c0_101, %c0_102] : memref<3x256x8xbf16, #tpu.memory_space<vmem>>, vector<1x256x8xbf16>
    %146 = vector.shape_cast %145 : vector<1x256x8xbf16> to vector<256x8xbf16>
    %cst_103 = arith.constant dense<0.000000e+00> : vector<16x8xf32>
    %147 = tpu.matmul %136, %146, %cst_103 {dimension_numbers = #tpu.dot_dimension_numbers<[1], [0], [0], [1], [0, 0, 1, 1], [], []>} : vector<16x256xbf16>, vector<256x8xbf16>, vector<16x8xf32> -> vector<16x8xf32>
    %148 = arith.addf %144, %147 : vector<16x8xf32>
    %c0_104 = arith.constant 0 : index
    %c0_105 = arith.constant 0 : index
    %149 = vector.load %arg15[%c0_104, %c0_105] : memref<1x8xf32, #tpu.memory_space<vmem>>, vector<1x8xf32>
    %150 = vector.broadcast %149 : vector<1x8xf32> to vector<16x8xf32>
    %151 = arith.addf %148, %150 : vector<16x8xf32>
    %152 = vector.shape_cast %151 : vector<16x8xf32> to vector<2x8x8xf32>
    %cst_106 = arith.constant dense<0.000000e+00> : vector<2x8x8xf32>
    %153 = tpu.matmul %0, %152, %cst_106 {dimension_numbers = #tpu.dot_dimension_numbers<[2], [1], [1], [2], [0, 0, 0, 1, 1, 2], [0], [0]>} : vector<2x8x8xf32>, vector<2x8x8xf32>, vector<2x8x8xf32> -> vector<2x8x8xf32>
    %cst_107 = arith.constant dense<0.000000e+00> : vector<2x8x8xf32>
    %154 = tpu.matmul %1, %152, %cst_107 {dimension_numbers = #tpu.dot_dimension_numbers<[2], [1], [1], [2], [0, 0, 0, 1, 1, 2], [0], [0]>} : vector<2x8x8xf32>, vector<2x8x8xf32>, vector<2x8x8xf32> -> vector<2x8x8xf32>
    %155 = vector.shape_cast %153 : vector<2x8x8xf32> to vector<16x8xf32>
    %156 = arith.truncf %155 : vector<16x8xf32> to vector<16x8xbf16>
    %157 = vector.shape_cast %154 : vector<2x8x8xf32> to vector<16x8xf32>
    %158 = arith.truncf %157 : vector<16x8xf32> to vector<16x8xbf16>
    %159 = arith.truncf %151 : vector<16x8xf32> to vector<16x8xbf16>
    %c0_108 = arith.constant 0 : index
    %c0_109 = arith.constant 0 : index
    %c0_110 = arith.constant 0 : index
    %160 = vector.load %arg16[%c0_108, %c0_109, %c0_110] : memref<3x8x256xbf16, #tpu.memory_space<vmem>>, vector<1x8x256xbf16>
    %161 = vector.shape_cast %160 : vector<1x8x256xbf16> to vector<8x256xbf16>
    %cst_111 = arith.constant dense<0.000000e+00> : vector<16x256xf32>
    %162 = tpu.matmul %156, %161, %cst_111 {dimension_numbers = #tpu.dot_dimension_numbers<[1], [0], [0], [1], [0, 0, 1, 1], [], []>} : vector<16x8xbf16>, vector<8x256xbf16>, vector<16x256xf32> -> vector<16x256xf32>
    %c1_112 = arith.constant 1 : index
    %c0_113 = arith.constant 0 : index
    %c0_114 = arith.constant 0 : index
    %163 = vector.load %arg16[%c1_112, %c0_113, %c0_114] : memref<3x8x256xbf16, #tpu.memory_space<vmem>>, vector<1x8x256xbf16>
    %164 = vector.shape_cast %163 : vector<1x8x256xbf16> to vector<8x256xbf16>
    %cst_115 = arith.constant dense<0.000000e+00> : vector<16x256xf32>
    %165 = tpu.matmul %159, %164, %cst_115 {dimension_numbers = #tpu.dot_dimension_numbers<[1], [0], [0], [1], [0, 0, 1, 1], [], []>} : vector<16x8xbf16>, vector<8x256xbf16>, vector<16x256xf32> -> vector<16x256xf32>
    %166 = arith.addf %162, %165 : vector<16x256xf32>
    %c2_116 = arith.constant 2 : index
    %c0_117 = arith.constant 0 : index
    %c0_118 = arith.constant 0 : index
    %167 = vector.load %arg16[%c2_116, %c0_117, %c0_118] : memref<3x8x256xbf16, #tpu.memory_space<vmem>>, vector<1x8x256xbf16>
    %168 = vector.shape_cast %167 : vector<1x8x256xbf16> to vector<8x256xbf16>
    %cst_119 = arith.constant dense<0.000000e+00> : vector<16x256xf32>
    %169 = tpu.matmul %158, %168, %cst_119 {dimension_numbers = #tpu.dot_dimension_numbers<[1], [0], [0], [1], [0, 0, 1, 1], [], []>} : vector<16x8xbf16>, vector<8x256xbf16>, vector<16x256xf32> -> vector<16x256xf32>
    %170 = arith.addf %166, %169 : vector<16x256xf32>
    %c0_120 = arith.constant 0 : index
    %c0_121 = arith.constant 0 : index
    %171 = vector.load %arg17[%c0_120, %c0_121] : memref<1x256xf32, #tpu.memory_space<vmem>>, vector<1x256xf32>
    %172 = vector.broadcast %171 : vector<1x256xf32> to vector<16x256xf32>
    %173 = arith.addf %170, %172 : vector<16x256xf32>
    %cst_122 = arith.constant 0.000000e+00 : f32
    %174 = vector.broadcast %cst_122 : f32 to vector<16x256xf32>
    %175 = arith.maximumf %173, %174 : vector<16x256xf32>
    %176 = vector.shape_cast %175 : vector<16x256xf32> to vector<2x8x256xf32>
    %cst_123 = arith.constant dense<0.000000e+00> : vector<2x8x256xf32>
    %177 = tpu.matmul %0, %176, %cst_123 {dimension_numbers = #tpu.dot_dimension_numbers<[2], [1], [1], [2], [0, 0, 0, 1, 1, 2], [0], [0]>} : vector<2x8x8xf32>, vector<2x8x256xf32>, vector<2x8x256xf32> -> vector<2x8x256xf32>
    %cst_124 = arith.constant dense<0.000000e+00> : vector<2x8x256xf32>
    %178 = tpu.matmul %1, %176, %cst_124 {dimension_numbers = #tpu.dot_dimension_numbers<[2], [1], [1], [2], [0, 0, 0, 1, 1, 2], [0], [0]>} : vector<2x8x8xf32>, vector<2x8x256xf32>, vector<2x8x256xf32> -> vector<2x8x256xf32>
    %179 = vector.shape_cast %177 : vector<2x8x256xf32> to vector<16x256xf32>
    %180 = arith.truncf %179 : vector<16x256xf32> to vector<16x256xbf16>
    %181 = vector.shape_cast %178 : vector<2x8x256xf32> to vector<16x256xf32>
    %182 = arith.truncf %181 : vector<16x256xf32> to vector<16x256xbf16>
    %183 = arith.truncf %175 : vector<16x256xf32> to vector<16x256xbf16>
    %c0_125 = arith.constant 0 : index
    %c0_126 = arith.constant 0 : index
    %c0_127 = arith.constant 0 : index
    %184 = vector.load %arg18[%c0_125, %c0_126, %c0_127] : memref<3x256x128xbf16, #tpu.memory_space<vmem>>, vector<1x256x128xbf16>
    %185 = vector.shape_cast %184 : vector<1x256x128xbf16> to vector<256x128xbf16>
    %cst_128 = arith.constant dense<0.000000e+00> : vector<16x128xf32>
    %186 = tpu.matmul %180, %185, %cst_128 {dimension_numbers = #tpu.dot_dimension_numbers<[1], [0], [0], [1], [0, 0, 1, 1], [], []>} : vector<16x256xbf16>, vector<256x128xbf16>, vector<16x128xf32> -> vector<16x128xf32>
    %c1_129 = arith.constant 1 : index
    %c0_130 = arith.constant 0 : index
    %c0_131 = arith.constant 0 : index
    %187 = vector.load %arg18[%c1_129, %c0_130, %c0_131] : memref<3x256x128xbf16, #tpu.memory_space<vmem>>, vector<1x256x128xbf16>
    %188 = vector.shape_cast %187 : vector<1x256x128xbf16> to vector<256x128xbf16>
    %cst_132 = arith.constant dense<0.000000e+00> : vector<16x128xf32>
    %189 = tpu.matmul %183, %188, %cst_132 {dimension_numbers = #tpu.dot_dimension_numbers<[1], [0], [0], [1], [0, 0, 1, 1], [], []>} : vector<16x256xbf16>, vector<256x128xbf16>, vector<16x128xf32> -> vector<16x128xf32>
    %190 = arith.addf %186, %189 : vector<16x128xf32>
    %c2_133 = arith.constant 2 : index
    %c0_134 = arith.constant 0 : index
    %c0_135 = arith.constant 0 : index
    %191 = vector.load %arg18[%c2_133, %c0_134, %c0_135] : memref<3x256x128xbf16, #tpu.memory_space<vmem>>, vector<1x256x128xbf16>
    %192 = vector.shape_cast %191 : vector<1x256x128xbf16> to vector<256x128xbf16>
    %cst_136 = arith.constant dense<0.000000e+00> : vector<16x128xf32>
    %193 = tpu.matmul %182, %192, %cst_136 {dimension_numbers = #tpu.dot_dimension_numbers<[1], [0], [0], [1], [0, 0, 1, 1], [], []>} : vector<16x256xbf16>, vector<256x128xbf16>, vector<16x128xf32> -> vector<16x128xf32>
    %194 = arith.addf %190, %193 : vector<16x128xf32>
    %c0_137 = arith.constant 0 : index
    %c0_138 = arith.constant 0 : index
    %195 = vector.load %arg19[%c0_137, %c0_138] : memref<1x128xf32, #tpu.memory_space<vmem>>, vector<1x128xf32>
    %196 = vector.broadcast %195 : vector<1x128xf32> to vector<16x128xf32>
    %197 = arith.addf %194, %196 : vector<16x128xf32>
    %cst_139 = arith.constant 0.000000e+00 : f32
    %198 = vector.broadcast %cst_139 : f32 to vector<16x128xf32>
    %199 = arith.maximumf %197, %198 : vector<16x128xf32>
    %200 = vector.shape_cast %199 : vector<16x128xf32> to vector<2x8x128xf32>
    %cst_140 = arith.constant dense<0.000000e+00> : vector<2x8x128xf32>
    %201 = tpu.matmul %0, %200, %cst_140 {dimension_numbers = #tpu.dot_dimension_numbers<[2], [1], [1], [2], [0, 0, 0, 1, 1, 2], [0], [0]>} : vector<2x8x8xf32>, vector<2x8x128xf32>, vector<2x8x128xf32> -> vector<2x8x128xf32>
    %cst_141 = arith.constant dense<0.000000e+00> : vector<2x8x128xf32>
    %202 = tpu.matmul %1, %200, %cst_141 {dimension_numbers = #tpu.dot_dimension_numbers<[2], [1], [1], [2], [0, 0, 0, 1, 1, 2], [0], [0]>} : vector<2x8x8xf32>, vector<2x8x128xf32>, vector<2x8x128xf32> -> vector<2x8x128xf32>
    %203 = vector.shape_cast %201 : vector<2x8x128xf32> to vector<16x128xf32>
    %204 = arith.truncf %203 : vector<16x128xf32> to vector<16x128xbf16>
    %205 = vector.shape_cast %202 : vector<2x8x128xf32> to vector<16x128xf32>
    %206 = arith.truncf %205 : vector<16x128xf32> to vector<16x128xbf16>
    %207 = arith.truncf %199 : vector<16x128xf32> to vector<16x128xbf16>
    %c0_142 = arith.constant 0 : index
    %c0_143 = arith.constant 0 : index
    %c0_144 = arith.constant 0 : index
    %208 = vector.load %arg20[%c0_142, %c0_143, %c0_144] : memref<3x128x64xbf16, #tpu.memory_space<vmem>>, vector<1x128x64xbf16>
    %209 = vector.shape_cast %208 : vector<1x128x64xbf16> to vector<128x64xbf16>
    %cst_145 = arith.constant dense<0.000000e+00> : vector<16x64xf32>
    %210 = tpu.matmul %204, %209, %cst_145 {dimension_numbers = #tpu.dot_dimension_numbers<[1], [0], [0], [1], [0, 0, 1, 1], [], []>} : vector<16x128xbf16>, vector<128x64xbf16>, vector<16x64xf32> -> vector<16x64xf32>
    %c1_146 = arith.constant 1 : index
    %c0_147 = arith.constant 0 : index
    %c0_148 = arith.constant 0 : index
    %211 = vector.load %arg20[%c1_146, %c0_147, %c0_148] : memref<3x128x64xbf16, #tpu.memory_space<vmem>>, vector<1x128x64xbf16>
    %212 = vector.shape_cast %211 : vector<1x128x64xbf16> to vector<128x64xbf16>
    %cst_149 = arith.constant dense<0.000000e+00> : vector<16x64xf32>
    %213 = tpu.matmul %207, %212, %cst_149 {dimension_numbers = #tpu.dot_dimension_numbers<[1], [0], [0], [1], [0, 0, 1, 1], [], []>} : vector<16x128xbf16>, vector<128x64xbf16>, vector<16x64xf32> -> vector<16x64xf32>
    %214 = arith.addf %210, %213 : vector<16x64xf32>
    %c2_150 = arith.constant 2 : index
    %c0_151 = arith.constant 0 : index
    %c0_152 = arith.constant 0 : index
    %215 = vector.load %arg20[%c2_150, %c0_151, %c0_152] : memref<3x128x64xbf16, #tpu.memory_space<vmem>>, vector<1x128x64xbf16>
    %216 = vector.shape_cast %215 : vector<1x128x64xbf16> to vector<128x64xbf16>
    %cst_153 = arith.constant dense<0.000000e+00> : vector<16x64xf32>
    %217 = tpu.matmul %206, %216, %cst_153 {dimension_numbers = #tpu.dot_dimension_numbers<[1], [0], [0], [1], [0, 0, 1, 1], [], []>} : vector<16x128xbf16>, vector<128x64xbf16>, vector<16x64xf32> -> vector<16x64xf32>
    %218 = arith.addf %214, %217 : vector<16x64xf32>
    %c0_154 = arith.constant 0 : index
    %c0_155 = arith.constant 0 : index
    %219 = vector.load %arg21[%c0_154, %c0_155] : memref<1x64xf32, #tpu.memory_space<vmem>>, vector<1x64xf32>
    %220 = vector.broadcast %219 : vector<1x64xf32> to vector<16x64xf32>
    %221 = arith.addf %218, %220 : vector<16x64xf32>
    %cst_156 = arith.constant 0.000000e+00 : f32
    %222 = vector.broadcast %cst_156 : f32 to vector<16x64xf32>
    %223 = arith.maximumf %221, %222 : vector<16x64xf32>
    %224 = vector.shape_cast %223 : vector<16x64xf32> to vector<2x8x64xf32>
    %cst_157 = arith.constant dense<0.000000e+00> : vector<2x8x64xf32>
    %225 = tpu.matmul %0, %224, %cst_157 {dimension_numbers = #tpu.dot_dimension_numbers<[2], [1], [1], [2], [0, 0, 0, 1, 1, 2], [0], [0]>} : vector<2x8x8xf32>, vector<2x8x64xf32>, vector<2x8x64xf32> -> vector<2x8x64xf32>
    %cst_158 = arith.constant dense<0.000000e+00> : vector<2x8x64xf32>
    %226 = tpu.matmul %1, %224, %cst_158 {dimension_numbers = #tpu.dot_dimension_numbers<[2], [1], [1], [2], [0, 0, 0, 1, 1, 2], [0], [0]>} : vector<2x8x8xf32>, vector<2x8x64xf32>, vector<2x8x64xf32> -> vector<2x8x64xf32>
    %227 = vector.shape_cast %225 : vector<2x8x64xf32> to vector<16x64xf32>
    %228 = arith.truncf %227 : vector<16x64xf32> to vector<16x64xbf16>
    %229 = vector.shape_cast %226 : vector<2x8x64xf32> to vector<16x64xf32>
    %230 = arith.truncf %229 : vector<16x64xf32> to vector<16x64xbf16>
    %231 = arith.truncf %223 : vector<16x64xf32> to vector<16x64xbf16>
    %c0_159 = arith.constant 0 : index
    %c0_160 = arith.constant 0 : index
    %c0_161 = arith.constant 0 : index
    %232 = vector.load %arg22[%c0_159, %c0_160, %c0_161] : memref<3x64x32xbf16, #tpu.memory_space<vmem>>, vector<1x64x32xbf16>
    %233 = vector.shape_cast %232 : vector<1x64x32xbf16> to vector<64x32xbf16>
    %cst_162 = arith.constant dense<0.000000e+00> : vector<16x32xf32>
    %234 = tpu.matmul %228, %233, %cst_162 {dimension_numbers = #tpu.dot_dimension_numbers<[1], [0], [0], [1], [0, 0, 1, 1], [], []>} : vector<16x64xbf16>, vector<64x32xbf16>, vector<16x32xf32> -> vector<16x32xf32>
    %c1_163 = arith.constant 1 : index
    %c0_164 = arith.constant 0 : index
    %c0_165 = arith.constant 0 : index
    %235 = vector.load %arg22[%c1_163, %c0_164, %c0_165] : memref<3x64x32xbf16, #tpu.memory_space<vmem>>, vector<1x64x32xbf16>
    %236 = vector.shape_cast %235 : vector<1x64x32xbf16> to vector<64x32xbf16>
    %cst_166 = arith.constant dense<0.000000e+00> : vector<16x32xf32>
    %237 = tpu.matmul %231, %236, %cst_166 {dimension_numbers = #tpu.dot_dimension_numbers<[1], [0], [0], [1], [0, 0, 1, 1], [], []>} : vector<16x64xbf16>, vector<64x32xbf16>, vector<16x32xf32> -> vector<16x32xf32>
    %238 = arith.addf %234, %237 : vector<16x32xf32>
    %c2_167 = arith.constant 2 : index
    %c0_168 = arith.constant 0 : index
    %c0_169 = arith.constant 0 : index
    %239 = vector.load %arg22[%c2_167, %c0_168, %c0_169] : memref<3x64x32xbf16, #tpu.memory_space<vmem>>, vector<1x64x32xbf16>
    %240 = vector.shape_cast %239 : vector<1x64x32xbf16> to vector<64x32xbf16>
    %cst_170 = arith.constant dense<0.000000e+00> : vector<16x32xf32>
    %241 = tpu.matmul %230, %240, %cst_170 {dimension_numbers = #tpu.dot_dimension_numbers<[1], [0], [0], [1], [0, 0, 1, 1], [], []>} : vector<16x64xbf16>, vector<64x32xbf16>, vector<16x32xf32> -> vector<16x32xf32>
    %242 = arith.addf %238, %241 : vector<16x32xf32>
    %c0_171 = arith.constant 0 : index
    %c0_172 = arith.constant 0 : index
    %243 = vector.load %arg23[%c0_171, %c0_172] : memref<1x32xf32, #tpu.memory_space<vmem>>, vector<1x32xf32>
    %244 = vector.broadcast %243 : vector<1x32xf32> to vector<16x32xf32>
    %245 = arith.addf %242, %244 : vector<16x32xf32>
    %cst_173 = arith.constant 0.000000e+00 : f32
    %246 = vector.broadcast %cst_173 : f32 to vector<16x32xf32>
    %247 = arith.maximumf %245, %246 : vector<16x32xf32>
    %248 = vector.shape_cast %247 : vector<16x32xf32> to vector<2x8x32xf32>
    %cst_174 = arith.constant dense<0.000000e+00> : vector<2x8x32xf32>
    %249 = tpu.matmul %0, %248, %cst_174 {dimension_numbers = #tpu.dot_dimension_numbers<[2], [1], [1], [2], [0, 0, 0, 1, 1, 2], [0], [0]>} : vector<2x8x8xf32>, vector<2x8x32xf32>, vector<2x8x32xf32> -> vector<2x8x32xf32>
    %cst_175 = arith.constant dense<0.000000e+00> : vector<2x8x32xf32>
    %250 = tpu.matmul %1, %248, %cst_175 {dimension_numbers = #tpu.dot_dimension_numbers<[2], [1], [1], [2], [0, 0, 0, 1, 1, 2], [0], [0]>} : vector<2x8x8xf32>, vector<2x8x32xf32>, vector<2x8x32xf32> -> vector<2x8x32xf32>
    %251 = vector.shape_cast %249 : vector<2x8x32xf32> to vector<16x32xf32>
    %252 = arith.truncf %251 : vector<16x32xf32> to vector<16x32xbf16>
    %253 = vector.shape_cast %250 : vector<2x8x32xf32> to vector<16x32xf32>
    %254 = arith.truncf %253 : vector<16x32xf32> to vector<16x32xbf16>
    %255 = arith.truncf %247 : vector<16x32xf32> to vector<16x32xbf16>
    %c0_176 = arith.constant 0 : index
    %c0_177 = arith.constant 0 : index
    %c0_178 = arith.constant 0 : index
    %256 = vector.load %arg24[%c0_176, %c0_177, %c0_178] : memref<3x32x16xbf16, #tpu.memory_space<vmem>>, vector<1x32x16xbf16>
    %257 = vector.shape_cast %256 : vector<1x32x16xbf16> to vector<32x16xbf16>
    %cst_179 = arith.constant dense<0.000000e+00> : vector<16x16xf32>
    %258 = tpu.matmul %252, %257, %cst_179 {dimension_numbers = #tpu.dot_dimension_numbers<[1], [0], [0], [1], [0, 0, 1, 1], [], []>} : vector<16x32xbf16>, vector<32x16xbf16>, vector<16x16xf32> -> vector<16x16xf32>
    %c1_180 = arith.constant 1 : index
    %c0_181 = arith.constant 0 : index
    %c0_182 = arith.constant 0 : index
    %259 = vector.load %arg24[%c1_180, %c0_181, %c0_182] : memref<3x32x16xbf16, #tpu.memory_space<vmem>>, vector<1x32x16xbf16>
    %260 = vector.shape_cast %259 : vector<1x32x16xbf16> to vector<32x16xbf16>
    %cst_183 = arith.constant dense<0.000000e+00> : vector<16x16xf32>
    %261 = tpu.matmul %255, %260, %cst_183 {dimension_numbers = #tpu.dot_dimension_numbers<[1], [0], [0], [1], [0, 0, 1, 1], [], []>} : vector<16x32xbf16>, vector<32x16xbf16>, vector<16x16xf32> -> vector<16x16xf32>
    %262 = arith.addf %258, %261 : vector<16x16xf32>
    %c2_184 = arith.constant 2 : index
    %c0_185 = arith.constant 0 : index
    %c0_186 = arith.constant 0 : index
    %263 = vector.load %arg24[%c2_184, %c0_185, %c0_186] : memref<3x32x16xbf16, #tpu.memory_space<vmem>>, vector<1x32x16xbf16>
    %264 = vector.shape_cast %263 : vector<1x32x16xbf16> to vector<32x16xbf16>
    %cst_187 = arith.constant dense<0.000000e+00> : vector<16x16xf32>
    %265 = tpu.matmul %254, %264, %cst_187 {dimension_numbers = #tpu.dot_dimension_numbers<[1], [0], [0], [1], [0, 0, 1, 1], [], []>} : vector<16x32xbf16>, vector<32x16xbf16>, vector<16x16xf32> -> vector<16x16xf32>
    %266 = arith.addf %262, %265 : vector<16x16xf32>
    %c0_188 = arith.constant 0 : index
    %c0_189 = arith.constant 0 : index
    %267 = vector.load %arg25[%c0_188, %c0_189] : memref<1x16xf32, #tpu.memory_space<vmem>>, vector<1x16xf32>
    %268 = vector.broadcast %267 : vector<1x16xf32> to vector<16x16xf32>
    %269 = arith.addf %266, %268 : vector<16x16xf32>
    %cst_190 = arith.constant 0.000000e+00 : f32
    %270 = vector.broadcast %cst_190 : f32 to vector<16x16xf32>
    %271 = arith.maximumf %269, %270 : vector<16x16xf32>
    %272 = vector.shape_cast %271 : vector<16x16xf32> to vector<2x8x16xf32>
    %cst_191 = arith.constant dense<0.000000e+00> : vector<2x8x16xf32>
    %273 = tpu.matmul %0, %272, %cst_191 {dimension_numbers = #tpu.dot_dimension_numbers<[2], [1], [1], [2], [0, 0, 0, 1, 1, 2], [0], [0]>} : vector<2x8x8xf32>, vector<2x8x16xf32>, vector<2x8x16xf32> -> vector<2x8x16xf32>
    %cst_192 = arith.constant dense<0.000000e+00> : vector<2x8x16xf32>
    %274 = tpu.matmul %1, %272, %cst_192 {dimension_numbers = #tpu.dot_dimension_numbers<[2], [1], [1], [2], [0, 0, 0, 1, 1, 2], [0], [0]>} : vector<2x8x8xf32>, vector<2x8x16xf32>, vector<2x8x16xf32> -> vector<2x8x16xf32>
    %275 = vector.shape_cast %273 : vector<2x8x16xf32> to vector<16x16xf32>
    %276 = arith.truncf %275 : vector<16x16xf32> to vector<16x16xbf16>
    %277 = vector.shape_cast %274 : vector<2x8x16xf32> to vector<16x16xf32>
    %278 = arith.truncf %277 : vector<16x16xf32> to vector<16x16xbf16>
    %279 = arith.truncf %271 : vector<16x16xf32> to vector<16x16xbf16>
    %c0_193 = arith.constant 0 : index
    %c0_194 = arith.constant 0 : index
    %c0_195 = arith.constant 0 : index
    %280 = vector.load %arg26[%c0_193, %c0_194, %c0_195] : memref<3x16x4xbf16, #tpu.memory_space<vmem>>, vector<1x16x4xbf16>
    %281 = vector.shape_cast %280 : vector<1x16x4xbf16> to vector<16x4xbf16>
    %cst_196 = arith.constant dense<0.000000e+00> : vector<16x4xf32>
    %282 = tpu.matmul %276, %281, %cst_196 {dimension_numbers = #tpu.dot_dimension_numbers<[1], [0], [0], [1], [0, 0, 1, 1], [], []>} : vector<16x16xbf16>, vector<16x4xbf16>, vector<16x4xf32> -> vector<16x4xf32>
    %c1_197 = arith.constant 1 : index
    %c0_198 = arith.constant 0 : index
    %c0_199 = arith.constant 0 : index
    %283 = vector.load %arg26[%c1_197, %c0_198, %c0_199] : memref<3x16x4xbf16, #tpu.memory_space<vmem>>, vector<1x16x4xbf16>
    %284 = vector.shape_cast %283 : vector<1x16x4xbf16> to vector<16x4xbf16>
    %cst_200 = arith.constant dense<0.000000e+00> : vector<16x4xf32>
    %285 = tpu.matmul %279, %284, %cst_200 {dimension_numbers = #tpu.dot_dimension_numbers<[1], [0], [0], [1], [0, 0, 1, 1], [], []>} : vector<16x16xbf16>, vector<16x4xbf16>, vector<16x4xf32> -> vector<16x4xf32>
    %286 = arith.addf %282, %285 : vector<16x4xf32>
    %c2_201 = arith.constant 2 : index
    %c0_202 = arith.constant 0 : index
    %c0_203 = arith.constant 0 : index
    %287 = vector.load %arg26[%c2_201, %c0_202, %c0_203] : memref<3x16x4xbf16, #tpu.memory_space<vmem>>, vector<1x16x4xbf16>
    %288 = vector.shape_cast %287 : vector<1x16x4xbf16> to vector<16x4xbf16>
    %cst_204 = arith.constant dense<0.000000e+00> : vector<16x4xf32>
    %289 = tpu.matmul %278, %288, %cst_204 {dimension_numbers = #tpu.dot_dimension_numbers<[1], [0], [0], [1], [0, 0, 1, 1], [], []>} : vector<16x16xbf16>, vector<16x4xbf16>, vector<16x4xf32> -> vector<16x4xf32>
    %290 = arith.addf %286, %289 : vector<16x4xf32>
    %c0_205 = arith.constant 0 : index
    %c0_206 = arith.constant 0 : index
    %291 = vector.load %arg27[%c0_205, %c0_206] : memref<1x4xf32, #tpu.memory_space<vmem>>, vector<1x4xf32>
    %292 = vector.broadcast %291 : vector<1x4xf32> to vector<16x4xf32>
    %293 = arith.addf %290, %292 : vector<16x4xf32>
    %294 = math.tanh %293 : vector<16x4xf32>
    %295 = vector.shape_cast %294 : vector<16x4xf32> to vector<2x8x4xf32>
    %c0_207 = arith.constant 0 : index
    %c0_208 = arith.constant 0 : index
    %c0_209 = arith.constant 0 : index
    %296 = vector.load %arg28[%c0_207, %c0_208, %c0_209] : memref<2x8x4xf32, #tpu.memory_space<vmem>>, vector<2x8x4xf32>
    tpu.vector_store %arg28[%c0_207, %c0_208, %c0_209], %295 {strides = array<i32>} : memref<2x8x4xf32, #tpu.memory_space<vmem>>, vector<2x8x4xf32>,
    return
  }
  func.func @transform_0(%arg0: i32) -> (i32, i32, i32) {
    %c0_i32 = arith.constant 0 : i32
    %c0_i32_0 = arith.constant 0 : i32
    %c0_i32_1 = arith.constant 0 : i32
    %c0_i32_2 = arith.constant 0 : i32
    return %c0_i32, %c0_i32_0, %c0_i32_1 : i32, i32, i32
  }
  func.func @transform_1(%arg0: i32) -> (i32, i32, i32) {
    %c0_i32 = arith.constant 0 : i32
    %c0_i32_0 = arith.constant 0 : i32
    %c0_i32_1 = arith.constant 0 : i32
    %c0_i32_2 = arith.constant 0 : i32
    return %c0_i32, %c0_i32_0, %c0_i32_1 : i32, i32, i32
  }
  func.func @transform_2(%arg0: i32) -> (i32, i32, i32) {
    %c0_i32 = arith.constant 0 : i32
    %c0_i32_0 = arith.constant 0 : i32
    %c0_i32_1 = arith.constant 0 : i32
    return %arg0, %c0_i32, %c0_i32_0 : i32, i32, i32
  }
  func.func @transform_3(%arg0: i32) -> (i32, i32, i32) {
    %c0_i32 = arith.constant 0 : i32
    %c0_i32_0 = arith.constant 0 : i32
    %c0_i32_1 = arith.constant 0 : i32
    %c0_i32_2 = arith.constant 0 : i32
    return %c0_i32, %c0_i32_0, %c0_i32_1 : i32, i32, i32
  }
  func.func @transform_4(%arg0: i32) -> (i32, i32) {
    %c0_i32 = arith.constant 0 : i32
    %c0_i32_0 = arith.constant 0 : i32
    %c0_i32_1 = arith.constant 0 : i32
    return %c0_i32, %c0_i32_0 : i32, i32
  }
  func.func @transform_5(%arg0: i32) -> (i32, i32, i32) {
    %c0_i32 = arith.constant 0 : i32
    %c0_i32_0 = arith.constant 0 : i32
    %c0_i32_1 = arith.constant 0 : i32
    %c0_i32_2 = arith.constant 0 : i32
    return %c0_i32, %c0_i32_0, %c0_i32_1 : i32, i32, i32
  }
  func.func @transform_6(%arg0: i32) -> (i32, i32) {
    %c0_i32 = arith.constant 0 : i32
    %c0_i32_0 = arith.constant 0 : i32
    %c0_i32_1 = arith.constant 0 : i32
    return %c0_i32, %c0_i32_0 : i32, i32
  }
  func.func @transform_7(%arg0: i32) -> (i32, i32, i32) {
    %c0_i32 = arith.constant 0 : i32
    %c0_i32_0 = arith.constant 0 : i32
    %c0_i32_1 = arith.constant 0 : i32
    %c0_i32_2 = arith.constant 0 : i32
    return %c0_i32, %c0_i32_0, %c0_i32_1 : i32, i32, i32
  }
  func.func @transform_8(%arg0: i32) -> (i32, i32) {
    %c0_i32 = arith.constant 0 : i32
    %c0_i32_0 = arith.constant 0 : i32
    %c0_i32_1 = arith.constant 0 : i32
    return %c0_i32, %c0_i32_0 : i32, i32
  }
  func.func @transform_9(%arg0: i32) -> (i32, i32, i32) {
    %c0_i32 = arith.constant 0 : i32
    %c0_i32_0 = arith.constant 0 : i32
    %c0_i32_1 = arith.constant 0 : i32
    %c0_i32_2 = arith.constant 0 : i32
    return %c0_i32, %c0_i32_0, %c0_i32_1 : i32, i32, i32
  }
  func.func @transform_10(%arg0: i32) -> (i32, i32) {
    %c0_i32 = arith.constant 0 : i32
    %c0_i32_0 = arith.constant 0 : i32
    %c0_i32_1 = arith.constant 0 : i32
    return %c0_i32, %c0_i32_0 : i32, i32
  }
  func.func @transform_11(%arg0: i32) -> (i32, i32, i32) {
    %c0_i32 = arith.constant 0 : i32
    %c0_i32_0 = arith.constant 0 : i32
    %c0_i32_1 = arith.constant 0 : i32
    %c0_i32_2 = arith.constant 0 : i32
    return %c0_i32, %c0_i32_0, %c0_i32_1 : i32, i32, i32
  }
  func.func @transform_12(%arg0: i32) -> (i32, i32) {
    %c0_i32 = arith.constant 0 : i32
    %c0_i32_0 = arith.constant 0 : i32
    %c0_i32_1 = arith.constant 0 : i32
    return %c0_i32, %c0_i32_0 : i32, i32
  }
  func.func @transform_13(%arg0: i32) -> (i32, i32, i32) {
    %c0_i32 = arith.constant 0 : i32
    %c0_i32_0 = arith.constant 0 : i32
    %c0_i32_1 = arith.constant 0 : i32
    %c0_i32_2 = arith.constant 0 : i32
    return %c0_i32, %c0_i32_0, %c0_i32_1 : i32, i32, i32
  }
  func.func @transform_14(%arg0: i32) -> (i32, i32) {
    %c0_i32 = arith.constant 0 : i32
    %c0_i32_0 = arith.constant 0 : i32
    %c0_i32_1 = arith.constant 0 : i32
    return %c0_i32, %c0_i32_0 : i32, i32
  }
  func.func @transform_15(%arg0: i32) -> (i32, i32, i32) {
    %c0_i32 = arith.constant 0 : i32
    %c0_i32_0 = arith.constant 0 : i32
    %c0_i32_1 = arith.constant 0 : i32
    %c0_i32_2 = arith.constant 0 : i32
    return %c0_i32, %c0_i32_0, %c0_i32_1 : i32, i32, i32
  }
  func.func @transform_16(%arg0: i32) -> (i32, i32) {
    %c0_i32 = arith.constant 0 : i32
    %c0_i32_0 = arith.constant 0 : i32
    %c0_i32_1 = arith.constant 0 : i32
    return %c0_i32, %c0_i32_0 : i32, i32
  }
  func.func @transform_17(%arg0: i32) -> (i32, i32, i32) {
    %c0_i32 = arith.constant 0 : i32
    %c0_i32_0 = arith.constant 0 : i32
    %c0_i32_1 = arith.constant 0 : i32
    %c0_i32_2 = arith.constant 0 : i32
    return %c0_i32, %c0_i32_0, %c0_i32_1 : i32, i32, i32
  }
  func.func @transform_18(%arg0: i32) -> (i32, i32) {
    %c0_i32 = arith.constant 0 : i32
    %c0_i32_0 = arith.constant 0 : i32
    %c0_i32_1 = arith.constant 0 : i32
    return %c0_i32, %c0_i32_0 : i32, i32
  }
  func.func @transform_19(%arg0: i32) -> (i32, i32, i32) {
    %c0_i32 = arith.constant 0 : i32
    %c0_i32_0 = arith.constant 0 : i32
    %c0_i32_1 = arith.constant 0 : i32
    %c0_i32_2 = arith.constant 0 : i32
    return %c0_i32, %c0_i32_0, %c0_i32_1 : i32, i32, i32
  }
  func.func @transform_20(%arg0: i32) -> (i32, i32) {
    %c0_i32 = arith.constant 0 : i32
    %c0_i32_0 = arith.constant 0 : i32
    %c0_i32_1 = arith.constant 0 : i32
    return %c0_i32, %c0_i32_0 : i32, i32
  }
  func.func @transform_21(%arg0: i32) -> (i32, i32, i32) {
    %c0_i32 = arith.constant 0 : i32
    %c0_i32_0 = arith.constant 0 : i32
    %c0_i32_1 = arith.constant 0 : i32
    %c0_i32_2 = arith.constant 0 : i32
    return %c0_i32, %c0_i32_0, %c0_i32_1 : i32, i32, i32
  }
  func.func @transform_22(%arg0: i32) -> (i32, i32) {
    %c0_i32 = arith.constant 0 : i32
    %c0_i32_0 = arith.constant 0 : i32
    %c0_i32_1 = arith.constant 0 : i32
    return %c0_i32, %c0_i32_0 : i32, i32
  }
  func.func @transform_23(%arg0: i32) -> (i32, i32, i32) {
    %c0_i32 = arith.constant 0 : i32
    %c0_i32_0 = arith.constant 0 : i32
    %c0_i32_1 = arith.constant 0 : i32
    %c0_i32_2 = arith.constant 0 : i32
    return %c0_i32, %c0_i32_0, %c0_i32_1 : i32, i32, i32
  }
  func.func @transform_24(%arg0: i32) -> (i32, i32) {
    %c0_i32 = arith.constant 0 : i32
    %c0_i32_0 = arith.constant 0 : i32
    %c0_i32_1 = arith.constant 0 : i32
    return %c0_i32, %c0_i32_0 : i32, i32
  }
  func.func @transform_25(%arg0: i32) -> (i32, i32, i32) {
    %c0_i32 = arith.constant 0 : i32
    %c0_i32_0 = arith.constant 0 : i32
    %c0_i32_1 = arith.constant 0 : i32
    %c0_i32_2 = arith.constant 0 : i32
    return %c0_i32, %c0_i32_0, %c0_i32_1 : i32, i32, i32
  }
  func.func @transform_26(%arg0: i32) -> (i32, i32) {
    %c0_i32 = arith.constant 0 : i32
    %c0_i32_0 = arith.constant 0 : i32
    %c0_i32_1 = arith.constant 0 : i32
    return %c0_i32, %c0_i32_0 : i32, i32
  }
  func.func @transform_27(%arg0: i32) -> (i32, i32, i32) {
    %c0_i32 = arith.constant 0 : i32
    %c0_i32_0 = arith.constant 0 : i32
    %c0_i32_1 = arith.constant 0 : i32
    return %arg0, %c0_i32, %c0_i32_0 : i32, i32, i32
  }
}

</mosaic_0001>

<bundles_post_ra>
// kernel: tpu_custom_call.1
= control target key start
LH: loop header
LB: loop body
LE: loop exit
PB: predicated region body
PF: predicated region fallthrough
CT: control target
= control target key end

     0   :  { %s10450_s0 = inlined_call_operand.hbm [shape: f32[2,8,8], index: 0, kind: input, shape index: {}]   ;;  %s10451_s1 = inlined_call_operand.hbm [shape: f32[2,8,8], index: 1, kind: input, shape index: {}]   ;;  %s10452_s2 = inlined_call_operand.vmem [shape: bf16[2,8,4], index: 2, kind: input, shape index: {}]   ;;  %s10453_s3 = inlined_call_operand.hbm [shape: bf16[3,4,16], index: 3, kind: input, shape index: {}]   ;;  %s10454_s4 = inlined_call_operand.vmem [shape: f32[1,16], index: 4, kind: input, shape index: {}]   ;;  %s10455_s5 = inlined_call_operand.hbm [shape: bf16[3,16,32], index: 5, kind: input, shape index: {}]   ;;  %s10456_s6 = inlined_call_operand.hbm [shape: f32[1,32], index: 6, kind: input, shape index: {}]   ;;  %s10457_s7 = inlined_call_operand.hbm [shape: bf16[3,32,64], index: 7, kind: input, shape index: {}]   ;;  %s10458_s8 = inlined_call_operand.hbm [shape: f32[1,64], index: 8, kind: input, shape index: {}]   ;;  %s10459_s9 = inlined_call_operand.vmem [shape: bf16[3,64,128], index: 9, kind: input, shape index: {}]   ;;  %s10460_s10 = inlined_call_operand.hbm [shape: f32[1,128], index: 10, kind: input, shape index: {}]   ;;  %s10461_s11 = inlined_call_operand.vmem [shape: bf16[3,128,256], index: 11, kind: input, shape index: {}]   ;;  %s10462_s12 = inlined_call_operand.hbm [shape: f32[1,256], index: 12, kind: input, shape index: {}]   ;;  %s10463_s13 = inlined_call_operand.vmem [shape: bf16[3,256,8], index: 13, kind: input, shape index: {}]   ;;  %s10464_s14 = inlined_call_operand.hbm [shape: f32[1,8], index: 14, kind: input, shape index: {}]   ;;  %s10465_s15 = inlined_call_operand.hbm [shape: bf16[3,8,256], index: 15, kind: input, shape index: {}]   ;;  %s10466_s16 = inlined_call_operand.hbm [shape: f32[1,256], index: 16, kind: input, shape index: {}]   ;;  %s10467_s17 = inlined_call_operand.vmem [shape: bf16[3,256,128], index: 17, kind: input, shape index: {}]   ;;  %s10468_s18 = inlined_call_operand.hbm [shape: f32[1,128], index: 18, kind: input, shape index: {}]   ;;  %s10469_s19 = inlined_call_operand.vmem [shape: bf16[3,128,64], index: 19, kind: input, shape index: {}]   ;;  %s10470_s20 = inlined_call_operand.hbm [shape: f32[1,64], index: 20, kind: input, shape index: {}]   ;;  %s10471_s21 = inlined_call_operand.vmem [shape: bf16[3,64,32], index: 21, kind: input, shape index: {}]   ;;  %s10472_s22 = inlined_call_operand.hbm [shape: f32[1,32], index: 22, kind: input, shape index: {}]   ;;  %s10473_s23 = inlined_call_operand.vmem [shape: bf16[3,32,16], index: 23, kind: input, shape index: {}]   ;;  %s10474_s24 = inlined_call_operand.vmem [shape: f32[1,16], index: 24, kind: input, shape index: {}]   ;;  %s10475_s25 = inlined_call_operand.vmem [shape: bf16[3,16,4], index: 25, kind: input, shape index: {}]   ;;  %s10476_s26 = inlined_call_operand.vmem [shape: f32[1,4], index: 26, kind: input, shape index: {}]   ;;  %s10477_s27 = inlined_call_operand.vmem [shape: f32[2,8,4], index: 27, kind: output, shape index: {}]  }
   0x1   :  { %10494 = sst [smem:[#allocation33_spill]] %s10450_s0 }
   0x2   :  { %10495 = sst [smem:[#allocation34_spill]] %s10451_s1 }
   0x3   :  { %10496 = sst [smem:[#allocation35_spill]] %s10452_s2 }
   0x4   :  { %10497 = sst [smem:[#allocation36_spill]] %s10453_s3 }
   0x5   :  { %10498 = sst [smem:[#allocation37_spill]] %s10454_s4 }
   0x6   :  { %10499 = sst [smem:[#allocation38_spill]] %s10455_s5 }
   0x7   :  { %10500 = sst [smem:[#allocation39_spill]] %s10456_s6 }
   0x8   :  { %10501 = sst [smem:[#allocation40_spill]] %s10457_s7 }
   0x9   :  { %10502 = sst [smem:[#allocation41_spill]] %s10458_s8 }
   0xa   :  { %10503 = sst [smem:[#allocation42_spill]] %s10459_s9 }
   0xb   :  { %10504 = sst [smem:[#allocation43_spill]] %s10460_s10 }
   0xc   :  { %10505 = sst [smem:[#allocation44_spill]] %s10461_s11 }
   0xd   :  { %10506 = sst [smem:[#allocation45_spill]] %s10475_s25 }
   0xe   :  { %10507 = sst [smem:[#allocation46_spill]] %s10476_s26 }
   0xf   :  { %10508 = sst [smem:[#allocation47_spill]] %s10477_s27 }
  0x10   :  { %32 = vsyncpa [#allocation3], 0 }
  0x11   :  { %33 = vsyncpa [#allocation5], 0 }
  0x12   :  { %34 = vsyncpa [#allocation8], 0 }
  0x13   :  { %35 = vsyncpa [#allocation11], 0 }
  0x14   :  { %36 = vsyncpa [#allocation14], 0 }
  0x15   :  { %37 = vsyncpa [#allocation17], 0 }
  0x16   :  { %38 = vsyncpa [#allocation20], 0 }
  0x17   :  { %39 = vsyncpa [#allocation23], 0  ;;  %s9044_s7 = smov [#allocation4]   ;;  %s9045_s8 = smov [#allocation7]  }
  0x18   :  { %s57_s4 = sshll.u32 %s9044_s7, 4  ;;  %s85_s30 = sshll.u32 %s9045_s8, 4  ;;  %s58_s4 = int_to_ptr.vmem [resolvable:$true] %s57_s4  ;;  %s9208_s30 = int_to_ptr.vmem [resolvable:$true] %s85_s30 }
  0x19   :  { %s10509_s28 = sld [smem:[#allocation34_spill]] }
  0x1f   :  { %s8698_s0 = scalar_lea.hbm %s10509_s28, 256 }
  0x20   :  { %p8699_p0 = scmp.ne.s32.totalorder %s10509_s28, %s8698_s0  ;;  %p8702_p1 = scmp.lt.u32.totalorder %s8698_s0, %s10509_s28 }
  0x22   :  { %p8704_p2 = pnand %p8702_p1, %p8699_p0 }
  0x24   :  { %8707 = shalt.err (!%p8704_p2)
}
  0x25   :  { %s8708_s11 = scalar_lea.vmem %s58_s4, 256  ;;  %p8713_p4 = scmp.lt.s32.totalorder %s58_s4, %s58_s4 }
  0x26   :  { %p8709_p3 = scmp.ne.s32.totalorder %s58_s4, %s8708_s11  ;;  %p8714_p5 = scmp.lt.s32.totalorder %s8708_s11, %s8708_s11 }
  0x28   :  { %p8715_p6 = por %p8714_p5, %p8713_p4 }
  0x2a   :  { %p8716_p7 = pnand %p8715_p6, %p8709_p3 }
  0x2c   :  { %8719 = shalt.err (!%p8716_p7)
}
  0x2d   :  { %s10489_s2 = smov 128   ;;  %s10491_s3 = smov 8  }
  0x2e   :  { %63 = dma.hbm_to_vmem [thread:$0]  %s10509_s28, 256, %s58_s4, [#allocation5], %s10489_s2, %s10489_s2, %s10491_s3  }
  0x2f   :  { %s10510_s0 = sld [smem:[#allocation38_spill]] }
  0x35   :  { %s8720_s10 = scalar_lea.hbm %s10510_s0, 384 }
  0x36   :  { %p8721_p8 = scmp.ne.s32.totalorder %s10510_s0, %s8720_s10  ;;  %p8724_p9 = scmp.lt.u32.totalorder %s8720_s10, %s10510_s0 }
  0x38   :  { %p8726_p10 = pnand %p8724_p9, %p8721_p8 }
  0x3a   :  { %8729 = shalt.err (!%p8726_p10)
}
  0x3b   :  { %s8730_s27 = scalar_lea.vmem %s9208_s30, 384  ;;  %p8735_p12 = scmp.lt.s32.totalorder %s9208_s30, %s9208_s30 }
  0x3c   :  { %p8731_p11 = scmp.ne.s32.totalorder %s9208_s30, %s8730_s27  ;;  %p8736_p13 = scmp.lt.s32.totalorder %s8730_s27, %s8730_s27 }
  0x3e   :  { %p8737_p0 = por %p8736_p13, %p8735_p12 }
  0x40   :  { %p8738_p1 = pnand %p8737_p0, %p8731_p11 }
  0x42   :  { %8741 = shalt.err (!%p8738_p1)
}
  0x43   :  { %s9048_s4 = smov 64   ;;  %s9049_s28 = smov 4  }
  0x44   :  { %91 = dma.hbm_to_vmem [thread:$0]  %s10510_s0, 384, %s9208_s30, [#allocation8], %s9048_s4, %s9048_s4, %s9049_s28  }
  0x45   :  { %s9050_s9 = smov [#allocation10]   ;;  %s9051_s10 = smov [#allocation13]  }
  0x46   :  { %s107_s5 = sshll.u32 %s9050_s9, 4  ;;  %s132_s29 = sshll.u32 %s9051_s10, 4  ;;  %s108_s5 = int_to_ptr.vmem [resolvable:$true] %s107_s5  ;;  %s133_s29 = int_to_ptr.vmem [resolvable:$true] %s132_s29 }
  0x47   :  { %s10511_s11 = sld [smem:[#allocation40_spill]] }
  0x4d   :  { %s8742_s27 = scalar_lea.hbm %s10511_s11, 768 }
  0x4e   :  { %p8743_p2 = scmp.ne.s32.totalorder %s10511_s11, %s8742_s27  ;;  %p8746_p3 = scmp.lt.u32.totalorder %s8742_s27, %s10511_s11 }
  0x50   :  { %p8748_p4 = pnand %p8746_p3, %p8743_p2 }
  0x52   :  { %8751 = shalt.err (!%p8748_p4)
}
  0x53   :  { %s8752_s30 = scalar_lea.vmem %s108_s5, 768  ;;  %p8757_p6 = scmp.lt.s32.totalorder %s108_s5, %s108_s5 }
  0x54   :  { %p8753_p5 = scmp.ne.s32.totalorder %s108_s5, %s8752_s30  ;;  %p8758_p7 = scmp.lt.s32.totalorder %s8752_s30, %s8752_s30 }
  0x56   :  { %p8759_p8 = por %p8758_p7, %p8757_p6 }
  0x58   :  { %p8760_p9 = pnand %p8759_p8, %p8753_p5 }
  0x5a   :  { %8763 = shalt.err (!%p8760_p9)
}
  0x5b   :  { %113 = dma.hbm_to_vmem [thread:$0]  %s10511_s11, 768, %s108_s5, [#allocation11], %s9048_s4, %s9048_s4, %s9049_s28  }
  0x5c   :  { %s10512_s3 = sld [smem:[#allocation43_spill]] }
  0x62   :  { %s8764_s9 = scalar_lea.hbm %s10512_s3, 16 }
  0x63   :  { %p8765_p10 = scmp.ne.s32.totalorder %s10512_s3, %s8764_s9  ;;  %p8768_p11 = scmp.lt.u32.totalorder %s8764_s9, %s10512_s3 }
  0x65   :  { %p8770_p12 = pnand %p8768_p11, %p8765_p10 }
  0x67   :  { %8773 = shalt.err (!%p8770_p12)
}
  0x68   :  { %s8774_s6 = scalar_lea.vmem %s133_s29, 16  ;;  %s8778_s27 = scalar_lea.vmem %s133_s29, 32 }
  0x69   :  { %p8775_p13 = scmp.ne.s32.totalorder %s133_s29, %s8774_s6  ;;  %p8779_p0 = scmp.lt.s32.totalorder %s133_s29, %s133_s29 }
  0x6a   :  { %p8780_p1 = scmp.lt.s32.totalorder %s8778_s27, %s8774_s6 }
  0x6c   :  { %p8781_p2 = por %p8780_p1, %p8779_p0 }
  0x6e   :  { %p8782_p3 = pnand %p8781_p2, %p8775_p13 }
  0x70   :  { %8785 = shalt.err (!%p8782_p3)
}
  0x71   :  { %135 = dma.hbm_to_vmem [thread:$0]  %s10512_s3, 16, %s133_s29, [#allocation14]  }
  0x72   :  { %s9052_s5 = smov [#allocation16]   ;;  %s9053_s30 = smov [#allocation19]  }
  0x73   :  { %s156_s11 = sshll.u32 %s9052_s5, 4  ;;  %s178_s0 = sshll.u32 %s9053_s30, 4  ;;  %s157_s11 = int_to_ptr.vmem [resolvable:$true] %s156_s11  ;;  %s179_s0 = int_to_ptr.vmem [resolvable:$true] %s178_s0 }
  0x74   :  { %s8786_s2 = scalar_lea.hbm %s10464_s14, 16 }
  0x75   :  { %p8787_p4 = scmp.ne.s32.totalorder %s10464_s14, %s8786_s2  ;;  %p8790_p5 = scmp.lt.u32.totalorder %s8786_s2, %s10464_s14 }
  0x77   :  { %p8792_p6 = pnand %p8790_p5, %p8787_p4 }
  0x79   :  { %8795 = shalt.err (!%p8792_p6)
}
  0x7a   :  { %s8796_s29 = scalar_lea.vmem %s157_s11, 16  ;;  %s8800_s3 = scalar_lea.vmem %s157_s11, 32 }
  0x7b   :  { %p8797_p7 = scmp.ne.s32.totalorder %s157_s11, %s8796_s29  ;;  %p8801_p8 = scmp.lt.s32.totalorder %s157_s11, %s157_s11 }
  0x7c   :  { %p8802_p9 = scmp.lt.s32.totalorder %s8800_s3, %s8796_s29 }
  0x7e   :  { %p8803_p10 = por %p8802_p9, %p8801_p8 }
  0x80   :  { %p8804_p11 = pnand %p8803_p10, %p8797_p7 }
  0x82   :  { %8807 = shalt.err (!%p8804_p11)
}
  0x83   :  { %159 = dma.hbm_to_vmem [thread:$0]  %s10464_s14, 16, %s157_s11, [#allocation17]  }
  0x84   :  { %s8808_s28 = scalar_lea.hbm %s10466_s16, 32 }
  0x85   :  { %p8809_p12 = scmp.ne.s32.totalorder %s10466_s16, %s8808_s28  ;;  %p8812_p13 = scmp.lt.u32.totalorder %s8808_s28, %s10466_s16 }
  0x87   :  { %p8814_p0 = pnand %p8812_p13, %p8809_p12 }
  0x89   :  { %8817 = shalt.err (!%p8814_p0)
}
  0x8a   :  { %s8818_s2 = scalar_lea.vmem %s179_s0, 32  ;;  %p8823_p2 = scmp.lt.s32.totalorder %s179_s0, %s179_s0 }
  0x8b   :  { %p8819_p1 = scmp.ne.s32.totalorder %s179_s0, %s8818_s2  ;;  %p8824_p3 = scmp.lt.s32.totalorder %s8818_s2, %s8818_s2 }
  0x8d   :  { %p8825_p4 = por %p8824_p3, %p8823_p2 }
  0x8f   :  { %p8826_p5 = pnand %p8825_p4, %p8819_p1 }
  0x91   :  { %8829 = shalt.err (!%p8826_p5)
}
  0x92   :  { %181 = dma.hbm_to_vmem [thread:$0]  %s10466_s16, 32, %s179_s0, [#allocation20]  }
  0x93   :  { %s9054_s9 = smov [#allocation22]   ;;  %s9055_s25 = smov [#allocation2]  }
  0x94   :  { %s202_s10 = sshll.u32 %s9054_s9, 4  ;;  %s45_s26 = sshll.u32 %s9055_s25, 4  ;;  %s203_s10 = int_to_ptr.vmem [resolvable:$true] %s202_s10  ;;  %s9290_s26 = int_to_ptr.vmem [resolvable:$true] %s45_s26 }
  0x95   :  { %s8830_s1 = scalar_lea.hbm %s10470_s20, 16 }
  0x96   :  { %p8831_p6 = scmp.ne.s32.totalorder %s10470_s20, %s8830_s1  ;;  %p8834_p7 = scmp.lt.u32.totalorder %s8830_s1, %s10470_s20 }
  0x98   :  { %p8836_p8 = pnand %p8834_p7, %p8831_p6 }
  0x9a   :  { %8839 = shalt.err (!%p8836_p8)
}
  0x9b   :  { %s8840_s16 = scalar_lea.vmem %s203_s10, 16  ;;  %s8844_s0 = scalar_lea.vmem %s203_s10, 32 }
  0x9c   :  { %p8841_p9 = scmp.ne.s32.totalorder %s203_s10, %s8840_s16  ;;  %p8845_p10 = scmp.lt.s32.totalorder %s203_s10, %s203_s10 }
  0x9d   :  { %p8846_p11 = scmp.lt.s32.totalorder %s8844_s0, %s8840_s16 }
  0x9f   :  { %p8847_p12 = por %p8846_p11, %p8845_p10 }
  0xa1   :  { %p8848_p13 = pnand %p8847_p12, %p8841_p9 }
  0xa3   :  { %8851 = shalt.err (!%p8848_p13)
}
  0xa4   :  { %205 = dma.hbm_to_vmem [thread:$0]  %s10470_s20, 16, %s203_s10, [#allocation23]  }
  0xa5   :  { %s10513_s2 = sld [smem:[#allocation33_spill]] }
  0xab   :  { %s8852_s14 = scalar_lea.hbm %s10513_s2, 256 }
  0xac   :  { %p8853_p0 = scmp.ne.s32.totalorder %s10513_s2, %s8852_s14  ;;  %p8856_p1 = scmp.lt.u32.totalorder %s8852_s14, %s10513_s2 }
  0xae   :  { %p8858_p2 = pnand %p8856_p1, %p8853_p0 }
  0xb0   :  { %8861 = shalt.err (!%p8858_p2)
}
  0xb1   :  { %s8862_s3 = scalar_lea.vmem %s9290_s26, 256  ;;  %p8867_p4 = scmp.lt.s32.totalorder %s9290_s26, %s9290_s26 }
  0xb2   :  { %p8863_p3 = scmp.ne.s32.totalorder %s9290_s26, %s8862_s3  ;;  %p8868_p5 = scmp.lt.s32.totalorder %s8862_s3, %s8862_s3 }
  0xb4   :  { %p8869_p6 = por %p8868_p5, %p8867_p4 }
  0xb6   :  { %p8870_p7 = pnand %p8869_p6, %p8863_p3 }
  0xb8   :  { %8873 = shalt.err (!%p8870_p7)
}
  0xb9   :  { %s10514_s20 = smov 8   ;;  %s10515_s10 = smov 128  }
  0xba   :  { %51 = dma.hbm_to_vmem [thread:$0]  %s10513_s2, 256, %s9290_s26, [#allocation3], %s10515_s10, %s10515_s10, %s10514_s20  }
  0xbb   :  { %s9056_s27 = smov [#allocation6]   ;;  %s10516_s0 = sld [smem:[#allocation36_spill]] }
  0xbc   :  { %s71_s4 = sshll.u32 %s9056_s27, 4  ;;  %s72_s4 = int_to_ptr.vmem [resolvable:$true] %s71_s4 }
  0xc1   :  { %s8874_s5 = scalar_lea.hbm %s10516_s0, 96 }
  0xc2   :  { %p8875_p8 = scmp.ne.s32.totalorder %s10516_s0, %s8874_s5  ;;  %p8878_p9 = scmp.lt.u32.totalorder %s8874_s5, %s10516_s0 }
  0xc4   :  { %p8880_p10 = pnand %p8878_p9, %p8875_p8 }
  0xc6   :  { %8883 = shalt.err (!%p8880_p10)
}
  0xc7   :  { %s8884_s11 = scalar_lea.vmem %s72_s4, 96  ;;  %p8889_p12 = scmp.lt.s32.totalorder %s72_s4, %s72_s4 }
  0xc8   :  { %p8885_p11 = scmp.ne.s32.totalorder %s72_s4, %s8884_s11  ;;  %p8890_p13 = scmp.lt.s32.totalorder %s8884_s11, %s8884_s11 }
  0xca   :  { %p8891_p0 = por %p8890_p13, %p8889_p12 }
  0xcc   :  { %p8892_p1 = pnand %p8891_p0, %p8885_p11 }
  0xce   :  { %8895 = shalt.err (!%p8892_p1)
}
  0xcf   :  { %s9057_s26 = smov 32   ;;  %s9058_s2 = smov 2  }
  0xd0   :  { %77 = dma.hbm_to_vmem [thread:$0]  %s10516_s0, 96, %s72_s4, [#allocation5], %s9057_s26, %s9057_s26, %s9058_s2  }
  0xd1   :  { %s9059_s29 = smov [#allocation9]   ;;  %s9060_s1 = smov [#allocation12]  }
  0xd2   :  { %s98_s3 = sshll.u32 %s9059_s29, 4  ;;  %s120_s6 = sshll.u32 %s9060_s1, 4  ;;  %s99_s3 = int_to_ptr.vmem [resolvable:$true] %s98_s3  ;;  %s121_s6 = int_to_ptr.vmem [resolvable:$true] %s120_s6 }
  0xd3   :  { %s10517_s16 = sld [smem:[#allocation39_spill]] }
  0xd9   :  { %s8896_s5 = scalar_lea.hbm %s10517_s16, 16 }
  0xda   :  { %p8897_p2 = scmp.ne.s32.totalorder %s10517_s16, %s8896_s5  ;;  %p8900_p3 = scmp.lt.u32.totalorder %s8896_s5, %s10517_s16 }
  0xdc   :  { %p8902_p4 = pnand %p8900_p3, %p8897_p2 }
  0xde   :  { %8905 = shalt.err (!%p8902_p4)
}
  0xdf   :  { %s8906_s4 = scalar_lea.vmem %s99_s3, 16  ;;  %s8910_s0 = scalar_lea.vmem %s99_s3, 32 }
  0xe0   :  { %p8907_p5 = scmp.ne.s32.totalorder %s99_s3, %s8906_s4  ;;  %p8911_p6 = scmp.lt.s32.totalorder %s99_s3, %s99_s3 }
  0xe1   :  { %p8912_p7 = scmp.lt.s32.totalorder %s8910_s0, %s8906_s4 }
  0xe3   :  { %p8913_p8 = por %p8912_p7, %p8911_p6 }
  0xe5   :  { %p8914_p9 = pnand %p8913_p8, %p8907_p5 }
  0xe7   :  { %8917 = shalt.err (!%p8914_p9)
}
  0xe8   :  { %101 = dma.hbm_to_vmem [thread:$0]  %s10517_s16, 16, %s99_s3, [#allocation8]  }
  0xe9   :  { %s10518_s25 = sld [smem:[#allocation41_spill]] }
  0xef   :  { %s8918_s29 = scalar_lea.hbm %s10518_s25, 16 }
  0xf0   :  { %p8919_p10 = scmp.ne.s32.totalorder %s10518_s25, %s8918_s29  ;;  %p8922_p11 = scmp.lt.u32.totalorder %s8918_s29, %s10518_s25 }
  0xf2   :  { %p8924_p12 = pnand %p8922_p11, %p8919_p10 }
  0xf4   :  { %8927 = shalt.err (!%p8924_p12)
}
  0xf5   :  { %s8928_s30 = scalar_lea.vmem %s121_s6, 16  ;;  %s8932_s7 = scalar_lea.vmem %s121_s6, 32 }
  0xf6   :  { %p8929_p13 = scmp.ne.s32.totalorder %s121_s6, %s8928_s30  ;;  %p8933_p0 = scmp.lt.s32.totalorder %s121_s6, %s121_s6 }
  0xf7   :  { %p8934_p1 = scmp.lt.s32.totalorder %s8932_s7, %s8928_s30 }
  0xf9   :  { %p8935_p2 = por %p8934_p1, %p8933_p0 }
  0xfb   :  { %p8936_p3 = pnand %p8935_p2, %p8929_p13 }
  0xfd   :  { %8939 = shalt.err (!%p8936_p3)
}
  0xfe   :  { %123 = dma.hbm_to_vmem [thread:$0]  %s10518_s25, 16, %s121_s6, [#allocation11]  }
  0xff   :  { %s9061_s8 = smov [#allocation15]   ;;  %s9062_s4 = smov [#allocation18]  }
 0x100   :  { %s144_s14 = sshll.u32 %s9061_s8, 4  ;;  %s165_s0 = sshll.u32 %s9062_s4, 4  ;;  %s145_s14 = int_to_ptr.vmem [resolvable:$true] %s144_s14  ;;  %s166_s0 = int_to_ptr.vmem [resolvable:$true] %s165_s0 }
 0x101   :  { %s8940_s2 = scalar_lea.hbm %s10462_s12, 32 }
 0x102   :  { %p8941_p4 = scmp.ne.s32.totalorder %s10462_s12, %s8940_s2  ;;  %p8944_p5 = scmp.lt.u32.totalorder %s8940_s2, %s10462_s12 }
 0x104   :  { %p8946_p6 = pnand %p8944_p5, %p8941_p4 }
 0x106   :  { %8949 = shalt.err (!%p8946_p6)
}
 0x107   :  { %s8950_s6 = scalar_lea.vmem %s145_s14, 32  ;;  %p8955_p8 = scmp.lt.s32.totalorder %s145_s14, %s145_s14 }
 0x108   :  { %p8951_p7 = scmp.ne.s32.totalorder %s145_s14, %s8950_s6  ;;  %p8956_p9 = scmp.lt.s32.totalorder %s8950_s6, %s8950_s6 }
 0x10a   :  { %p8957_p10 = por %p8956_p9, %p8955_p8 }
 0x10c   :  { %p8958_p11 = pnand %p8957_p10, %p8951_p7 }
 0x10e   :  { %8961 = shalt.err (!%p8958_p11)
}
 0x10f   :  { %147 = dma.hbm_to_vmem [thread:$0]  %s10462_s12, 32, %s145_s14, [#allocation14]  }
 0x110   :  { %s8962_s7 = scalar_lea.hbm %s10465_s15, 384 }
 0x111   :  { %p8963_p12 = scmp.ne.s32.totalorder %s10465_s15, %s8962_s7  ;;  %p8966_p13 = scmp.lt.u32.totalorder %s8962_s7, %s10465_s15 }
 0x113   :  { %p8968_p0 = pnand %p8966_p13, %p8963_p12 }
 0x115   :  { %8971 = shalt.err (!%p8968_p0)
}
 0x116   :  { %s8972_s11 = scalar_lea.vmem %s166_s0, 384  ;;  %p8977_p2 = scmp.lt.s32.totalorder %s166_s0, %s166_s0 }
 0x117   :  { %p8973_p1 = scmp.ne.s32.totalorder %s166_s0, %s8972_s11  ;;  %p8978_p3 = scmp.lt.s32.totalorder %s8972_s11, %s8972_s11 }
 0x119   :  { %p8979_p4 = por %p8978_p3, %p8977_p2 }
 0x11b   :  { %p8980_p5 = pnand %p8979_p4, %p8973_p1 }
 0x11d   :  { %8983 = shalt.err (!%p8980_p5)
}
 0x11e   :  { %171 = dma.hbm_to_vmem [thread:$0]  %s10465_s15, 384, %s166_s0, [#allocation17], %s10515_s10, %s10515_s10, %s10514_s20  }
 0x11f   :  { %s9063_s26 = smov [#allocation21]   ;;  %s9064_s9 = smov [#allocation24]  }
 0x120   :  { %s190_s2 = sshll.u32 %s9063_s26, 4  ;;  %s214_s29 = sshll.u32 %s9064_s9, 4  ;;  %s191_s2 = int_to_ptr.vmem [resolvable:$true] %s190_s2  ;;  %s215_s29 = int_to_ptr.vmem [resolvable:$true] %s214_s29 }
 0x121   :  { %s8984_s6 = scalar_lea.hbm %s10468_s18, 16 }
 0x122   :  { %p8985_p6 = scmp.ne.s32.totalorder %s10468_s18, %s8984_s6  ;;  %p8988_p7 = scmp.lt.u32.totalorder %s8984_s6, %s10468_s18 }
 0x124   :  { %p8990_p8 = pnand %p8988_p7, %p8985_p6 }
 0x126   :  { %8993 = shalt.err (!%p8990_p8)
}
 0x127   :  { %s8994_s15 = scalar_lea.vmem %s191_s2, 16  ;;  %s8998_s20 = scalar_lea.vmem %s191_s2, 32 }
 0x128   :  { %p8995_p9 = scmp.ne.s32.totalorder %s191_s2, %s8994_s15  ;;  %p8999_p10 = scmp.lt.s32.totalorder %s191_s2, %s191_s2 }
 0x129   :  { %p9000_p11 = scmp.lt.s32.totalorder %s8998_s20, %s8994_s15 }
 0x12b   :  { %p9001_p12 = por %p9000_p11, %p8999_p10 }
 0x12d   :  { %p9002_p13 = pnand %p9001_p12, %p8995_p9 }
 0x12f   :  { %9005 = shalt.err (!%p9002_p13)
}
 0x130   :  { %193 = dma.hbm_to_vmem [thread:$0]  %s10468_s18, 16, %s191_s2, [#allocation20]  }
 0x131   :  { %s9006_s16 = scalar_lea.hbm %s10472_s22, 16 }
 0x132   :  { %p9007_p0 = scmp.ne.s32.totalorder %s10472_s22, %s9006_s16  ;;  %p9010_p1 = scmp.lt.u32.totalorder %s9006_s16, %s10472_s22 }
 0x134   :  { %p9012_p2 = pnand %p9010_p1, %p9007_p0 }
 0x136   :  { %9015 = shalt.err (!%p9012_p2)
}
 0x137   :  { %s9016_s14 = scalar_lea.vmem %s215_s29, 16  ;;  %s9020_s26 = scalar_lea.vmem %s215_s29, 32 }
 0x138   :  { %p9017_p3 = scmp.ne.s32.totalorder %s215_s29, %s9016_s14  ;;  %p9021_p4 = scmp.lt.s32.totalorder %s215_s29, %s215_s29 }
 0x139   :  { %p9022_p5 = scmp.lt.s32.totalorder %s9020_s26, %s9016_s14 }
 0x13b   :  { %p9023_p6 = por %p9022_p5, %p9021_p4 }
 0x13d   :  { %p9024_p7 = pnand %p9023_p6, %p9017_p3 }
 0x13f   :  { %9027 = shalt.err (!%p9024_p7)
}
 0x140   :  { %217 = dma.hbm_to_vmem [thread:$0]  %s10472_s22, 16, %s215_s29, [#allocation23]  }
 0x141   :  { %9028 = dma.done.wait [#allocation3], 256  }
 0x142   :  { %9029 = vsyncadd [#allocation3], 4294967040 }
 0x143   :  { %9030 = dma.done.wait [#allocation5], 352  }
 0x144   :  { %9031 = vsyncadd [#allocation5], 4294966944 }
 0x145   :  { %9032 = dma.done.wait [#allocation8], 400  }
 0x146   :  { %9033 = vsyncadd [#allocation8], 4294966896 }
 0x147   :  { %9034 = dma.done.wait [#allocation11], 784  }
 0x148   :  { %9035 = vsyncadd [#allocation11], 4294966512 }
 0x149   :  { %9036 = dma.done.wait [#allocation14], 48  }
 0x14a   :  { %9037 = vsyncadd [#allocation14], 4294967248 }
 0x14b   :  { %9038 = dma.done.wait [#allocation17], 400  }
 0x14c   :  { %9039 = vsyncadd [#allocation17], 4294966896 }
 0x14d   :  { %9040 = dma.done.wait [#allocation20], 48  }
 0x14e   :  { %9041 = vsyncadd [#allocation20], 4294967248 }
 0x14f   :  { %9042 = dma.done.wait [#allocation23], 32  }
 0x150   :  { %9043 = vsyncadd [#allocation23], 4294967264  ;;  %v9065_v0 = vmov 0.0   ;;  %vm9066_vm0 = vmmov 0   ;;  %vm583_vm1 = vcmask 1041408   ;;  %s10519_s29 = sld [smem:[#allocation35_spill]] }
 0x151   :  { %7970 = vmatprep.subr.mxu0 %v9065_v0  ;;  %7975 = vmatprep.subr.mxu1 %v9065_v0  ;;  %v9420_v4 = vld [vmem:[#allocation2] sm:$0xff]  ;;  %vm280_vm2 = vcmask 64512   ;;  %v9422_v5 = vld [vmem:[#allocation2 + $0x8] sm:$0xff]  ;;  %vm579_vm3 = vcmask 31744   ;;  %v9425_v8 = vld [vmem:[#allocation4] sm:$0xff]  ;;  %s10520_s6 = sld [smem:[#allocation37_spill]] }
 0x152   :  { %7972 = vmatprep.mubr.msk.f32.mxu0 %vm9066_vm0, %v9065_v0  ;;  %7977 = vmatprep.mubr.msk.f32.mxu1 %vm9066_vm0, %v9065_v0  ;;  %v578_v6 = vld [vmem:[#allocation6 + $0x2] sm:$0x3]  ;;  %v9427_v9 = vld [vmem:[#allocation4 + $0x8] sm:$0xff]  ;;  %v576_v10 = vld [vmem:[#allocation6] sm:$0x3]  ;;  %vm1033_vm4 = vcmask 130048  }
 0x153   :  { %v585_v7 = vsel %vm583_vm1, %v578_v6, 0  ;;  %v632_v11 = vsel %vm583_vm1, %v576_v10, 0  ;;  %v676_v12 = vld [vmem:[#allocation6 + $0x4] sm:$0x3]  ;;  %v8445_v46 = vld [vmem:[#allocation7 + $0x8] sm:$0xff]   ;;  %v8446_v49 = vld [vmem:[#allocation7] sm:$0xff]  }
 0x154   :  { %v681_v13 = vsel %vm583_vm1, %v676_v12, 0  ;;  %v8447_v50 = vld [vmem:[#allocation7 + $0x10] sm:$0xff]   ;;  %v7146_v10 = vld [vmem:[#allocation9] ss:$0 sm:$0xff]  ;;  %vm1500_vm5 = vcmask 261120   ;;  %s10521_s5 = sld [smem:[#allocation42_spill]] }
 0x155   :  { %vm2001_vm6 = vcmask 523264   ;;  %s10522_s30 = sld [smem:[#allocation44_spill]]  ;;  %vm4040_vm7 = vcmask 1043456   ;;  %s10523_s12 = sld [smem:[#allocation45_spill]] }
 0x156   :  { %v276_v1 = vld [vmem:[%s10519_s29] sm:$0xff]   ;;  %s10525_s27 = sld [smem:[#allocation47_spill]] }
 0x157   :  { %v278_v2 = vunpack.c.l.bf16 %v276_v1  ;;  %v279_v3 = vunpack.c.h.bf16 %v276_v1  ;;  %v7135_v35 = vld [vmem:[%s10520_s6] ss:$0 sm:$0xff] }
 0x159   :  { %7971 = vmatpush3.msra.mxu0 %v278_v2  ;;  %7976 = vmatpush3.msra.mxu1 %v279_v3 }
 0x15a   :  { %7973 = vmatmul.mubr.msk.f32.vlgmr.msra.gmra.mrb[0].mxu0 %vm280_vm2, %v9420_v4  ;;  %7978 = vmatmul.mubr.msk.f32.vlgmr.msra.gmra.mrb[0].mxu1 %vm280_vm2, %v9422_v5 }
 0x15b   :  { %7980 = vmatprep.subr.mxu0 %v9065_v0  ;;  %7985 = vmatprep.subr.mxu1 %v9065_v0 }
 0x15c   :  { %7981 = vmatpush3.msra.mxu0 %v278_v2  ;;  %7982 = vmatprep.mubr.msk.f32.mxu0 %vm9066_vm0, %v9065_v0 }
 0x15d   :  { %7986 = vmatpush3.msra.mxu1 %v279_v3  ;;  %7987 = vmatprep.mubr.msk.f32.mxu1 %vm9066_vm0, %v9065_v0 }
 0x15e   :  { %7983 = vmatmul.mubr.msk.f32.vlgmr.msra.gmra.mrb[2].mxu0 %vm280_vm2, %v9425_v8  ;;  %7988 = vmatmul.mubr.msk.f32.vlgmr.msra.gmra.mrb[2].mxu1 %vm280_vm2, %v9427_v9 }
 0x15f   :  { %7990 = vmatprep.subr.bf16.mxu0 %v9065_v0  ;;  %7992 = vmatprep.mubr.msk.bf16.mxu0 %vm9066_vm0, %v9065_v0 }
 0x160   :  { %7991 = vmatpush3.bf16.msra.mxu0 %v585_v7  ;;  %7996 = vmatprep.subr.bf16.mxu1 %v9065_v0 }
 0x161   :  { %7998 = vmatprep.mubr.msk.bf16.mxu1 %vm9066_vm0, %v9065_v0  ;;  %8002 = vmatprep.subr.bf16.mxu0 %v9065_v0 }
 0x162   :  { %7997 = vmatpush3.bf16.msra.mxu1 %v632_v11 }
 0x163   :  { %7993 = vmatmul.mubr.msk.bf16.vlgmr.msra.gmra.mrb[4].mxu0 %vm579_vm3, %v276_v1  ;;  %8008 = vmatprep.subr.mxu1 %v9065_v0 }
 0x164   :  { %8004 = vmatprep.mubr.msk.bf16.mxu0 %vm9066_vm0, %v9065_v0  ;;  %8003 = vmatpush3.bf16.msra.mxu0 %v681_v13 }
 0x165   :  { %8018 = vmatprep.subr.mxu0 %v9065_v0 }
 0x22d   :  { %v350_v14 = vpop.f32.mrb[0].mxu0  ;;  %v423_v15 = vpop.f32.mrb[0].mxu1 }
 0x22e   :  { %v573_v16 = vpack.c.bf16 %v423_v15, %v350_v14  ;;  %v7974_v17 = vpop.f32.mrb[1].mxu0  ;;  %v7979_v18 = vpop.f32.mrb[1].mxu1 }
 0x230   :  { %7999 = vmatmul.mubr.msk.bf16.vlgmr.msra.gmra.mrb[4].mxu1 %vm579_vm3, %v573_v16 }
 0x231   :  { %v496_v19 = vpop.f32.mrb[2].mxu0  ;;  %v569_v20 = vpop.f32.mrb[2].mxu1  ;;  %8010 = vmatprep.mubr.msk.f32.mxu1 %vm9066_vm0, %v9065_v0 }
 0x232   :  { %v574_v21 = vpack.c.bf16 %v569_v20, %v496_v19  ;;  %v7984_v22 = vpop.f32.mrb[3].mxu0  ;;  %v7989_v23 = vpop.f32.mrb[3].mxu1 }
 0x233   :  { %v8448_v22 = vld [vmem:[#allocation10 + $0x10] sm:$0xff]   ;;  %v9498_v23 = vld [vmem:[#allocation2] sm:$0xff] }
 0x234   :  { %8005 = vmatmul.mubr.msk.bf16.vlgmr.msra.gmra.mrb[8].mxu0 %vm579_vm3, %v574_v21 }
 0x235   :  { %8020 = vmatprep.mubr.msk.f32.mxu0 %vm9066_vm0, %v9065_v0 }
 0x236   :  { %v621_v24 = vpop.f32.mrb[4].mxu0 }
 0x237   :  { %v7994_v25 = vpop.f32.mrb[5].mxu0 }
 0x238   :  { %v624_v26 = vpop.f32.mrb[6].mxu0  ;;  %v8449_v25 = vld [vmem:[#allocation10 + $0x18] sm:$0xff]  }
 0x239   :  { %v7995_v27 = vpop.f32.mrb[7].mxu0 }
 0x23a   :  { %v8450_v27 = vld [vmem:[#allocation10] sm:$0xff]  }
 0x303   :  { %v668_v28 = vpop.f32.mrb[4].mxu1 }
 0x304   :  { %v669_v29 = vadd.f32 %v668_v28, %v621_v24  ;;  %v8000_v30 = vpop.f32.mrb[5].mxu1  ;;  %v8451_v28 = vld [vmem:[#allocation10 + $0x8] sm:$0xff]  }
 0x305   :  { %v671_v31 = vpop.f32.mrb[6].mxu1  ;;  %v8453_v30 = vld [vmem:[#allocation10 + $0x28] sm:$0xff]  }
 0x306   :  { %v672_v32 = vadd.f32 %v671_v31, %v624_v26  ;;  %v8001_v33 = vpop.f32.mrb[7].mxu1  ;;  %v9509_v26 = vld [vmem:[#allocation2 + $0x8] sm:$0xff] }
 0x307   :  { %v717_v34 = vpop.f32.mrb[8].mxu0 }
 0x308   :  { %v724_v36 = vadd.f32 %v717_v34, %v669_v29  ;;  %v8006_v37 = vpop.f32.mrb[9].mxu0  ;;  %v8452_v29 = vld [vmem:[#allocation10 + $0x20] sm:$0xff]  }
 0x309   :  { %v720_v38 = vpop.f32.mrb[10].mxu0 }
 0x30a   :  { %v733_v39 = vadd.f32 %v7135_v35, %v724_v36  ;;  %v725_v40 = vadd.f32 %v720_v38, %v672_v32  ;;  %v8007_v41 = vpop.f32.mrb[11].mxu0 }
 0x30c   :  { %v735_v42 = vmul.f32 0.2, %v733_v39  ;;  %v734_v43 = vadd.f32 %v7135_v35, %v725_v40 }
 0x30e   :  { %v737_v44 = vmax.f32 %v733_v39, %v735_v42  ;;  %v736_v45 = vmul.f32 0.2, %v734_v43 }
 0x310   :  { %v738_v47 = vmax.f32 %v734_v43, %v736_v45  ;;  %8009 = vmatpush3.msra.mxu1 %v737_v44  ;;  %8019 = vmatpush3.msra.mxu0 %v737_v44 }
 0x311   :  { %8011 = vmatmul.mubr.msk.f32.vlgmr.msra.gmra.mrb[8].mxu1 %vm280_vm2, %v9420_v4  ;;  %8013 = vmatprep.subr.mxu1 %v9065_v0 }
 0x312   :  { %v1021_v48 = vpack.c.bf16 %v738_v47, %v737_v44  ;;  %8021 = vmatmul.mubr.msk.f32.vlgmr.msra.gmra.mrb[12].mxu0 %vm280_vm2, %v9425_v8  ;;  %8028 = vmatprep.subr.bf16.mxu0 %v9065_v0 }
 0x313   :  { %8014 = vmatpush3.msra.mxu1 %v738_v47  ;;  %8029 = vmatpush3.bf16.msra.mxu0 %v8445_v46 }
 0x314   :  { %8015 = vmatprep.mubr.msk.f32.mxu1 %vm9066_vm0, %v9065_v0  ;;  %8023 = vmatprep.subr.mxu1 %v9065_v0 }
 0x315   :  { %8030 = vmatprep.mubr.msk.bf16.mxu0 %vm9066_vm0, %v9065_v0  ;;  %8016 = vmatmul.mubr.msk.f32.vlgmr.msra.gmra.mrb[10].mxu1 %vm280_vm2, %v9422_v5 }
 0x316   :  { %8024 = vmatpush3.msra.mxu1 %v738_v47  ;;  %8031 = vmatmul.mubr.msk.bf16.vlgmr.msra.gmra.mrb[16].mxu0 %vm1033_vm4, %v1021_v48 }
 0x317   :  { %8025 = vmatprep.mubr.msk.f32.mxu1 %vm9066_vm0, %v9065_v0  ;;  %8034 = vmatprep.subr.bf16.mxu1 %v9065_v0 }
 0x318   :  { %8040 = vmatprep.subr.bf16.mxu0 %v9065_v0  ;;  %8042 = vmatprep.mubr.msk.bf16.mxu0 %vm9066_vm0, %v9065_v0 }
 0x319   :  { %8026 = vmatmul.mubr.msk.f32.vlgmr.msra.gmra.mrb[12].mxu1 %vm280_vm2, %v9427_v9  ;;  %8041 = vmatpush3.bf16.msra.mxu0 %v8447_v50 }
 0x31a   :  { %8036 = vmatprep.mubr.msk.bf16.mxu1 %vm9066_vm0, %v9065_v0  ;;  %8035 = vmatpush3.bf16.msra.mxu1 %v8446_v49 }
 0x31b   :  { %8046 = vmatprep.subr.mxu1 %v9065_v0  ;;  %8056 = vmatprep.subr.mxu0 %v9065_v0 }
 0x3e4   :  { %v805_v51 = vpop.f32.mrb[8].mxu1 }
 0x3e5   :  { %v8012_v52 = vpop.f32.mrb[9].mxu1  ;;  %v945_v53 = vpop.f32.mrb[12].mxu0 }
 0x3e6   :  { %v8022_v54 = vpop.f32.mrb[13].mxu0  ;;  %v7160_v52 = vld [vmem:[#allocation12] ss:$0 sm:$0xff] }
 0x3e8   :  { %v875_v55 = vpop.f32.mrb[10].mxu1 }
 0x3e9   :  { %v1019_v56 = vpack.c.bf16 %v875_v55, %v805_v51  ;;  %v1071_v57 = vpop.f32.mrb[16].mxu0  ;;  %v8017_v58 = vpop.f32.mrb[11].mxu1 }
 0x3ea   :  { %v8032_v59 = vpop.f32.mrb[17].mxu0 }
 0x3eb   :  { %v1074_v60 = vpop.f32.mrb[18].mxu0  ;;  %8037 = vmatmul.mubr.msk.bf16.vlgmr.msra.gmra.mrb[16].mxu1 %vm1033_vm4, %v1019_v56 }
 0x3ec   :  { %v8033_v61 = vpop.f32.mrb[19].mxu0  ;;  %v1015_v62 = vpop.f32.mrb[12].mxu1  ;;  %8048 = vmatprep.mubr.msk.f32.mxu1 %vm9066_vm0, %v9065_v0 }
 0x3ed   :  { %v1020_v63 = vpack.c.bf16 %v1015_v62, %v945_v53  ;;  %v8027_v1 = vpop.f32.mrb[13].mxu1 }
 0x3ee   :  { %v8454_v1 = vld [vmem:[%s10521_s5 + $0x20] sm:$0xff]  }
 0x3ef   :  { %8043 = vmatmul.mubr.msk.bf16.vlgmr.msra.gmra.mrb[20].mxu0 %vm1033_vm4, %v1020_v63 }
 0x3f0   :  { %8058 = vmatprep.mubr.msk.f32.mxu0 %vm9066_vm0, %v9065_v0 }
 0x4be   :  { %v1121_v2 = vpop.f32.mrb[16].mxu1 }
 0x4bf   :  { %v1122_v3 = vadd.f32 %v1121_v2, %v1071_v57  ;;  %v8038_v4 = vpop.f32.mrb[17].mxu1 }
 0x4c0   :  { %v1124_v5 = vpop.f32.mrb[18].mxu1  ;;  %v8455_v4 = vld [vmem:[%s10521_s5 + $0x28] sm:$0xff]  }
 0x4c1   :  { %v1125_v6 = vadd.f32 %v1124_v5, %v1074_v60  ;;  %v8039_v7 = vpop.f32.mrb[19].mxu1  ;;  %v8458_v5 = vld [vmem:[%s10521_s5] sm:$0xff]  }
 0x4c2   :  { %v1174_v9 = vpop.f32.mrb[20].mxu0  ;;  %v8459_v7 = vld [vmem:[%s10521_s5 + $0x8] sm:$0xff]  }
 0x4c3   :  { %v1181_v11 = vadd.f32 %v1174_v9, %v1122_v3  ;;  %v8044_v12 = vpop.f32.mrb[21].mxu0  ;;  %v9546_v3 = vld [vmem:[#allocation4] sm:$0xff]  ;;  %v8457_v9 = vld [vmem:[%s10521_s5 + $0x38] sm:$0xff]  }
 0x4c4   :  { %v1177_v13 = vpop.f32.mrb[22].mxu0  ;;  %v8462_v12 = vld [vmem:[%s10521_s5 + $0x48] sm:$0xff]  }
 0x4c5   :  { %v1190_v14 = vadd.f32 %v7146_v10, %v1181_v11  ;;  %v1182_v15 = vadd.f32 %v1177_v13, %v1125_v6  ;;  %v8045_v16 = vpop.f32.mrb[23].mxu0  ;;  %v8456_v6 = vld [vmem:[%s10521_s5 + $0x30] sm:$0xff]   ;;  %v8463_v13 = vld [vmem:[%s10521_s5 + $0x18] sm:$0xff]  }
 0x4c6   :  { %v8461_v11 = vld [vmem:[%s10521_s5 + $0x10] sm:$0xff]   ;;  %v8468_v16 = vld [vmem:[%s10522_s30 + $0x84] ss:$8 sps:$4 sm:$0xff]  }
 0x4c7   :  { %v1192_v17 = vmul.f32 0.2, %v1190_v14  ;;  %v1191_v18 = vadd.f32 %v7146_v10, %v1182_v15  ;;  %v8460_v10 = vld [vmem:[%s10521_s5 + $0x40] sm:$0xff]   ;;  %v8465_v15 = vld [vmem:[%s10521_s5 + $0x58] sm:$0xff]  }
 0x4c9   :  { %v1194_v19 = vmax.f32 %v1190_v14, %v1192_v17  ;;  %v1193_v20 = vmul.f32 0.2, %v1191_v18  ;;  %v8464_v14 = vld [vmem:[%s10521_s5 + $0x50] sm:$0xff]  }
 0x4cb   :  { %v1195_v21 = vmax.f32 %v1191_v18, %v1193_v20  ;;  %8047 = vmatpush3.msra.mxu1 %v1194_v19  ;;  %8057 = vmatpush3.msra.mxu0 %v1194_v19 }
 0x4cc   :  { %8049 = vmatmul.mubr.msk.f32.vlgmr.msra.gmra.mrb[14].mxu1 %vm280_vm2, %v9498_v23  ;;  %8051 = vmatprep.subr.mxu1 %v9065_v0 }
 0x4cd   :  { %v1478_v24 = vpack.c.bf16 %v1195_v21, %v1194_v19  ;;  %8066 = vmatprep.subr.bf16.mxu0 %v9065_v0  ;;  %8052 = vmatpush3.msra.mxu1 %v1195_v21 }
 0x4ce   :  { %8059 = vmatmul.mubr.msk.f32.vlgmr.msra.gmra.mrb[14].mxu0 %vm280_vm2, %v9425_v8  ;;  %8053 = vmatprep.mubr.msk.f32.mxu1 %vm9066_vm0, %v9065_v0  ;;  %v9519_v8 = vld [vmem:[#allocation4 + $0x8] sm:$0xff] }
 0x4cf   :  { %8067 = vmatpush3.bf16.msra.mxu0 %v8448_v22  ;;  %8061 = vmatprep.subr.mxu1 %v9065_v0 }
 0x4d0   :  { %8054 = vmatmul.mubr.msk.f32.vlgmr.msra.gmra.mrb[20].mxu1 %vm280_vm2, %v9509_v26  ;;  %8068 = vmatprep.subr.bf16.mxu0 %v9065_v0 }
 0x4d1   :  { %8062 = vmatpush3.msra.mxu1 %v1195_v21  ;;  %8063 = vmatprep.mubr.msk.f32.mxu1 %vm9066_vm0, %v9065_v0 }
 0x4d2   :  { %8070 = vmatprep.mubr.msk.bf16.mxu0 %vm9066_vm0, %v9065_v0  ;;  %8074 = vmatprep.subr.bf16.mxu1 %v9065_v0 }
 0x4d3   :  { %8069 = vmatpush3.bf16.msra.mxu0 %v8449_v25 }
 0x4d4   :  { %8064 = vmatmul.mubr.msk.f32.vlgmr.msra.gmra.mrb[22].mxu1 %vm280_vm2, %v9519_v8  ;;  %8082 = vmatprep.subr.bf16.mxu0 %v9065_v0 }
 0x4d5   :  { %8078 = vmatprep.mubr.msk.bf16.mxu1 %vm9066_vm0, %v9065_v0  ;;  %8075 = vmatpush3.bf16.msra.mxu1 %v8450_v27  ;;  %v8466_v27 = vld [vmem:[%s10522_s30 + $0x80] ss:$8 sps:$4 sm:$0xff]  }
 0x4d6   :  { %8071 = vmatmul.mubr.msk.bf16.vlgmr.msra.gmra.mrb[24].mxu0 %vm1500_vm5, %v1478_v24  ;;  %8076 = vmatprep.subr.bf16.mxu1 %v9065_v0 }
 0x4d7   :  { %8086 = vmatprep.mubr.msk.bf16.mxu0 %vm9066_vm0, %v9065_v0  ;;  %8083 = vmatpush3.bf16.msra.mxu0 %v8452_v29 }
 0x4d8   :  { %8084 = vmatprep.subr.bf16.mxu0 %v9065_v0 }
 0x4d9   :  { %8077 = vmatpush3.bf16.msra.mxu1 %v8451_v28 }
 0x4da   :  { %8090 = vmatprep.subr.mxu1 %v9065_v0 }
 0x4db   :  { %8085 = vmatpush3.bf16.msra.mxu0 %v8453_v30  ;;  %v8471_v30 = vld [vmem:[%s10522_s30 + $0x94] ss:$8 sps:$4 sm:$0xff]  }
 0x4dc   :  { %8100 = vmatprep.subr.mxu0 %v9065_v0 }
 0x59f   :  { %v1262_v31 = vpop.f32.mrb[14].mxu1 }
 0x5a0   :  { %v8050_v32 = vpop.f32.mrb[15].mxu1 }
 0x5a1   :  { %v1402_v33 = vpop.f32.mrb[14].mxu0  ;;  %v8474_v32 = vld [vmem:[%s10522_s30 + $0xa4] ss:$8 sps:$4 sm:$0xff]  }
 0x5a2   :  { %v8060_v34 = vpop.f32.mrb[15].mxu0 }
 0x5a3   :  { %v1332_v35 = vpop.f32.mrb[20].mxu1  ;;  %v8477_v34 = vld [vmem:[%s10522_s30 + $0xb4] ss:$8 sps:$4 sm:$0xff]  }
 0x5a4   :  { %v1476_v36 = vpack.c.bf16 %v1332_v35, %v1262_v31  ;;  %v8055_v37 = vpop.f32.mrb[21].mxu1  ;;  %v8469_v31 = vld [vmem:[%s10522_s30 + $0x90] ss:$8 sps:$4 sm:$0xff]  }
 0x5a6   :  { %8079 = vmatmul.mubr.msk.bf16.vlgmr.msra.gmra.mrb[24].mxu1 %vm1500_vm5, %v1476_v36 }
 0x5a7   :  { %v1472_v38 = vpop.f32.mrb[22].mxu1  ;;  %8092 = vmatprep.mubr.msk.f32.mxu1 %vm9066_vm0, %v9065_v0 }
 0x5a8   :  { %v1477_v39 = vpack.c.bf16 %v1472_v38, %v1402_v33  ;;  %v8065_v40 = vpop.f32.mrb[23].mxu1  ;;  %v8472_v33 = vld [vmem:[%s10522_s30 + $0xa0] ss:$8 sps:$4 sm:$0xff]   ;;  %v8475_v38 = vld [vmem:[%s10522_s30 + $0xb0] ss:$8 sps:$4 sm:$0xff]  }
 0x5a9   :  { %v1538_v41 = vpop.f32.mrb[24].mxu0  ;;  %v8478_v40 = vld [vmem:[%s10522_s30 + $0xc0] ss:$8 sps:$4 sm:$0xff]  }
 0x5aa   :  { %v8072_v42 = vpop.f32.mrb[25].mxu0  ;;  %8087 = vmatmul.mubr.msk.bf16.vlgmr.msra.gmra.mrb[28].mxu0 %vm1500_vm5, %v1477_v39 }
 0x5ab   :  { %v1541_v43 = vpop.f32.mrb[26].mxu0  ;;  %8102 = vmatprep.mubr.msk.f32.mxu0 %vm9066_vm0, %v9065_v0  ;;  %v8483_v42 = vld [vmem:[%s10522_s30 + $0xd4] ss:$8 sps:$4 sm:$0xff]  }
 0x5ac   :  { %v8073_v44 = vpop.f32.mrb[27].mxu0 }
 0x5ad   :  { %v8486_v44 = vld [vmem:[%s10522_s30 + $0xe4] ss:$8 sps:$4 sm:$0xff]  }
 0x679   :  { %v1594_v45 = vpop.f32.mrb[24].mxu1 }
 0x67a   :  { %v1595_v46 = vadd.f32 %v1594_v45, %v1538_v41  ;;  %v8080_v47 = vpop.f32.mrb[25].mxu1  ;;  %v8480_v41 = vld [vmem:[%s10522_s30 + $0xc4] ss:$8 sps:$4 sm:$0xff]   ;;  %v8484_v45 = vld [vmem:[%s10522_s30 + $0xe0] ss:$8 sps:$4 sm:$0xff]  }
 0x67b   :  { %v1597_v48 = vpop.f32.mrb[26].mxu1  ;;  %v8489_v47 = vld [vmem:[%s10522_s30 + $0xf4] ss:$8 sps:$4 sm:$0xff]  }
 0x67c   :  { %v1598_v49 = vadd.f32 %v1597_v48, %v1541_v43  ;;  %v8081_v50 = vpop.f32.mrb[27].mxu1  ;;  %v8481_v43 = vld [vmem:[%s10522_s30 + $0xd0] ss:$8 sps:$4 sm:$0xff]   ;;  %v9067_v48 = vmov 0  }
 0x67d   :  { %v1655_v51 = vpop.f32.mrb[28].mxu0 }
 0x67e   :  { %v1662_v53 = vadd.f32 %v1655_v51, %v1595_v46  ;;  %v8088_v54 = vpop.f32.mrb[29].mxu0  ;;  %v8487_v46 = vld [vmem:[%s10522_s30 + $0xf0] ss:$8 sps:$4 sm:$0xff]  }
 0x67f   :  { %v1658_v55 = vpop.f32.mrb[30].mxu0 }
 0x680   :  { %v1671_v56 = vadd.f32 %v7160_v52, %v1662_v53  ;;  %v1663_v57 = vadd.f32 %v1658_v55, %v1598_v49  ;;  %v8089_v58 = vpop.f32.mrb[31].mxu0  ;;  %v8492_v49 = vld [vmem:[%s10522_s30 + $0x4] ss:$8 sps:$4 sm:$0xff]  }
 0x682   :  { %v1673_v59 = vmul.f32 0.2, %v1671_v56  ;;  %v1672_v60 = vadd.f32 %v7160_v52, %v1663_v57  ;;  %v7196_v57 = vld [vmem:[#allocation13] ss:$0 sm:$0xff] }
 0x684   :  { %v1675_v61 = vmax.f32 %v1671_v56, %v1673_v59  ;;  %v1674_v62 = vmul.f32 0.2, %v1672_v60 }
 0x686   :  { %v1676_v63 = vmax.f32 %v1672_v60, %v1674_v62  ;;  %8091 = vmatpush3.msra.mxu1 %v1675_v61  ;;  %8101 = vmatpush3.msra.mxu0 %v1675_v61 }
 0x687   :  { %8093 = vmatmul.mubr.msk.f32.vlgmr.msra.gmra.mrb[28].mxu1 %vm280_vm2, %v9498_v23  ;;  %8095 = vmatprep.subr.mxu1 %v9065_v0 }
 0x688   :  { %v1959_v2 = vpack.c.bf16 %v1676_v63, %v1675_v61  ;;  %8110 = vmatprep.subr.bf16.mxu0 %v9065_v0  ;;  %8096 = vmatpush3.msra.mxu1 %v1676_v63 }
 0x689   :  { %8103 = vmatmul.mubr.msk.f32.vlgmr.msra.gmra.mrb[32].mxu0 %vm280_vm2, %v9546_v3  ;;  %8097 = vmatprep.mubr.msk.f32.mxu1 %vm9066_vm0, %v9065_v0 }
 0x68a   :  { %8111 = vmatpush3.bf16.msra.mxu0 %v8454_v1  ;;  %8105 = vmatprep.subr.mxu1 %v9065_v0 }
 0x68b   :  { %8098 = vmatmul.mubr.msk.f32.vlgmr.msra.gmra.mrb[30].mxu1 %vm280_vm2, %v9509_v26  ;;  %8112 = vmatprep.subr.bf16.mxu0 %v9065_v0 }
 0x68c   :  { %8106 = vmatpush3.msra.mxu1 %v1676_v63  ;;  %8107 = vmatprep.mubr.msk.f32.mxu1 %vm9066_vm0, %v9065_v0 }
 0x68d   :  { %8118 = vmatprep.mubr.msk.bf16.mxu0 %vm9066_vm0, %v9065_v0  ;;  %8122 = vmatprep.subr.bf16.mxu1 %v9065_v0 }
 0x68e   :  { %8113 = vmatpush3.bf16.msra.mxu0 %v8455_v4 }
 0x68f   :  { %8108 = vmatmul.mubr.msk.f32.vlgmr.msra.gmra.mrb[32].mxu1 %vm280_vm2, %v9519_v8  ;;  %8114 = vmatprep.subr.bf16.mxu0 %v9065_v0 }
 0x690   :  { %8123 = vmatpush3.bf16.msra.mxu1 %v8458_v5  ;;  %8130 = vmatprep.mubr.msk.bf16.mxu1 %vm9066_vm0, %v9065_v0 }
 0x691   :  { %8124 = vmatprep.subr.bf16.mxu1 %v9065_v0 }
 0x692   :  { %8115 = vmatpush3.bf16.msra.mxu0 %v8456_v6 }
 0x693   :  { %8116 = vmatprep.subr.bf16.mxu0 %v9065_v0 }
 0x694   :  { %8125 = vmatpush3.bf16.msra.mxu1 %v8459_v7  ;;  %v8490_v7 = vld [vmem:[%s10522_s30] ss:$8 sps:$4 sm:$0xff]  }
 0x695   :  { %8126 = vmatprep.subr.bf16.mxu1 %v9065_v0 }
 0x696   :  { %8117 = vmatpush3.bf16.msra.mxu0 %v8457_v9 }
 0x697   :  { %8134 = vmatprep.subr.bf16.mxu0 %v9065_v0 }
 0x698   :  { %8127 = vmatpush3.bf16.msra.mxu1 %v8461_v11  ;;  %v8493_v11 = vld [vmem:[%s10522_s30 + $0x10] ss:$8 sps:$4 sm:$0xff]  }
 0x699   :  { %8119 = vmatmul.mubr.msk.bf16.vlgmr.msra.gmra.mrb[36].mxu0 %vm2001_vm6, %v1959_v2  ;;  %8128 = vmatprep.subr.bf16.mxu1 %v9065_v0 }
 0x69a   :  { %8135 = vmatpush3.bf16.msra.mxu0 %v8460_v10  ;;  %8142 = vmatprep.mubr.msk.bf16.mxu0 %vm9066_vm0, %v9065_v0  ;;  %v8495_v10 = vld [vmem:[%s10522_s30 + $0x14] ss:$8 sps:$4 sm:$0xff]  }
 0x69b   :  { %8136 = vmatprep.subr.bf16.mxu0 %v9065_v0 }
 0x69c   :  { %8129 = vmatpush3.bf16.msra.mxu1 %v8463_v13  ;;  %v8496_v13 = vld [vmem:[%s10522_s30 + $0x20] ss:$8 sps:$4 sm:$0xff]  }
 0x69d   :  { %8146 = vmatprep.subr.mxu1 %v9065_v0 }
 0x69e   :  { %8137 = vmatpush3.bf16.msra.mxu0 %v8462_v12  ;;  %v8498_v12 = vld [vmem:[%s10522_s30 + $0x24] ss:$8 sps:$4 sm:$0xff]  }
 0x69f   :  { %8138 = vmatprep.subr.bf16.mxu0 %v9065_v0 }
 0x6a2   :  { %8139 = vmatpush3.bf16.msra.mxu0 %v8464_v14  ;;  %v8501_v14 = vld [vmem:[%s10522_s30 + $0x34] ss:$8 sps:$4 sm:$0xff]  }
 0x6a3   :  { %8140 = vmatprep.subr.bf16.mxu0 %v9065_v0 }
 0x6a6   :  { %8141 = vmatpush3.bf16.msra.mxu0 %v8465_v15  ;;  %v8499_v15 = vld [vmem:[%s10522_s30 + $0x30] ss:$8 sps:$4 sm:$0xff]  }
 0x6a7   :  { %2602 = vmatprep.subr.bf16.mxu0 %v8468_v16  ;;  %v8504_v16 = vld [vmem:[%s10522_s30 + $0x44] ss:$8 sps:$4 sm:$0xff]  }
 0x75a   :  { %v1743_v17 = vpop.f32.mrb[28].mxu1 }
 0x75b   :  { %v8094_v18 = vpop.f32.mrb[29].mxu1 }
 0x75c   :  { %v1883_v19 = vpop.f32.mrb[32].mxu0  ;;  %v8507_v18 = vld [vmem:[%s10522_s30 + $0x54] ss:$8 sps:$4 sm:$0xff]  }
 0x75d   :  { %v8104_v20 = vpop.f32.mrb[33].mxu0 }
 0x75e   :  { %v1813_v21 = vpop.f32.mrb[30].mxu1  ;;  %v8510_v20 = vld [vmem:[%s10522_s30 + $0x64] ss:$8 sps:$4 sm:$0xff]  }
 0x75f   :  { %v1957_v22 = vpack.c.bf16 %v1813_v21, %v1743_v17  ;;  %v8099_v24 = vpop.f32.mrb[31].mxu1  ;;  %v8502_v17 = vld [vmem:[%s10522_s30 + $0x40] ss:$8 sps:$4 sm:$0xff]  }
 0x760   :  { %v8508_v21 = vld [vmem:[%s10522_s30 + $0x60] ss:$8 sps:$4 sm:$0xff]   ;;  %v8513_v24 = vld [vmem:[%s10522_s30 + $0x74] ss:$8 sps:$4 sm:$0xff]  }
 0x761   :  { %8131 = vmatmul.mubr.msk.bf16.vlgmr.msra.gmra.mrb[36].mxu1 %vm2001_vm6, %v1957_v22  ;;  %v8511_v22 = vld [vmem:[%s10522_s30 + $0x70] ss:$8 sps:$4 sm:$0xff]  }
 0x762   :  { %v1953_v25 = vpop.f32.mrb[32].mxu1  ;;  %8148 = vmatprep.mubr.msk.f32.mxu1 %vm9066_vm0, %v9065_v0 }
 0x763   :  { %v1958_v28 = vpack.c.bf16 %v1953_v25, %v1883_v19  ;;  %v8109_v29 = vpop.f32.mrb[33].mxu1  ;;  %v8505_v19 = vld [vmem:[%s10522_s30 + $0x50] ss:$8 sps:$4 sm:$0xff]   ;;  %v8516_v25 = vld [vmem:[%s10522_s30 + $0x104] ss:$8 sps:$4 sm:$0xff]  }
 0x765   :  { %8143 = vmatmul.mubr.msk.bf16.vlgmr.msra.gmra.mrb[40].mxu0 %vm2001_vm6, %v1958_v28 }
 0x766   :  { %2603 = vmatpush1.bf16.msra.mxu0 %v8466_v27  ;;  %2634 = vmatprep.mubr.bf16.mxu0 %v9067_v48 }
 0x767   :  { %2604 = vmatprep.subr.bf16.mxu0 %v8471_v30  ;;  %v8514_v30 = vld [vmem:[%s10522_s30 + $0x100] ss:$8 sps:$4 sm:$0xff]  }
 0x76a   :  { %2605 = vmatpush1.bf16.msra.mxu0 %v8469_v31 }
 0x76b   :  { %2606 = vmatprep.subr.bf16.mxu0 %v8474_v32 }
 0x76c   :  { %v2039_v35 = vpop.f32.mrb[36].mxu0 }
 0x76d   :  { %v8120_v36 = vpop.f32.mrb[37].mxu0 }
 0x76e   :  { %v2042_v37 = vpop.f32.mrb[38].mxu0  ;;  %2607 = vmatpush1.bf16.msra.mxu0 %v8472_v33  ;;  %v8519_v33 = vld [vmem:[%s10522_s30 + $0x114] ss:$8 sps:$4 sm:$0xff]   ;;  %v8522_v36 = vld [vmem:[%s10522_s30 + $0x124] ss:$8 sps:$4 sm:$0xff]  }
 0x76f   :  { %v8121_v39 = vpop.f32.mrb[39].mxu0  ;;  %2608 = vmatprep.subr.bf16.mxu0 %v8477_v34  ;;  %v8517_v34 = vld [vmem:[%s10522_s30 + $0x110] ss:$8 sps:$4 sm:$0xff]  }
 0x772   :  { %2609 = vmatpush1.bf16.msra.mxu0 %v8475_v38  ;;  %v8520_v38 = vld [vmem:[%s10522_s30 + $0x120] ss:$8 sps:$4 sm:$0xff]  }
 0x773   :  { %2610 = vmatprep.subr.bf16.mxu0 %v8480_v41 }
 0x776   :  { %2611 = vmatpush1.bf16.msra.mxu0 %v8478_v40  ;;  %v8525_v40 = vld [vmem:[%s10522_s30 + $0x134] ss:$8 sps:$4 sm:$0xff]  }
 0x777   :  { %2612 = vmatprep.subr.bf16.mxu0 %v8483_v42 }
 0x77a   :  { %2613 = vmatpush1.bf16.msra.mxu0 %v8481_v43  ;;  %v8523_v43 = vld [vmem:[%s10522_s30 + $0x130] ss:$8 sps:$4 sm:$0xff]  }
 0x77b   :  { %2614 = vmatprep.subr.bf16.mxu0 %v8486_v44  ;;  %v8528_v44 = vld [vmem:[%s10522_s30 + $0x144] ss:$8 sps:$4 sm:$0xff]  }
 0x77e   :  { %2615 = vmatpush1.bf16.msra.mxu0 %v8484_v45  ;;  %v8526_v45 = vld [vmem:[%s10522_s30 + $0x140] ss:$8 sps:$4 sm:$0xff]  }
 0x77f   :  { %2616 = vmatprep.subr.bf16.mxu0 %v8489_v47  ;;  %v8529_v47 = vld [vmem:[%s10522_s30 + $0x150] ss:$8 sps:$4 sm:$0xff]  }
 0x782   :  { %2617 = vmatpush1.bf16.msra.mxu0 %v8487_v46  ;;  %v8531_v46 = vld [vmem:[%s10522_s30 + $0x154] ss:$8 sps:$4 sm:$0xff]  }
 0x783   :  { %2725 = vmatprep.subr.bf16.mxu0 %v8492_v49  ;;  %v8534_v49 = vld [vmem:[%s10522_s30 + $0x164] ss:$8 sps:$4 sm:$0xff]  }
 0x834   :  { %v2107_v50 = vpop.f32.mrb[36].mxu1 }
 0x835   :  { %v2108_v51 = vadd.f32 %v2107_v50, %v2039_v35  ;;  %v8132_v52 = vpop.f32.mrb[37].mxu1  ;;  %v8532_v50 = vld [vmem:[%s10522_s30 + $0x160] ss:$8 sps:$4 sm:$0xff]  }
 0x836   :  { %v2110_v53 = vpop.f32.mrb[38].mxu1  ;;  %v8535_v52 = vld [vmem:[%s10522_s30 + $0x170] ss:$8 sps:$4 sm:$0xff]  }
 0x837   :  { %v2111_v54 = vadd.f32 %v2110_v53, %v2042_v37  ;;  %v8133_v55 = vpop.f32.mrb[39].mxu1  ;;  %v2914_v53 = vlaneseq }
 0x838   :  { %v2184_v56 = vpop.f32.mrb[40].mxu0 }
 0x839   :  { %v2191_v58 = vadd.f32 %v2184_v56, %v2108_v51  ;;  %v8144_v59 = vpop.f32.mrb[41].mxu0  ;;  %v8537_v51 = vld [vmem:[%s10522_s30 + $0x174] ss:$8 sps:$4 sm:$0xff]  }
 0x83a   :  { %v2187_v60 = vpop.f32.mrb[42].mxu0  ;;  %v2912_v56 = vld [vmem:[#allocation15] sm:$0x3] }
 0x83b   :  { %v2200_v61 = vadd.f32 %v7196_v57, %v2191_v58  ;;  %v2192_v62 = vadd.f32 %v2187_v60, %v2111_v54  ;;  %v8145_v63 = vpop.f32.mrb[43].mxu0  ;;  %v9783_v54 = vshrl.u32 %v2914_v53, 7 }
 0x83d   :  { %v2202_v1 = vmul.f32 0.2, %v2200_v61  ;;  %v2201_v2 = vadd.f32 %v7196_v57, %v2192_v62  ;;  %v2916_v55 = vsub.s32 0, %v9783_v54  ;;  %v2920_v57 = vsub.s32 1, %v9783_v54 }
 0x83f   :  { %v2204_v4 = vmax.f32 %v2200_v61, %v2202_v1  ;;  %v2203_v5 = vmul.f32 0.2, %v2201_v2  ;;  %v2917_v58 = vrot.slane %v2912_v56, %v2916_v55  ;;  %v2921_v59 = vrot.slane %v2912_v56, %v2920_v57 }
 0x841   :  { %v2205_v6 = vmax.f32 %v2201_v2, %v2203_v5  ;;  %8147 = vmatpush3.msra.mxu1 %v2204_v4 }
 0x842   :  { %8149 = vmatmul.mubr.msk.f32.vlgmr.msra.gmra.mrb[34].mxu1 %vm280_vm2, %v9498_v23  ;;  %8151 = vmatprep.subr.mxu1 %v9065_v0 }
 0x843   :  { %8152 = vmatpush3.msra.mxu1 %v2205_v6  ;;  %8153 = vmatprep.mubr.msk.f32.mxu1 %vm9066_vm0, %v9065_v0  ;;  %v2488_v9 = vpack.c.bf16 %v2205_v6, %v2204_v4 }
 0x844   :  { %8156 = vmatprep.subr.mxu1 %v9065_v0 }
 0x845   :  { %2635 = vmatmul.mubr.bf16.vlgmr.msra.gmra.mrb[44].mxu0 %v2488_v9 }
 0x846   :  { %8154 = vmatmul.mubr.msk.f32.vlgmr.msra.gmra.mrb[40].mxu1 %vm280_vm2, %v9509_v26  ;;  %2726 = vmatpush1.bf16.msra.mxu0 %v8490_v7 }
 0x847   :  { %8157 = vmatpush3.msra.mxu1 %v2204_v4  ;;  %8158 = vmatprep.mubr.msk.f32.mxu1 %vm9066_vm0, %v9065_v0 }
 0x848   :  { %8161 = vmatprep.subr.mxu1 %v9065_v0  ;;  %2727 = vmatprep.subr.bf16.mxu0 %v8495_v10 }
 0x849   :  { %2757 = vmatprep.mubr.bf16.mxu0 %v9067_v48 }
 0x84a   :  { %8159 = vmatmul.mubr.msk.f32.vlgmr.msra.gmra.mrb[42].mxu1 %vm280_vm2, %v9546_v3  ;;  %2728 = vmatpush1.bf16.msra.mxu0 %v8493_v11 }
 0x84b   :  { %8162 = vmatpush3.msra.mxu1 %v2205_v6  ;;  %8163 = vmatprep.mubr.msk.f32.mxu1 %vm9066_vm0, %v9065_v0 }
 0x84c   :  { %2729 = vmatprep.subr.bf16.mxu0 %v8498_v12 }
 0x84e   :  { %8164 = vmatmul.mubr.msk.f32.vlgmr.msra.gmra.mrb[44].mxu1 %vm280_vm2, %v9519_v8  ;;  %2730 = vmatpush1.bf16.msra.mxu0 %v8496_v13 }
 0x84f   :  { %2731 = vmatprep.subr.bf16.mxu0 %v8501_v14  ;;  %3000 = vmatprep.mubr.f32.mxu1 %v9065_v0 }
 0x852   :  { %2732 = vmatpush1.bf16.msra.mxu0 %v8499_v15 }
 0x853   :  { %2733 = vmatprep.subr.bf16.mxu0 %v8504_v16 }
 0x856   :  { %2734 = vmatpush1.bf16.msra.mxu0 %v8502_v17  ;;  %v8538_v17 = vld [vmem:[%s10463_s13 + $0xc0] sm:$0xff]  }
 0x857   :  { %2735 = vmatprep.subr.bf16.mxu0 %v8507_v18  ;;  %v8539_v18 = vld [vmem:[%s10463_s13 + $0x80] sm:$0xff]  }
 0x85a   :  { %2736 = vmatpush1.bf16.msra.mxu0 %v8505_v19  ;;  %v8540_v19 = vld [vmem:[%s10463_s13 + $0xc8] sm:$0xff]  }
 0x85b   :  { %2737 = vmatprep.subr.bf16.mxu0 %v8510_v20  ;;  %v8541_v20 = vld [vmem:[%s10463_s13 + $0x88] sm:$0xff]  }
 0x85e   :  { %2738 = vmatpush1.bf16.msra.mxu0 %v8508_v21  ;;  %v8542_v21 = vld [vmem:[%s10463_s13 + $0xd0] sm:$0xff]  }
 0x85f   :  { %2739 = vmatprep.subr.bf16.mxu0 %v8513_v24  ;;  %v8544_v24 = vld [vmem:[%s10463_s13 + $0xd8] sm:$0xff]  }
 0x862   :  { %2740 = vmatpush1.bf16.msra.mxu0 %v8511_v22  ;;  %v8543_v22 = vld [vmem:[%s10463_s13 + $0x90] sm:$0xff]  }
 0x863   :  { %2865 = vmatprep.subr.bf16.mxu0 %v8516_v25  ;;  %v8545_v25 = vld [vmem:[%s10463_s13 + $0x98] sm:$0xff]  }
 0x915   :  { %v2272_v27 = vpop.f32.mrb[34].mxu1 }
 0x916   :  { %v8150_v28 = vpop.f32.mrb[35].mxu1 }
 0x917   :  { %v8547_v28 = vld [vmem:[%s10463_s13 + $0xa0] sm:$0xff]  }
 0x919   :  { %v2342_v29 = vpop.f32.mrb[40].mxu1 }
 0x91a   :  { %v2486_v31 = vpack.c.bf16 %v2342_v29, %v2272_v27  ;;  %v8155_v32 = vpop.f32.mrb[41].mxu1  ;;  %v8546_v27 = vld [vmem:[%s10463_s13 + $0xe0] sm:$0xff]   ;;  %v8548_v29 = vld [vmem:[%s10463_s13 + $0xe8] sm:$0xff]  }
 0x91b   :  { %v8551_v32 = vld [vmem:[%s10463_s13 + $0xb0] sm:$0xff]  }
 0x91c   :  { %2758 = vmatmul.mubr.bf16.vlgmr.msra.gmra.mrb[44].mxu0 %v2486_v31  ;;  %v8550_v31 = vld [vmem:[%s10463_s13 + $0xf0] sm:$0xff]  }
 0x91d   :  { %2866 = vmatpush1.bf16.msra.mxu0 %v8514_v30  ;;  %v2412_v35 = vpop.f32.mrb[42].mxu1  ;;  %2897 = vmatprep.mubr.bf16.mxu0 %v9067_v48  ;;  %v8549_v30 = vld [vmem:[%s10463_s13 + $0xa8] sm:$0xff]  }
 0x91e   :  { %2867 = vmatprep.subr.bf16.mxu0 %v8519_v33  ;;  %v8160_v37 = vpop.f32.mrb[43].mxu1  ;;  %v8552_v33 = vld [vmem:[%s10463_s13 + $0xf8] sm:$0xff]  }
 0x91f   :  { %v8556_v37 = vld [vmem:[%s10463_s13 + $0x48] sm:$0xff]  }
 0x921   :  { %2868 = vmatpush1.bf16.msra.mxu0 %v8517_v34  ;;  %v2482_v39 = vpop.f32.mrb[44].mxu1  ;;  %v8553_v34 = vld [vmem:[%s10463_s13 + $0xb8] sm:$0xff]  }
 0x922   :  { %2869 = vmatprep.subr.bf16.mxu0 %v8522_v36  ;;  %v2487_v41 = vpack.c.bf16 %v2482_v39, %v2412_v35  ;;  %v8165_v42 = vpop.f32.mrb[45].mxu1  ;;  %v8554_v35 = vld [vmem:[%s10463_s13 + $0x40] sm:$0xff]   ;;  %v8558_v39 = vld [vmem:[%s10463_s13 + $0x50] sm:$0xff]  }
 0x923   :  { %v8555_v36 = vld [vmem:[%s10463_s13] sm:$0xff]   ;;  %v8561_v42 = vld [vmem:[%s10463_s13 + $0x18] sm:$0xff]  }
 0x925   :  { %2870 = vmatpush1.bf16.msra.mxu0 %v8520_v38  ;;  %v8557_v38 = vld [vmem:[%s10463_s13 + $0x8] sm:$0xff]  }
 0x926   :  { %2871 = vmatprep.subr.bf16.mxu0 %v8525_v40  ;;  %v8559_v40 = vld [vmem:[%s10463_s13 + $0x10] sm:$0xff]  }
 0x929   :  { %2872 = vmatpush1.bf16.msra.mxu0 %v8523_v43  ;;  %v8562_v43 = vld [vmem:[%s10463_s13 + $0x60] sm:$0xff]  }
 0x92a   :  { %2873 = vmatprep.subr.bf16.mxu0 %v8528_v44  ;;  %v8563_v44 = vld [vmem:[%s10463_s13 + $0x20] sm:$0xff]  }
 0x92d   :  { %2874 = vmatpush1.bf16.msra.mxu0 %v8526_v45  ;;  %v8564_v45 = vld [vmem:[%s10463_s13 + $0x68] sm:$0xff]  }
 0x92e   :  { %2875 = vmatprep.subr.bf16.mxu0 %v8531_v46  ;;  %v8565_v46 = vld [vmem:[%s10463_s13 + $0x28] sm:$0xff]  }
 0x931   :  { %2876 = vmatpush1.bf16.msra.mxu0 %v8529_v47  ;;  %v8566_v47 = vld [vmem:[%s10463_s13 + $0x70] sm:$0xff]  }
 0x932   :  { %2877 = vmatprep.subr.bf16.mxu0 %v8534_v49  ;;  %v8567_v49 = vld [vmem:[%s10463_s13 + $0x30] sm:$0xff]  }
 0x935   :  { %2878 = vmatpush1.bf16.msra.mxu0 %v8532_v50  ;;  %v8568_v50 = vld [vmem:[%s10463_s13 + $0x78] sm:$0xff]  }
 0x936   :  { %2879 = vmatprep.subr.bf16.mxu0 %v8537_v51  ;;  %v8569_v51 = vld [vmem:[%s10463_s13 + $0x38] sm:$0xff]  }
 0x939   :  { %2880 = vmatpush1.bf16.msra.mxu0 %v8535_v52  ;;  %v8570_v52 = vld [vmem:[%s10463_s13 + $0x140] sm:$0xff]  }
 0x93a   :  { %8166 = vmatprep.subr.mxu0 %v9065_v0 }
 0x93c   :  { %2898 = vmatmul.mubr.bf16.vlgmr.msra.gmra.mrb[44].mxu0 %v2487_v41  ;;  %v8560_v41 = vld [vmem:[%s10463_s13 + $0x58] sm:$0xff]  }
 0x93d   :  { %8168 = vmatprep.mubr.msk.f32.mxu0 %vm9066_vm0, %v9065_v0 }
 0xa0f   :  { %v2899_v60 = vpop.f32.mrb[44].mxu0 }
 0xa10   :  { %v2924_v61 = vadd.f32 %v2917_v58, %v2899_v60  ;;  %v2901_v62 = vpop.f32.mrb[45].mxu0 }
 0xa11   :  { %v2925_v63 = vadd.f32 %v2921_v59, %v2901_v62  ;;  %v2903_v1 = vpop.f32.mrb[46].mxu0  ;;  %v8571_v62 = vld [vmem:[%s10463_s13 + $0x100] sm:$0xff]  }
 0xa12   :  { %v2928_v2 = vmul.f32 0.2, %v2924_v61  ;;  %v2926_v4 = vadd.f32 %v2917_v58, %v2903_v1  ;;  %v2905_v5 = vpop.f32.mrb[47].mxu0 }
 0xa13   :  { %v2929_v6 = vmul.f32 0.2, %v2925_v63  ;;  %v2927_v7 = vadd.f32 %v2921_v59, %v2905_v5  ;;  %v8574_v5 = vld [vmem:[%s10463_s13 + $0x150] sm:$0xff]  }
 0xa14   :  { %v2930_v9 = vmul.f32 0.2, %v2926_v4  ;;  %v2932_v12 = vmax.f32 %v2924_v61, %v2928_v2 }
 0xa15   :  { %v2933_v10 = vmax.f32 %v2925_v63, %v2929_v6  ;;  %v2931_v11 = vmul.f32 0.2, %v2927_v7  ;;  %v8572_v63 = vld [vmem:[%s10463_s13 + $0x148] sm:$0xff]  }
 0xa16   :  { %v2934_v13 = vmax.f32 %v2926_v4, %v2930_v9  ;;  %v8573_v4 = vld [vmem:[%s10463_s13 + $0x108] sm:$0xff]  }
 0xa17   :  { %v2935_v14 = vmax.f32 %v2927_v7, %v2931_v11  ;;  %2936 = vmatprep.subr.mxu1 %v2933_v10 }
 0xa18   :  { %v3224_v15 = vpack.c.bf16 %v2934_v13, %v2932_v12  ;;  %2937 = vmatpush1.msra.mxu1 %v2932_v12 }
 0xa19   :  { %7281 = vmatmul.mubr.msk.f32.vlgmr.msra.gmra.mrb[46].mxu1 %vm280_vm2, %v9498_v23  ;;  %3007 = vmatprep.subr.mxu1 %v2935_v14  ;;  %v3225_v16 = vpack.c.bf16 %v2935_v14, %v2933_v10 }
 0xa1a   :  { %3008 = vmatpush1.msra.mxu1 %v2934_v13  ;;  %3071 = vmatprep.mubr.f32.mxu1 %v9065_v0 }
 0xa1b   :  { %3078 = vmatprep.subr.mxu1 %v2933_v10  ;;  %v8575_v10 = vld [vmem:[%s10463_s13 + $0x110] sm:$0xff]  }
 0xa1d   :  { %7282 = vmatmul.mubr.msk.f32.vlgmr.msra.gmra.mrb[48].mxu1 %vm280_vm2, %v9509_v26 }
 0xa1e   :  { %3079 = vmatpush1.msra.mxu1 %v2932_v12  ;;  %3142 = vmatprep.mubr.f32.mxu1 %v9065_v0  ;;  %v8576_v12 = vld [vmem:[%s10463_s13 + $0x158] sm:$0xff]  }
 0xa1f   :  { %3149 = vmatprep.subr.mxu1 %v2935_v14  ;;  %v8578_v14 = vld [vmem:[%s10463_s13 + $0x160] sm:$0xff]  }
 0xa21   :  { %7283 = vmatmul.mubr.msk.f32.vlgmr.msra.gmra.mrb[50].mxu1 %vm280_vm2, %v9546_v3 }
 0xa22   :  { %3150 = vmatpush1.msra.mxu1 %v2934_v13  ;;  %3213 = vmatprep.mubr.f32.mxu1 %v9065_v0  ;;  %v8577_v13 = vld [vmem:[%s10463_s13 + $0x118] sm:$0xff]  }
 0xa23   :  { %7741 = vmatprep.subr.bf16.mxu1 %v8538_v17  ;;  %v8581_v17 = vld [vmem:[%s10463_s13 + $0x128] sm:$0xff]  }
 0xa25   :  { %7284 = vmatmul.mubr.msk.f32.vlgmr.msra.gmra.mrb[52].mxu1 %vm280_vm2, %v9519_v8 }
 0xa26   :  { %7742 = vmatpush3.bf16.msra.mxu1 %v8539_v18  ;;  %3419 = vmatprep.mubr.bf16.mxu1 %v3225_v16  ;;  %v8580_v16 = vld [vmem:[%s10463_s13 + $0x168] sm:$0xff]   ;;  %v8582_v18 = vld [vmem:[%s10463_s13 + $0x170] sm:$0xff]  }
 0xa27   :  { %7743 = vmatprep.subr.bf16.mxu1 %v8540_v19  ;;  %v8583_v19 = vld [vmem:[%s10463_s13 + $0x130] sm:$0xff]  }
 0xa2a   :  { %7744 = vmatpush3.bf16.msra.mxu1 %v8541_v20  ;;  %v8584_v20 = vld [vmem:[%s10463_s13 + $0x178] sm:$0xff]  }
 0xa2b   :  { %7745 = vmatprep.subr.bf16.mxu1 %v8542_v21  ;;  %v8585_v21 = vld [vmem:[%s10463_s13 + $0x138] sm:$0xff]  }
 0xa2e   :  { %7746 = vmatpush3.bf16.msra.mxu1 %v8543_v22 }
 0xa2f   :  { %7747 = vmatprep.subr.bf16.mxu1 %v8544_v24 }
 0xa32   :  { %7748 = vmatpush3.bf16.msra.mxu1 %v8545_v25 }
 0xa33   :  { %7749 = vmatprep.subr.bf16.mxu1 %v8546_v27 }
 0xa36   :  { %7750 = vmatpush3.bf16.msra.mxu1 %v8547_v28 }
 0xa37   :  { %7751 = vmatprep.subr.bf16.mxu1 %v8548_v29 }
 0xa3a   :  { %7752 = vmatpush3.bf16.msra.mxu1 %v8549_v30 }
 0xa3b   :  { %7753 = vmatprep.subr.bf16.mxu1 %v8550_v31 }
 0xa3e   :  { %7754 = vmatpush3.bf16.msra.mxu1 %v8551_v32 }
 0xa3f   :  { %7755 = vmatprep.subr.bf16.mxu1 %v8552_v33 }
 0xa42   :  { %7756 = vmatpush3.bf16.msra.mxu1 %v8553_v34 }
 0xa43   :  { %7763 = vmatprep.subr.bf16.mxu1 %v8554_v35 }
 0xa45   :  { %3420 = vmatmul.mubr.bf16.vlgmr.msra.gmra.mrb[56].mxu1 %v3224_v15  ;;  %v8579_v15 = vld [vmem:[%s10463_s13 + $0x120] sm:$0xff]   ;;  %s10524_s13 = sld [smem:[#allocation46_spill]] }
 0xa46   :  { %7764 = vmatpush3.bf16.msra.mxu1 %v8555_v36 }
 0xa47   :  { %7765 = vmatprep.subr.bf16.mxu1 %v8556_v37 }
 0xa4a   :  { %7766 = vmatpush3.bf16.msra.mxu1 %v8557_v38 }
 0xa4b   :  { %7767 = vmatprep.subr.bf16.mxu1 %v8558_v39 }
 0xa4e   :  { %7768 = vmatpush3.bf16.msra.mxu1 %v8559_v40 }
 0xa4f   :  { %7769 = vmatprep.subr.bf16.mxu1 %v8560_v41 }
 0xa52   :  { %7770 = vmatpush3.bf16.msra.mxu1 %v8561_v42  ;;  %v7397_v42 = vld [vmem:[#allocation16] ss:$0 sm:$0xff] }
 0xa53   :  { %7771 = vmatprep.subr.bf16.mxu1 %v8562_v43 }
 0xa56   :  { %7772 = vmatpush3.bf16.msra.mxu1 %v8563_v44 }
 0xa57   :  { %7773 = vmatprep.subr.bf16.mxu1 %v8564_v45 }
 0xa5a   :  { %7774 = vmatpush3.bf16.msra.mxu1 %v8565_v46 }
 0xa5b   :  { %7775 = vmatprep.subr.bf16.mxu1 %v8566_v47 }
 0xa5e   :  { %7776 = vmatpush3.bf16.msra.mxu1 %v8567_v49 }
 0xa5f   :  { %7777 = vmatprep.subr.bf16.mxu1 %v8568_v50 }
 0xa62   :  { %7778 = vmatpush3.bf16.msra.mxu1 %v8569_v51  ;;  %v4031_v51 = vld [vmem:[#allocation18 + $0x8] sm:$0xff] }
 0xa63   :  { %7785 = vmatprep.subr.bf16.mxu1 %v8570_v52  ;;  %v7402_v52 = vcombine.low %v4031_v51, %v4031_v51 }
 0xaec   :  { %v3002_v53 = vpop.f32.mrb[46].mxu1 }
 0xaed   :  { %v3004_v56 = vpop.f32.mrb[47].mxu1 }
 0xaf0   :  { %v3073_v58 = vpop.f32.mrb[48].mxu1 }
 0xaf1   :  { %v3220_v59 = vpack.c.bf16 %v3073_v58, %v3002_v53  ;;  %v3075_v60 = vpop.f32.mrb[49].mxu1  ;;  %v4029_v53 = vld [vmem:[#allocation18] sm:$0xff] }
 0xaf2   :  { %v3221_v61 = vpack.c.bf16 %v3075_v60, %v3004_v56  ;;  %v7406_v56 = vcombine.low %v4029_v53, %v4029_v53 }
 0xaf4   :  { %3556 = vmatprep.mubr.bf16.mxu1 %v3221_v61  ;;  %v3144_v1 = vpop.f32.mrb[50].mxu1  ;;  %v4099_v58 = vsel %vm4040_vm7, %v7406_v56, 0  ;;  %v8627_v56 = vld [vmem:[%s10467_s17 + $0x118] sm:$0xff]  }
 0xaf5   :  { %3557 = vmatmul.mubr.bf16.vlgmr.msra.gmra.mrb[60].mxu1 %v3220_v59  ;;  %v3146_v2 = vpop.f32.mrb[51].mxu1  ;;  %v4148_v59 = vld [vmem:[#allocation18 + $0x10] sm:$0xff] }
 0xaf6   :  { %7786 = vmatpush3.bf16.msra.mxu1 %v8571_v62  ;;  %v7411_v60 = vcombine.high %v4148_v59, %v4148_v59  ;;  %v7410_v62 = vcombine.low %v4148_v59, %v4148_v59  ;;  %v8612_v59 = vld [vmem:[%s10467_s17 + $0x50] sm:$0xff]  }
 0xaf7   :  { %7787 = vmatprep.subr.bf16.mxu1 %v8572_v63 }
 0xaf8   :  { %v3215_v6 = vpop.f32.mrb[52].mxu1 }
 0xaf9   :  { %v3222_v7 = vpack.c.bf16 %v3215_v6, %v3144_v1  ;;  %v3217_v9 = vpop.f32.mrb[53].mxu1 }
 0xafa   :  { %7788 = vmatpush3.bf16.msra.mxu1 %v8573_v4  ;;  %v3223_v11 = vpack.c.bf16 %v3217_v9, %v3146_v2  ;;  %v4158_v4 = vsel %vm4040_vm7, %v7410_v62, 0  ;;  %v8620_v62 = vld [vmem:[%s10467_s17 + $0x60] sm:$0xff]  }
 0xafb   :  { %7789 = vmatprep.subr.bf16.mxu1 %v8574_v5  ;;  %v8592_v5 = vld [vmem:[%s10467_s17 + $0xc0] sm:$0xff]  }
 0xafc   :  { %3726 = vmatprep.mubr.bf16.mxu1 %v3223_v11 }
 0xafe   :  { %7790 = vmatpush3.bf16.msra.mxu1 %v8575_v10 }
 0xaff   :  { %7791 = vmatprep.subr.bf16.mxu1 %v8576_v12  ;;  %v8593_v12 = vld [vmem:[%s10467_s17 + $0x80] sm:$0xff]  }
 0xb02   :  { %7792 = vmatpush3.bf16.msra.mxu1 %v8577_v13  ;;  %v8594_v13 = vld [vmem:[%s10467_s17 + $0xc8] sm:$0xff]  }
 0xb03   :  { %7793 = vmatprep.subr.bf16.mxu1 %v8578_v14  ;;  %v8596_v14 = vld [vmem:[%s10467_s17 + $0xd0] sm:$0xff]  }
 0xb06   :  { %7794 = vmatpush3.bf16.msra.mxu1 %v8579_v15  ;;  %v8597_v15 = vld [vmem:[%s10467_s17 + $0x90] sm:$0xff]  }
 0xb07   :  { %7795 = vmatprep.subr.bf16.mxu1 %v8580_v16  ;;  %v8598_v16 = vld [vmem:[%s10467_s17 + $0xd8] sm:$0xff]  }
 0xb0a   :  { %7796 = vmatpush3.bf16.msra.mxu1 %v8581_v17  ;;  %v8599_v17 = vld [vmem:[%s10467_s17 + $0x98] sm:$0xff]  }
 0xb0b   :  { %7797 = vmatprep.subr.bf16.mxu1 %v8582_v18  ;;  %v8600_v18 = vld [vmem:[%s10467_s17 + $0xe0] sm:$0xff]  }
 0xb0e   :  { %7798 = vmatpush3.bf16.msra.mxu1 %v8583_v19  ;;  %v8601_v19 = vld [vmem:[%s10467_s17 + $0xa0] sm:$0xff]  }
 0xb0f   :  { %7799 = vmatprep.subr.bf16.mxu1 %v8584_v20  ;;  %v8602_v20 = vld [vmem:[%s10467_s17 + $0xe8] sm:$0xff]  }
 0xb12   :  { %7800 = vmatpush3.bf16.msra.mxu1 %v8585_v21  ;;  %v8603_v21 = vld [vmem:[%s10467_s17 + $0xa8] sm:$0xff]  }
 0xb15   :  { %3727 = vmatmul.mubr.bf16.vlgmr.msra.gmra.mrb[64].mxu1 %v3222_v7 }
 0xb16   :  { %4294 = vmatprep.mubr.f32.mxu1 %v9065_v0 }
 0xb18   :  { %v7757_v22 = vpop.f32.mrb[56].mxu1 }
 0xb19   :  { %v7758_v24 = vpop.f32.mrb[57].mxu1 }
 0xb1a   :  { %v7759_v25 = vadd.f32 %v7758_v24, %v7757_v22  ;;  %v7760_v27 = vpop.f32.mrb[58].mxu1  ;;  %v8604_v22 = vld [vmem:[%s10467_s17 + $0xf0] sm:$0xff]  }
 0xb1b   :  { %v7761_v28 = vpop.f32.mrb[59].mxu1  ;;  %v8605_v24 = vld [vmem:[%s10467_s17 + $0xb0] sm:$0xff]  }
 0xb1c   :  { %v7762_v29 = vadd.f32 %v7761_v28, %v7760_v27  ;;  %v8607_v27 = vld [vmem:[%s10467_s17 + $0xb8] sm:$0xff]   ;;  %v8613_v28 = vld [vmem:[%s10467_s17 + $0x140] sm:$0xff]  }
 0xbc8   :  { %v7779_v30 = vpop.f32.mrb[60].mxu1 }
 0xbc9   :  { %v7780_v31 = vpop.f32.mrb[61].mxu1 }
 0xbca   :  { %v7781_v32 = vadd.f32 %v7780_v31, %v7779_v30  ;;  %v7782_v33 = vpop.f32.mrb[62].mxu1 }
 0xbcb   :  { %v7783_v34 = vpop.f32.mrb[63].mxu1 }
 0xbcc   :  { %v3559_v35 = vadd.f32 %v7781_v32, %v7759_v25  ;;  %v7784_v36 = vadd.f32 %v7783_v34, %v7782_v33  ;;  %v8606_v25 = vld [vmem:[%s10467_s17 + $0xf8] sm:$0xff]  }
 0xbce   :  { %v3562_v37 = vadd.f32 %v7784_v36, %v7762_v29  ;;  %v4210_v29 = vld [vmem:[#allocation19] sm:$0x3] }
 0xbcf   :  { %v4215_v30 = vrot.slane %v4210_v29, %v2916_v55  ;;  %v4219_v31 = vrot.slane %v4210_v29, %v2920_v57  ;;  %v8615_v55 = vld [vmem:[%s10467_s17 + $0x100] sm:$0xff]   ;;  %v8617_v57 = vld [vmem:[%s10467_s17 + $0x148] sm:$0xff]  }
 0xbe8   :  { %v7801_v38 = vpop.f32.mrb[64].mxu1 }
 0xbe9   :  { %v7802_v39 = vpop.f32.mrb[65].mxu1 }
 0xbea   :  { %v7803_v40 = vadd.f32 %v7802_v39, %v7801_v38  ;;  %v7804_v41 = vpop.f32.mrb[66].mxu1 }
 0xbeb   :  { %v7805_v43 = vpop.f32.mrb[67].mxu1 }
 0xbec   :  { %v3735_v44 = vadd.f32 %v7803_v40, %v3559_v35  ;;  %v7806_v45 = vadd.f32 %v7805_v43, %v7804_v41 }
 0xbee   :  { %v3744_v46 = vadd.f32 %v7397_v42, %v3735_v44  ;;  %v3736_v47 = vadd.f32 %v7806_v45, %v3562_v37  ;;  %v10031_v45 = vld [vmem:[#allocation2] sm:$0xff] }
 0xbf0   :  { %v3745_v49 = vadd.f32 %v7397_v42, %v3736_v47  ;;  %8167 = vmatpush3.msra.mxu0 %v3744_v46  ;;  %v8619_v47 = vld [vmem:[%s10467_s17 + $0x108] sm:$0xff]  }
 0xbf1   :  { %8169 = vmatmul.mubr.msk.f32.vlgmr.msra.gmra.mrb[34].mxu0 %vm280_vm2, %v9498_v23  ;;  %8171 = vmatprep.subr.mxu0 %v9065_v0  ;;  %v7403_v23 = vcombine.high %v4031_v51, %v4031_v51  ;;  %v10056_v51 = vld [vmem:[#allocation4] sm:$0xff] }
 0xbf2   :  { %v4028_v50 = vpack.c.bf16 %v3745_v49, %v3744_v46  ;;  %8172 = vmatpush3.msra.mxu0 %v3745_v49  ;;  %8173 = vmatprep.mubr.msk.f32.mxu0 %vm9066_vm0, %v9065_v0 }
 0xbf3   :  { %8176 = vmatprep.subr.mxu0 %v9065_v0 }
 0xbf5   :  { %8174 = vmatmul.mubr.msk.f32.vlgmr.msra.gmra.mrb[48].mxu0 %vm280_vm2, %v9509_v26  ;;  %v4042_v26 = vsel %vm4040_vm7, %v7402_v52, 0  ;;  %v8609_v52 = vld [vmem:[%s10467_s17] sm:$0xff]  }
 0xbf6   :  { %8177 = vmatpush3.msra.mxu0 %v3744_v46  ;;  %8178 = vmatprep.mubr.msk.f32.mxu0 %vm9066_vm0, %v9065_v0  ;;  %v10042_v46 = vld [vmem:[#allocation2 + $0x8] sm:$0xff] }
 0xbf7   :  { %8181 = vmatprep.subr.mxu0 %v9065_v0 }
 0xbf9   :  { %8179 = vmatmul.mubr.msk.f32.vlgmr.msra.gmra.mrb[50].mxu0 %vm280_vm2, %v9546_v3  ;;  %v7407_v3 = vcombine.high %v4029_v53, %v4029_v53  ;;  %v8610_v53 = vld [vmem:[%s10467_s17 + $0x48] sm:$0xff]  }
 0xbfa   :  { %8182 = vmatpush3.msra.mxu0 %v3745_v49  ;;  %8183 = vmatprep.mubr.msk.f32.mxu0 %vm9066_vm0, %v9065_v0  ;;  %v8608_v49 = vld [vmem:[%s10467_s17 + $0x40] sm:$0xff]  }
 0xbfb   :  { %7404 = vmatprep.subr.msk.bf16.mxu0 %vm4040_vm7, %v7403_v23  ;;  %v8623_v23 = vld [vmem:[%s10467_s17 + $0x110] sm:$0xff]  }
 0xbfd   :  { %8184 = vmatmul.mubr.msk.f32.vlgmr.msra.gmra.mrb[52].mxu0 %vm280_vm2, %v9519_v8 }
 0xbfe   :  { %4048 = vmatpush1.bf16.msra.mxu0 %v4042_v26  ;;  %4079 = vmatprep.mubr.bf16.mxu0 %v9067_v48  ;;  %v8625_v26 = vld [vmem:[%s10467_s17 + $0x158] sm:$0xff]  }
 0xbff   :  { %7408 = vmatprep.subr.msk.bf16.mxu0 %vm4040_vm7, %v7407_v3  ;;  %v10073_v3 = vld [vmem:[#allocation4 + $0x8] sm:$0xff] }
 0xc01   :  { %7405 = vmatmul.mubr.msk.bf16.vlgmr.msra.gmra.mrb[56].mxu0 %vm280_vm2, %v4028_v50  ;;  %v8621_v50 = vld [vmem:[%s10467_s17 + $0x150] sm:$0xff]  }
 0xc02   :  { %4136 = vmatprep.mubr.bf16.mxu0 %v9067_v48  ;;  %4105 = vmatpush1.bf16.msra.mxu0 %v4099_v58  ;;  %v8611_v58 = vld [vmem:[%s10467_s17 + $0x8] sm:$0xff]  }
 0xc03   :  { %7412 = vmatprep.subr.msk.bf16.mxu0 %vm4040_vm7, %v7411_v60  ;;  %v8614_v60 = vld [vmem:[%s10467_s17 + $0x10] sm:$0xff]  }
 0xcc4   :  { %v3812_v8 = vpop.f32.mrb[34].mxu0 }
 0xcc5   :  { %v8170_v61 = vpop.f32.mrb[35].mxu0 }
 0xcc6   :  { %v8618_v61 = vld [vmem:[%s10467_s17 + $0x18] sm:$0xff]  }
 0xcc8   :  { %v3882_v63 = vpop.f32.mrb[48].mxu0 }
 0xcc9   :  { %v4026_v1 = vpack.c.bf16 %v3882_v63, %v3812_v8  ;;  %v8175_v2 = vpop.f32.mrb[49].mxu0  ;;  %v8616_v8 = vld [vmem:[%s10467_s17 + $0x58] sm:$0xff]   ;;  %v8622_v63 = vld [vmem:[%s10467_s17 + $0x20] sm:$0xff]  }
 0xcca   :  { %v8626_v2 = vld [vmem:[%s10467_s17 + $0x28] sm:$0xff]  }
 0xccb   :  { %7409 = vmatmul.mubr.msk.bf16.vlgmr.msra.gmra.mrb[56].mxu0 %vm280_vm2, %v4026_v1  ;;  %v8624_v1 = vld [vmem:[%s10467_s17 + $0x68] sm:$0xff]  }
 0xccc   :  { %v3952_v6 = vpop.f32.mrb[50].mxu0  ;;  %4164 = vmatpush1.bf16.msra.mxu0 %v4158_v4  ;;  %4195 = vmatprep.mubr.bf16.mxu0 %v9067_v48  ;;  %v8595_v48 = vld [vmem:[%s10467_s17 + $0x88] sm:$0xff]   ;;  %v8628_v4 = vld [vmem:[%s10467_s17 + $0x70] sm:$0xff]  }
 0xccd   :  { %v8180_v7 = vpop.f32.mrb[51].mxu0  ;;  %7815 = vmatprep.subr.bf16.mxu0 %v8592_v5  ;;  %v8629_v5 = vld [vmem:[%s10467_s17 + $0x160] sm:$0xff]  }
 0xcce   :  { %v8631_v7 = vld [vmem:[%s10467_s17 + $0x120] sm:$0xff]  }
 0xcd0   :  { %v4022_v9 = vpop.f32.mrb[52].mxu0 }
 0xcd1   :  { %v4027_v10 = vpack.c.bf16 %v4022_v9, %v3952_v6  ;;  %v8185_v11 = vpop.f32.mrb[53].mxu0  ;;  %v8630_v6 = vld [vmem:[%s10467_s17 + $0x30] sm:$0xff]   ;;  %v8632_v9 = vld [vmem:[%s10467_s17 + $0x78] sm:$0xff]  }
 0xcd2   :  { %v8634_v11 = vld [vmem:[%s10467_s17 + $0x38] sm:$0xff]  }
 0xcd7   :  { %7413 = vmatmul.mubr.msk.bf16.vlgmr.msra.gmra.mrb[56].mxu0 %vm280_vm2, %v4027_v10  ;;  %v8633_v10 = vld [vmem:[%s10467_s17 + $0x168] sm:$0xff]  }
 0xcd8   :  { %7816 = vmatpush3.bf16.msra.mxu0 %v8593_v12  ;;  %v8635_v12 = vld [vmem:[%s10467_s17 + $0x128] sm:$0xff]  }
 0xcd9   :  { %7817 = vmatprep.subr.bf16.mxu0 %v8594_v13  ;;  %v8636_v13 = vld [vmem:[%s10467_s17 + $0x170] sm:$0xff]  }
 0xcdc   :  { %7818 = vmatpush3.bf16.msra.mxu0 %v8595_v48  ;;  %v8637_v48 = vld [vmem:[%s10467_s17 + $0x130] sm:$0xff]  }
 0xcdd   :  { %7819 = vmatprep.subr.bf16.mxu0 %v8596_v14  ;;  %v8638_v14 = vld [vmem:[%s10467_s17 + $0x178] sm:$0xff]  }
 0xce0   :  { %7820 = vmatpush3.bf16.msra.mxu0 %v8597_v15  ;;  %v8639_v15 = vld [vmem:[%s10467_s17 + $0x138] sm:$0xff]  }
 0xce1   :  { %7821 = vmatprep.subr.bf16.mxu0 %v8598_v16 }
 0xce4   :  { %7822 = vmatpush3.bf16.msra.mxu0 %v8599_v17 }
 0xce5   :  { %7823 = vmatprep.subr.bf16.mxu0 %v8600_v18 }
 0xce8   :  { %7824 = vmatpush3.bf16.msra.mxu0 %v8601_v19 }
 0xce9   :  { %7825 = vmatprep.subr.bf16.mxu0 %v8602_v20 }
 0xcec   :  { %7826 = vmatpush3.bf16.msra.mxu0 %v8603_v21 }
 0xced   :  { %7827 = vmatprep.subr.bf16.mxu0 %v8604_v22 }
 0xcf0   :  { %7828 = vmatpush3.bf16.msra.mxu0 %v8605_v24 }
 0xcf1   :  { %7829 = vmatprep.subr.bf16.mxu0 %v8606_v25 }
 0xcf4   :  { %7830 = vmatpush3.bf16.msra.mxu0 %v8607_v27 }
 0xcf5   :  { %7859 = vmatprep.subr.bf16.mxu0 %v8613_v28 }
 0xdaa   :  { %v4197_v32 = vpop.f32.mrb[56].mxu0 }
 0xdab   :  { %v4222_v33 = vadd.f32 %v4215_v30, %v4197_v32  ;;  %v4199_v34 = vpop.f32.mrb[57].mxu0 }
 0xdac   :  { %v4223_v35 = vadd.f32 %v4219_v31, %v4199_v34  ;;  %v4201_v36 = vpop.f32.mrb[58].mxu0 }
 0xdad   :  { %v4224_v37 = vadd.f32 %v4215_v30, %v4201_v36  ;;  %v4203_v38 = vpop.f32.mrb[59].mxu0  ;;  %v4226_v41 = vmax.f32 %v4222_v33, 0.0  ;;  %v8648_v36 = vld [vmem:[%s10469_s19] sm:$0xff]  }
 0xdae   :  { %v4227_v39 = vmax.f32 %v4223_v35, 0.0  ;;  %v4225_v40 = vadd.f32 %v4219_v31, %v4203_v38  ;;  %v8650_v38 = vld [vmem:[%s10469_s19 + $0x10] sm:$0xff]  }
 0xdaf   :  { %v4228_v42 = vmax.f32 %v4224_v37, 0.0  ;;  %v8649_v37 = vld [vmem:[%s10469_s19 + $0x8] sm:$0xff]  }
 0xdb0   :  { %v4229_v43 = vmax.f32 %v4225_v40, 0.0  ;;  %4230 = vmatprep.subr.mxu1 %v4227_v39  ;;  %v8654_v40 = vld [vmem:[%s10469_s19 + $0x20] sm:$0xff]  }
 0xdb1   :  { %v4518_v44 = vpack.c.bf16 %v4228_v42, %v4226_v41  ;;  %4231 = vmatpush1.msra.mxu1 %v4226_v41 }
 0xdb2   :  { %7414 = vmatmul.mubr.msk.f32.vlgmr.msra.gmra.mrb[54].mxu1 %vm280_vm2, %v10031_v45  ;;  %4301 = vmatprep.subr.mxu1 %v4229_v43  ;;  %v4519_v54 = vpack.c.bf16 %v4229_v43, %v4227_v39 }
 0xdb3   :  { %4302 = vmatpush1.msra.mxu1 %v4228_v42  ;;  %4365 = vmatprep.mubr.f32.mxu1 %v9065_v0 }
 0xdb4   :  { %4372 = vmatprep.subr.mxu1 %v4227_v39  ;;  %4713 = vmatprep.mubr.bf16.mxu0 %v4519_v54  ;;  %v8652_v39 = vld [vmem:[%s10469_s19 + $0x18] sm:$0xff]  }
 0xdb5   :  { %4714 = vmatmul.mubr.bf16.vlgmr.msra.gmra.mrb[60].mxu0 %v4518_v44 }
 0xdb6   :  { %7415 = vmatmul.mubr.msk.f32.vlgmr.msra.gmra.mrb[68].mxu1 %vm280_vm2, %v10042_v46  ;;  %7860 = vmatpush3.bf16.msra.mxu0 %v8615_v55 }
 0xdb7   :  { %4373 = vmatpush1.msra.mxu1 %v4226_v41  ;;  %4436 = vmatprep.mubr.f32.mxu1 %v9065_v0  ;;  %v8656_v41 = vld [vmem:[%s10469_s19 + $0x28] sm:$0xff]  }
 0xdb8   :  { %4443 = vmatprep.subr.mxu1 %v4229_v43  ;;  %7861 = vmatprep.subr.bf16.mxu0 %v8617_v57 }
 0xdba   :  { %7416 = vmatmul.mubr.msk.f32.vlgmr.msra.gmra.mrb[70].mxu1 %vm280_vm2, %v10056_v51  ;;  %7862 = vmatpush3.bf16.msra.mxu0 %v8619_v47 }
 0xdbb   :  { %4444 = vmatpush1.msra.mxu1 %v4228_v42  ;;  %4507 = vmatprep.mubr.f32.mxu1 %v9065_v0 }
 0xdbc   :  { %7837 = vmatprep.subr.bf16.mxu1 %v8608_v49  ;;  %7863 = vmatprep.subr.bf16.mxu0 %v8621_v50 }
 0xdbe   :  { %7417 = vmatmul.mubr.msk.f32.vlgmr.msra.gmra.mrb[72].mxu1 %vm280_vm2, %v10073_v3  ;;  %7864 = vmatpush3.bf16.msra.mxu0 %v8623_v23 }
 0xdbf   :  { %7838 = vmatpush3.bf16.msra.mxu1 %v8609_v52  ;;  %7865 = vmatprep.subr.bf16.mxu0 %v8625_v26 }
 0xdc0   :  { %7839 = vmatprep.subr.bf16.mxu1 %v8610_v53  ;;  %v7530_v53 = vld [vmem:[#allocation21] ss:$0 sm:$0xff] }
 0xdc2   :  { %7866 = vmatpush3.bf16.msra.mxu0 %v8627_v56 }
 0xdc3   :  { %7840 = vmatpush3.bf16.msra.mxu1 %v8611_v58  ;;  %7867 = vmatprep.subr.bf16.mxu0 %v8629_v5  ;;  %v8642_v5 = vld [vmem:[%s10469_s19 + $0x50] sm:$0xff]  }
 0xdc4   :  { %7841 = vmatprep.subr.bf16.mxu1 %v8612_v59 }
 0xdc6   :  { %7868 = vmatpush3.bf16.msra.mxu0 %v8631_v7  ;;  %v8644_v7 = vld [vmem:[%s10469_s19 + $0x60] sm:$0xff]  }
 0xdc7   :  { %7842 = vmatpush3.bf16.msra.mxu1 %v8614_v60  ;;  %7869 = vmatprep.subr.bf16.mxu0 %v8633_v10  ;;  %v8646_v10 = vld [vmem:[%s10469_s19 + $0x70] sm:$0xff]  }
 0xdc8   :  { %7843 = vmatprep.subr.bf16.mxu1 %v8616_v8 }
 0xdca   :  { %7870 = vmatpush3.bf16.msra.mxu0 %v8635_v12  ;;  %v8651_v12 = vld [vmem:[%s10469_s19 + $0x80] sm:$0xff]  }
 0xdcb   :  { %7844 = vmatpush3.bf16.msra.mxu1 %v8618_v61  ;;  %7871 = vmatprep.subr.bf16.mxu0 %v8636_v13  ;;  %v8653_v13 = vld [vmem:[%s10469_s19 + $0x88] sm:$0xff]  }
 0xdcc   :  { %7845 = vmatprep.subr.bf16.mxu1 %v8620_v62 }
 0xdce   :  { %7872 = vmatpush3.bf16.msra.mxu0 %v8637_v48  ;;  %v8655_v48 = vld [vmem:[%s10469_s19 + $0x90] sm:$0xff]  }
 0xdcf   :  { %7846 = vmatpush3.bf16.msra.mxu1 %v8622_v63  ;;  %7873 = vmatprep.subr.bf16.mxu0 %v8638_v14  ;;  %v8657_v14 = vld [vmem:[%s10469_s19 + $0x98] sm:$0xff]  }
 0xdd0   :  { %7847 = vmatprep.subr.bf16.mxu1 %v8624_v1 }
 0xdd2   :  { %7874 = vmatpush3.bf16.msra.mxu0 %v8639_v15  ;;  %v8658_v15 = vld [vmem:[%s10469_s19 + $0x30] sm:$0xff]  }
 0xdd3   :  { %7848 = vmatpush3.bf16.msra.mxu1 %v8626_v2  ;;  %8226 = vmatprep.subr.bf16.mxu0 %v9065_v0  ;;  %v8640_v2 = vld [vmem:[%s10469_s19 + $0x40] sm:$0xff]  }
 0xdd4   :  { %7849 = vmatprep.subr.bf16.mxu1 %v8628_v4  ;;  %v8641_v4 = vld [vmem:[%s10469_s19 + $0x48] sm:$0xff]  }
 0xdd7   :  { %7850 = vmatpush3.bf16.msra.mxu1 %v8630_v6  ;;  %v8643_v6 = vld [vmem:[%s10469_s19 + $0x58] sm:$0xff]  }
 0xdd8   :  { %7851 = vmatprep.subr.bf16.mxu1 %v8632_v9  ;;  %v8645_v9 = vld [vmem:[%s10469_s19 + $0x68] sm:$0xff]  }
 0xddb   :  { %7852 = vmatpush3.bf16.msra.mxu1 %v8634_v11  ;;  %v8647_v11 = vld [vmem:[%s10469_s19 + $0x78] sm:$0xff]  }
 0xddc   :  { %8186 = vmatprep.subr.mxu1 %v9065_v0 }
 0xe85   :  { %v4296_v16 = vpop.f32.mrb[54].mxu1 }
 0xe86   :  { %v4298_v17 = vpop.f32.mrb[55].mxu1 }
 0xe88   :  { %v7831_v18 = vpop.f32.mrb[60].mxu0 }
 0xe89   :  { %v4367_v19 = vpop.f32.mrb[68].mxu1  ;;  %v7832_v20 = vpop.f32.mrb[61].mxu0 }
 0xe8a   :  { %v4514_v21 = vpack.c.bf16 %v4367_v19, %v4296_v16  ;;  %v7833_v22 = vadd.f32 %v7832_v20, %v7831_v18  ;;  %v4369_v24 = vpop.f32.mrb[69].mxu1  ;;  %v7834_v25 = vpop.f32.mrb[62].mxu0  ;;  %v8659_v16 = vld [vmem:[%s10469_s19 + $0xa0] sm:$0xff]   ;;  %v8661_v18 = vld [vmem:[%s10469_s19 + $0xa8] sm:$0xff]   ;;  %v8662_v19 = vld [vmem:[%s10469_s19 + $0xb0] sm:$0xff]  }
 0xe8b   :  { %v4515_v27 = vpack.c.bf16 %v4369_v24, %v4298_v17  ;;  %v7835_v28 = vpop.f32.mrb[63].mxu0  ;;  %v8660_v17 = vld [vmem:[%s10469_s19 + $0x38] sm:$0xff]  }
 0xe8c   :  { %v7836_v29 = vadd.f32 %v7835_v28, %v7834_v25  ;;  %v8663_v20 = vld [vmem:[%s10469_s19 + $0xb8] sm:$0xff]  }
 0xe8d   :  { %v4438_v30 = vpop.f32.mrb[70].mxu1  ;;  %4850 = vmatprep.mubr.bf16.mxu1 %v4515_v27 }
 0xe8e   :  { %v4440_v31 = vpop.f32.mrb[71].mxu1  ;;  %4851 = vmatmul.mubr.bf16.vlgmr.msra.gmra.mrb[76].mxu1 %v4514_v21 }
 0xe8f   :  { %8188 = vmatprep.mubr.msk.f32.mxu1 %vm9066_vm0, %v9065_v0 }
 0xe91   :  { %v4509_v32 = vpop.f32.mrb[72].mxu1 }
 0xe92   :  { %v4516_v33 = vpack.c.bf16 %v4509_v32, %v4438_v30  ;;  %v4511_v34 = vpop.f32.mrb[73].mxu1 }
 0xe93   :  { %v4517_v35 = vpack.c.bf16 %v4511_v34, %v4440_v31 }
 0xe95   :  { %5020 = vmatprep.mubr.bf16.mxu0 %v4517_v35 }
 0xe96   :  { %5021 = vmatmul.mubr.bf16.vlgmr.msra.gmra.mrb[64].mxu0 %v4516_v33 }
 0xe97   :  { %8242 = vmatprep.mubr.msk.bf16.mxu0 %vm9066_vm0, %v9065_v0  ;;  %8227 = vmatpush3.bf16.msra.mxu0 %v8648_v36 }
 0xe98   :  { %8228 = vmatprep.subr.bf16.mxu0 %v9065_v0 }
 0xe9b   :  { %8229 = vmatpush3.bf16.msra.mxu0 %v8649_v37  ;;  %v8668_v37 = vld [vmem:[%s10471_s21] sm:$0xff]  }
 0xe9c   :  { %8230 = vmatprep.subr.bf16.mxu0 %v9065_v0 }
 0xe9f   :  { %8231 = vmatpush3.bf16.msra.mxu0 %v8650_v38  ;;  %v8669_v38 = vld [vmem:[%s10471_s21 + $0x8] sm:$0xff]  }
 0xea0   :  { %8232 = vmatprep.subr.bf16.mxu0 %v9065_v0 }
 0xea3   :  { %8233 = vmatpush3.bf16.msra.mxu0 %v8652_v39 }
 0xea4   :  { %8234 = vmatprep.subr.bf16.mxu0 %v9065_v0 }
 0xea7   :  { %8235 = vmatpush3.bf16.msra.mxu0 %v8654_v40 }
 0xea8   :  { %8236 = vmatprep.subr.bf16.mxu0 %v9065_v0 }
 0xeab   :  { %8237 = vmatpush3.bf16.msra.mxu0 %v8656_v41 }
 0xeac   :  { %8238 = vmatprep.subr.bf16.mxu0 %v9065_v0 }
 0xeaf   :  { %8239 = vmatpush3.bf16.msra.mxu0 %v8658_v15 }
 0xeb0   :  { %8240 = vmatprep.subr.bf16.mxu0 %v9065_v0 }
 0xeb3   :  { %8241 = vmatpush3.bf16.msra.mxu0 %v8660_v17 }
 0xeb4   :  { %8266 = vmatprep.subr.mxu0 %v9065_v0 }
 0xf61   :  { %v7853_v42 = vpop.f32.mrb[76].mxu1 }
 0xf62   :  { %v7854_v43 = vpop.f32.mrb[77].mxu1 }
 0xf63   :  { %v7855_v44 = vadd.f32 %v7854_v43, %v7853_v42  ;;  %v7856_v54 = vpop.f32.mrb[78].mxu1 }
 0xf64   :  { %v7857_v55 = vpop.f32.mrb[79].mxu1 }
 0xf65   :  { %v4853_v57 = vadd.f32 %v7855_v44, %v7833_v22  ;;  %v7858_v47 = vadd.f32 %v7857_v55, %v7856_v54  ;;  %v7591_v55 = vld [vmem:[#allocation22] ss:$0 sm:$0xff] }
 0xf67   :  { %v4856_v49 = vadd.f32 %v7858_v47, %v7836_v29 }
 0xf69   :  { %v7875_v50 = vpop.f32.mrb[64].mxu0 }
 0xf6a   :  { %v7876_v23 = vpop.f32.mrb[65].mxu0 }
 0xf6b   :  { %v7877_v52 = vadd.f32 %v7876_v23, %v7875_v50  ;;  %v7878_v26 = vpop.f32.mrb[66].mxu0 }
 0xf6c   :  { %v7879_v56 = vpop.f32.mrb[67].mxu0 }
 0xf6d   :  { %v5029_v58 = vadd.f32 %v7877_v52, %v4853_v57  ;;  %v7880_v59 = vadd.f32 %v7879_v56, %v7878_v26 }
 0xf6f   :  { %v5038_v60 = vadd.f32 %v7530_v53, %v5029_v58  ;;  %v5030_v8 = vadd.f32 %v7880_v59, %v4856_v49  ;;  %v8664_v59 = vld [vmem:[%s10471_s21 + $0x20] sm:$0xff]  }
 0xf71   :  { %v5040_v61 = vmax.f32 %v5038_v60, 0.0  ;;  %v5039_v62 = vadd.f32 %v7530_v53, %v5030_v8  ;;  %v8665_v60 = vld [vmem:[%s10471_s21 + $0x28] sm:$0xff]   ;;  %v8666_v8 = vld [vmem:[%s10471_s21 + $0x30] sm:$0xff]  }
 0xf73   :  { %v5041_v63 = vmax.f32 %v5039_v62, 0.0  ;;  %8187 = vmatpush3.msra.mxu1 %v5040_v61  ;;  %v8670_v62 = vld [vmem:[%s10471_s21 + $0x10] sm:$0xff]  }
 0xf74   :  { %8189 = vmatmul.mubr.msk.f32.vlgmr.msra.gmra.mrb[74].mxu1 %vm280_vm2, %v10031_v45  ;;  %8191 = vmatprep.subr.mxu1 %v9065_v0 }
 0xf75   :  { %8192 = vmatpush3.msra.mxu1 %v5041_v63  ;;  %8193 = vmatprep.mubr.msk.f32.mxu1 %vm9066_vm0, %v9065_v0  ;;  %v5324_v1 = vpack.c.bf16 %v5041_v63, %v5040_v61 }
 0xf76   :  { %8196 = vmatprep.subr.mxu1 %v9065_v0 }
 0xf78   :  { %8194 = vmatmul.mubr.msk.f32.vlgmr.msra.gmra.mrb[80].mxu1 %vm280_vm2, %v10042_v46 }
 0xf79   :  { %8197 = vmatpush3.msra.mxu1 %v5040_v61  ;;  %8198 = vmatprep.mubr.msk.f32.mxu1 %vm9066_vm0, %v9065_v0  ;;  %v8667_v61 = vld [vmem:[%s10471_s21 + $0x38] sm:$0xff]  }
 0xf7a   :  { %8201 = vmatprep.subr.mxu1 %v9065_v0 }
 0xf7c   :  { %8199 = vmatmul.mubr.msk.f32.vlgmr.msra.gmra.mrb[82].mxu1 %vm280_vm2, %v10056_v51 }
 0xf7d   :  { %8202 = vmatpush3.msra.mxu1 %v5041_v63  ;;  %8203 = vmatprep.mubr.msk.f32.mxu1 %vm9066_vm0, %v9065_v0  ;;  %v8671_v63 = vld [vmem:[%s10471_s21 + $0x40] sm:$0xff]  }
 0xf7e   :  { %8206 = vmatprep.subr.bf16.mxu1 %v9065_v0 }
 0xf80   :  { %8204 = vmatmul.mubr.msk.f32.vlgmr.msra.gmra.mrb[84].mxu1 %vm280_vm2, %v10073_v3 }
 0xf81   :  { %8207 = vmatpush3.bf16.msra.mxu1 %v8640_v2  ;;  %8222 = vmatprep.mubr.msk.bf16.mxu1 %vm9066_vm0, %v9065_v0  ;;  %v8673_v2 = vld [vmem:[%s10471_s21 + $0x48] sm:$0xff]  }
 0xf82   :  { %8208 = vmatprep.subr.bf16.mxu1 %v9065_v0 }
 0xf85   :  { %8209 = vmatpush3.bf16.msra.mxu1 %v8641_v4  ;;  %v8674_v4 = vld [vmem:[%s10471_s21 + $0x50] sm:$0xff]  }
 0xf86   :  { %8210 = vmatprep.subr.bf16.mxu1 %v9065_v0 }
 0xf89   :  { %8211 = vmatpush3.bf16.msra.mxu1 %v8642_v5  ;;  %v8675_v5 = vld [vmem:[%s10471_s21 + $0x58] sm:$0xff]  }
 0xf8a   :  { %8212 = vmatprep.subr.bf16.mxu1 %v9065_v0 }
 0xf8d   :  { %8213 = vmatpush3.bf16.msra.mxu1 %v8643_v6 }
 0xf8e   :  { %8214 = vmatprep.subr.bf16.mxu1 %v9065_v0 }
 0xf91   :  { %8215 = vmatpush3.bf16.msra.mxu1 %v8644_v7 }
 0xf92   :  { %8216 = vmatprep.subr.bf16.mxu1 %v9065_v0 }
 0xf95   :  { %8217 = vmatpush3.bf16.msra.mxu1 %v8645_v9 }
 0xf96   :  { %8218 = vmatprep.subr.bf16.mxu1 %v9065_v0 }
 0xf99   :  { %8219 = vmatpush3.bf16.msra.mxu1 %v8646_v10 }
 0xf9a   :  { %8220 = vmatprep.subr.bf16.mxu1 %v9065_v0 }
 0xf9d   :  { %8221 = vmatpush3.bf16.msra.mxu1 %v8647_v11 }
 0xf9e   :  { %8246 = vmatprep.subr.bf16.mxu1 %v9065_v0 }
 0xfa0   :  { %8223 = vmatmul.mubr.bf16.vlgmr.msra.gmra.mrb[88].mxu1 %v5324_v1  ;;  %v8672_v1 = vld [vmem:[%s10471_s21 + $0x18] sm:$0xff]  }
 0xfa1   :  { %8247 = vmatpush3.bf16.msra.mxu1 %v8651_v12  ;;  %8262 = vmatprep.mubr.msk.bf16.mxu1 %vm9066_vm0, %v9065_v0 }
 0xfa2   :  { %8248 = vmatprep.subr.bf16.mxu1 %v9065_v0 }
 0xfa5   :  { %8249 = vmatpush3.bf16.msra.mxu1 %v8653_v13 }
 0xfa6   :  { %8250 = vmatprep.subr.bf16.mxu1 %v9065_v0 }
 0xfa9   :  { %8251 = vmatpush3.bf16.msra.mxu1 %v8655_v48 }
 0xfaa   :  { %8252 = vmatprep.subr.bf16.mxu1 %v9065_v0 }
 0xfad   :  { %8253 = vmatpush3.bf16.msra.mxu1 %v8657_v14 }
 0xfae   :  { %8254 = vmatprep.subr.bf16.mxu1 %v9065_v0 }
 0xfb1   :  { %8255 = vmatpush3.bf16.msra.mxu1 %v8659_v16 }
 0xfb2   :  { %8256 = vmatprep.subr.bf16.mxu1 %v9065_v0 }
 0xfb5   :  { %8257 = vmatpush3.bf16.msra.mxu1 %v8661_v18 }
 0xfb6   :  { %8258 = vmatprep.subr.bf16.mxu1 %v9065_v0 }
 0xfb9   :  { %8259 = vmatpush3.bf16.msra.mxu1 %v8662_v19 }
 0xfba   :  { %8260 = vmatprep.subr.bf16.mxu1 %v9065_v0 }
 0xfbd   :  { %8261 = vmatpush3.bf16.msra.mxu1 %v8663_v20  ;;  %v8676_v20 = vld [vmem:[%s10473_s23 + $0x10] sm:$0xff]  }
 0xfbe   :  { %8298 = vmatprep.subr.bf16.mxu1 %v9065_v0 }
0x1047   :  { %v5108_v21 = vpop.f32.mrb[74].mxu1 }
0x1048   :  { %v8190_v22 = vpop.f32.mrb[75].mxu1 }
0x104b   :  { %v5178_v24 = vpop.f32.mrb[80].mxu1 }
0x104c   :  { %v5322_v25 = vpack.c.bf16 %v5178_v24, %v5108_v21  ;;  %v8195_v27 = vpop.f32.mrb[81].mxu1  ;;  %v8677_v21 = vld [vmem:[%s10473_s23 + $0x18] sm:$0xff]  }
0x104e   :  { %8243 = vmatmul.mubr.bf16.vlgmr.msra.gmra.mrb[68].mxu0 %v5322_v25 }
0x104f   :  { %v5248_v28 = vpop.f32.mrb[82].mxu1  ;;  %8268 = vmatprep.mubr.msk.f32.mxu0 %vm9066_vm0, %v9065_v0 }
0x1050   :  { %v8200_v29 = vpop.f32.mrb[83].mxu1 }
0x1053   :  { %v5318_v30 = vpop.f32.mrb[84].mxu1 }
0x1054   :  { %v5323_v31 = vpack.c.bf16 %v5318_v30, %v5248_v28  ;;  %v8205_v32 = vpop.f32.mrb[85].mxu1 }
0x1056   :  { %8263 = vmatmul.mubr.bf16.vlgmr.msra.gmra.mrb[92].mxu1 %v5323_v31  ;;  %v7627_v31 = vld [vmem:[#allocation24] ss:$0 sm:$0xff] }
0x1057   :  { %8306 = vmatprep.mubr.msk.bf16.mxu1 %vm9066_vm0, %v9065_v0  ;;  %8299 = vmatpush3.bf16.msra.mxu1 %v8668_v37 }
0x1058   :  { %8300 = vmatprep.subr.bf16.mxu1 %v9065_v0 }
0x105b   :  { %8301 = vmatpush3.bf16.msra.mxu1 %v8669_v38 }
0x105c   :  { %8302 = vmatprep.subr.bf16.mxu1 %v9065_v0 }
0x105f   :  { %8303 = vmatpush3.bf16.msra.mxu1 %v8670_v62 }
0x1060   :  { %8304 = vmatprep.subr.bf16.mxu1 %v9065_v0 }
0x1063   :  { %8305 = vmatpush3.bf16.msra.mxu1 %v8672_v1 }
0x1064   :  { %8322 = vmatprep.subr.mxu1 %v9065_v0 }
0x1073   :  { %v5440_v33 = vpop.f32.mrb[88].mxu1 }
0x1074   :  { %v8224_v34 = vpop.f32.mrb[89].mxu1 }
0x1075   :  { %v5443_v35 = vpop.f32.mrb[90].mxu1 }
0x1076   :  { %v8225_v36 = vpop.f32.mrb[91].mxu1 }
0x1121   :  { %v5529_v39 = vpop.f32.mrb[68].mxu0 }
0x1122   :  { %v5530_v40 = vadd.f32 %v5529_v39, %v5440_v33  ;;  %v8244_v41 = vpop.f32.mrb[69].mxu0 }
0x1123   :  { %v5532_v42 = vpop.f32.mrb[70].mxu0 }
0x1124   :  { %v5533_v43 = vadd.f32 %v5532_v42, %v5443_v35  ;;  %v8245_v44 = vpop.f32.mrb[71].mxu0  ;;  %v8678_v42 = vld [vmem:[%s10473_s23] sm:$0xff]  }
0x1125   :  { %v8680_v44 = vld [vmem:[%s10473_s23 + $0x20] sm:$0xff]  }
0x1129   :  { %v5635_v54 = vpop.f32.mrb[92].mxu1 }
0x112a   :  { %v5642_v57 = vadd.f32 %v5635_v54, %v5530_v40  ;;  %v8264_v47 = vpop.f32.mrb[93].mxu1  ;;  %v8681_v54 = vld [vmem:[%s10473_s23 + $0x28] sm:$0xff]  }
0x112b   :  { %v5638_v49 = vpop.f32.mrb[94].mxu1 }
0x112c   :  { %v5651_v50 = vadd.f32 %v7591_v55, %v5642_v57  ;;  %v5643_v23 = vadd.f32 %v5638_v49, %v5533_v43  ;;  %v8265_v52 = vpop.f32.mrb[95].mxu1  ;;  %v8679_v43 = vld [vmem:[%s10473_s23 + $0x8] sm:$0xff]  }
0x112e   :  { %v5653_v26 = vmax.f32 %v5651_v50, 0.0  ;;  %v5652_v53 = vadd.f32 %v7591_v55, %v5643_v23 }
0x1130   :  { %v5654_v56 = vmax.f32 %v5652_v53, 0.0  ;;  %8267 = vmatpush3.msra.mxu0 %v5653_v26 }
0x1131   :  { %8269 = vmatmul.mubr.msk.f32.vlgmr.msra.gmra.mrb[54].mxu0 %vm280_vm2, %v10031_v45  ;;  %8271 = vmatprep.subr.mxu0 %v9065_v0 }
0x1132   :  { %v5937_v58 = vpack.c.bf16 %v5654_v56, %v5653_v26  ;;  %8272 = vmatpush3.msra.mxu0 %v5654_v56  ;;  %8273 = vmatprep.mubr.msk.f32.mxu0 %vm9066_vm0, %v9065_v0 }
0x1133   :  { %8276 = vmatprep.subr.mxu0 %v9065_v0 }
0x1135   :  { %8274 = vmatmul.mubr.msk.f32.vlgmr.msra.gmra.mrb[72].mxu0 %vm280_vm2, %v10042_v46 }
0x1136   :  { %8277 = vmatpush3.msra.mxu0 %v5653_v26  ;;  %8278 = vmatprep.mubr.msk.f32.mxu0 %vm9066_vm0, %v9065_v0 }
0x1137   :  { %8281 = vmatprep.subr.mxu0 %v9065_v0 }
0x1139   :  { %8279 = vmatmul.mubr.msk.f32.vlgmr.msra.gmra.mrb[74].mxu0 %vm280_vm2, %v10056_v51 }
0x113a   :  { %8282 = vmatpush3.msra.mxu0 %v5654_v56  ;;  %8283 = vmatprep.mubr.msk.f32.mxu0 %vm9066_vm0, %v9065_v0 }
0x113b   :  { %8286 = vmatprep.subr.bf16.mxu0 %v9065_v0 }
0x113d   :  { %8284 = vmatmul.mubr.msk.f32.vlgmr.msra.gmra.mrb[76].mxu0 %vm280_vm2, %v10073_v3 }
0x113e   :  { %8287 = vmatpush3.bf16.msra.mxu0 %v8664_v59  ;;  %8294 = vmatprep.mubr.msk.bf16.mxu0 %vm9066_vm0, %v9065_v0 }
0x113f   :  { %8288 = vmatprep.subr.bf16.mxu0 %v9065_v0 }
0x1142   :  { %8289 = vmatpush3.bf16.msra.mxu0 %v8665_v60 }
0x1143   :  { %8290 = vmatprep.subr.bf16.mxu0 %v9065_v0 }
0x1146   :  { %8291 = vmatpush3.bf16.msra.mxu0 %v8666_v8 }
0x1147   :  { %8292 = vmatprep.subr.bf16.mxu0 %v9065_v0 }
0x114a   :  { %8293 = vmatpush3.bf16.msra.mxu0 %v8667_v61 }
0x114b   :  { %8310 = vmatprep.subr.bf16.mxu0 %v9065_v0 }
0x114d   :  { %8295 = vmatmul.mubr.msk.bf16.vlgmr.msra.gmra.mrb[80].mxu0 %vm2001_vm6, %v5937_v58 }
0x114e   :  { %8318 = vmatprep.mubr.msk.bf16.mxu0 %vm9066_vm0, %v9065_v0  ;;  %8311 = vmatpush3.bf16.msra.mxu0 %v8671_v63 }
0x114f   :  { %8312 = vmatprep.subr.bf16.mxu0 %v9065_v0 }
0x1152   :  { %8313 = vmatpush3.bf16.msra.mxu0 %v8673_v2 }
0x1153   :  { %8314 = vmatprep.subr.bf16.mxu0 %v9065_v0 }
0x1156   :  { %8315 = vmatpush3.bf16.msra.mxu0 %v8674_v4 }
0x1157   :  { %8316 = vmatprep.subr.bf16.mxu0 %v9065_v0 }
0x115a   :  { %8317 = vmatpush3.bf16.msra.mxu0 %v8675_v5 }
0x115b   :  { %8342 = vmatprep.subr.bf16.mxu0 %v9065_v0 }
0x1204   :  { %v5721_v6 = vpop.f32.mrb[54].mxu0 }
0x1205   :  { %v8270_v7 = vpop.f32.mrb[55].mxu0 }
0x1208   :  { %v5791_v9 = vpop.f32.mrb[72].mxu0 }
0x1209   :  { %v5935_v10 = vpack.c.bf16 %v5791_v9, %v5721_v6  ;;  %v8275_v11 = vpop.f32.mrb[73].mxu0  ;;  %v7649_v6 = vld [vmem:[%s10474_s24] ss:$0 sm:$0xff] }
0x120b   :  { %8307 = vmatmul.mubr.msk.bf16.vlgmr.msra.gmra.mrb[96].mxu1 %vm2001_vm6, %v5935_v10 }
0x120c   :  { %v5861_v12 = vpop.f32.mrb[74].mxu0  ;;  %8324 = vmatprep.mubr.msk.f32.mxu1 %vm9066_vm0, %v9065_v0 }
0x120d   :  { %v8280_v13 = vpop.f32.mrb[75].mxu0 }
0x1210   :  { %v5931_v48 = vpop.f32.mrb[76].mxu0 }
0x1211   :  { %v5936_v14 = vpack.c.bf16 %v5931_v48, %v5861_v12  ;;  %v8285_v15 = vpop.f32.mrb[77].mxu0 }
0x1213   :  { %8319 = vmatmul.mubr.msk.bf16.vlgmr.msra.gmra.mrb[84].mxu0 %vm2001_vm6, %v5936_v14 }
0x1214   :  { %8346 = vmatprep.mubr.msk.bf16.mxu0 %vm9066_vm0, %v9065_v0  ;;  %8343 = vmatpush3.bf16.msra.mxu0 %v8676_v20 }
0x1215   :  { %8344 = vmatprep.subr.bf16.mxu0 %v9065_v0 }
0x1218   :  { %8345 = vmatpush3.bf16.msra.mxu0 %v8677_v21 }
0x1219   :  { %8358 = vmatprep.subr.bf16.mxu0 %v9065_v0 }
0x1220   :  { %v6016_v16 = vpop.f32.mrb[80].mxu0 }
0x1221   :  { %v8296_v17 = vpop.f32.mrb[81].mxu0 }
0x1222   :  { %v6019_v18 = vpop.f32.mrb[82].mxu0  ;;  %v8682_v17 = vld [vmem:[%s10523_s12 + $0x8] sm:$0xff]  }
0x1223   :  { %v8297_v19 = vpop.f32.mrb[83].mxu0 }
0x12de   :  { %v6084_v22 = vpop.f32.mrb[96].mxu1 }
0x12df   :  { %v6085_v24 = vadd.f32 %v6084_v22, %v6016_v16  ;;  %v8308_v25 = vpop.f32.mrb[97].mxu1 }
0x12e0   :  { %v6087_v27 = vpop.f32.mrb[98].mxu1 }
0x12e1   :  { %v6088_v28 = vadd.f32 %v6087_v27, %v6019_v18  ;;  %v8309_v29 = vpop.f32.mrb[99].mxu1 }
0x12e6   :  { %v6161_v30 = vpop.f32.mrb[84].mxu0 }
0x12e7   :  { %v6168_v32 = vadd.f32 %v6161_v30, %v6085_v24  ;;  %v8320_v33 = vpop.f32.mrb[85].mxu0 }
0x12e8   :  { %v6164_v34 = vpop.f32.mrb[86].mxu0 }
0x12e9   :  { %v6177_v35 = vadd.f32 %v7627_v31, %v6168_v32  ;;  %v6169_v36 = vadd.f32 %v6164_v34, %v6088_v28  ;;  %v8321_v37 = vpop.f32.mrb[87].mxu0 }
0x12eb   :  { %v6179_v38 = vmax.f32 %v6177_v35, 0.0  ;;  %v6178_v39 = vadd.f32 %v7627_v31, %v6169_v36 }
0x12ed   :  { %v6180_v40 = vmax.f32 %v6178_v39, 0.0  ;;  %8323 = vmatpush3.msra.mxu1 %v6179_v38 }
0x12ee   :  { %8325 = vmatmul.mubr.msk.f32.vlgmr.msra.gmra.mrb[86].mxu1 %vm280_vm2, %v10031_v45  ;;  %8327 = vmatprep.subr.mxu1 %v9065_v0 }
0x12ef   :  { %v6463_v41 = vpack.c.bf16 %v6180_v40, %v6179_v38  ;;  %8328 = vmatpush3.msra.mxu1 %v6180_v40  ;;  %8329 = vmatprep.mubr.msk.f32.mxu1 %vm9066_vm0, %v9065_v0 }
0x12f0   :  { %8332 = vmatprep.subr.mxu1 %v9065_v0 }
0x12f1   :  { %8347 = vmatmul.mubr.msk.bf16.vlgmr.msra.gmra.mrb[88].mxu0 %vm1500_vm5, %v6463_v41 }
0x12f2   :  { %8330 = vmatmul.mubr.msk.f32.vlgmr.msra.gmra.mrb[100].mxu1 %vm280_vm2, %v10042_v46  ;;  %8362 = vmatprep.mubr.msk.bf16.mxu0 %vm9066_vm0, %v9065_v0 }
0x12f3   :  { %8333 = vmatpush3.msra.mxu1 %v6179_v38  ;;  %8334 = vmatprep.mubr.msk.f32.mxu1 %vm9066_vm0, %v9065_v0  ;;  %v7664_v38 = vld [vmem:[%s10524_s13] ss:$0 sm:$0xff] }
0x12f4   :  { %8337 = vmatprep.subr.mxu1 %v9065_v0  ;;  %8359 = vmatpush3.bf16.msra.mxu0 %v8680_v44 }
0x12f5   :  { %8360 = vmatprep.subr.bf16.mxu0 %v9065_v0 }
0x12f6   :  { %8335 = vmatmul.mubr.msk.f32.vlgmr.msra.gmra.mrb[102].mxu1 %vm280_vm2, %v10056_v51 }
0x12f7   :  { %8338 = vmatpush3.msra.mxu1 %v6180_v40  ;;  %8339 = vmatprep.mubr.msk.f32.mxu1 %vm9066_vm0, %v9065_v0 }
0x12f8   :  { %8350 = vmatprep.subr.bf16.mxu1 %v9065_v0  ;;  %8361 = vmatpush3.bf16.msra.mxu0 %v8681_v54 }
0x12f9   :  { %8371 = vmatprep.subr.mxu0 %v9065_v0 }
0x12fa   :  { %8340 = vmatmul.mubr.msk.f32.vlgmr.msra.gmra.mrb[104].mxu1 %vm280_vm2, %v10073_v3 }
0x12fb   :  { %8354 = vmatprep.mubr.msk.bf16.mxu1 %vm9066_vm0, %v9065_v0  ;;  %8351 = vmatpush3.bf16.msra.mxu1 %v8678_v42 }
0x12fc   :  { %8352 = vmatprep.subr.bf16.mxu1 %v9065_v0 }
0x12ff   :  { %8353 = vmatpush3.bf16.msra.mxu1 %v8679_v43 }
0x1300   :  { %8366 = vmatprep.subr.mxu1 %v9065_v0 }
0x13c1   :  { %v6247_v55 = vpop.f32.mrb[86].mxu1 }
0x13c2   :  { %v8326_v57 = vpop.f32.mrb[87].mxu1 }
0x13c4   :  { %v6522_v47 = vpop.f32.mrb[88].mxu0 }
0x13c5   :  { %v6317_v49 = vpop.f32.mrb[100].mxu1  ;;  %v8348_v50 = vpop.f32.mrb[89].mxu0 }
0x13c6   :  { %v6461_v23 = vpack.c.bf16 %v6317_v49, %v6247_v55  ;;  %v8331_v52 = vpop.f32.mrb[101].mxu1  ;;  %v6525_v26 = vpop.f32.mrb[90].mxu0 }
0x13c7   :  { %v8349_v53 = vpop.f32.mrb[91].mxu0 }
0x13c8   :  { %8355 = vmatmul.mubr.msk.bf16.vlgmr.msra.gmra.mrb[108].mxu1 %vm1500_vm5, %v6461_v23 }
0x13c9   :  { %v6387_v56 = vpop.f32.mrb[102].mxu1  ;;  %8368 = vmatprep.mubr.msk.f32.mxu1 %vm9066_vm0, %v9065_v0 }
0x13ca   :  { %v8336_v58 = vpop.f32.mrb[103].mxu1 }
0x13cd   :  { %v6457_v59 = vpop.f32.mrb[104].mxu1 }
0x13ce   :  { %v6462_v60 = vpack.c.bf16 %v6457_v59, %v6387_v56  ;;  %v8341_v8 = vpop.f32.mrb[105].mxu1 }
0x13d0   :  { %8363 = vmatmul.mubr.msk.bf16.vlgmr.msra.gmra.mrb[92].mxu0 %vm1500_vm5, %v6462_v60 }
0x13d1   :  { %8373 = vmatprep.mubr.msk.f32.mxu0 %vm9066_vm0, %v9065_v0 }
0x149b   :  { %v6578_v61 = vpop.f32.mrb[108].mxu1 }
0x149c   :  { %v6579_v62 = vadd.f32 %v6578_v61, %v6522_v47  ;;  %v8356_v63 = vpop.f32.mrb[109].mxu1 }
0x149d   :  { %v6581_v1 = vpop.f32.mrb[110].mxu1 }
0x149e   :  { %v6582_v2 = vadd.f32 %v6581_v1, %v6525_v26  ;;  %v8357_v4 = vpop.f32.mrb[111].mxu1 }
0x14a3   :  { %v6639_v5 = vpop.f32.mrb[92].mxu0 }
0x14a4   :  { %v6646_v7 = vadd.f32 %v6639_v5, %v6579_v62  ;;  %v8364_v9 = vpop.f32.mrb[93].mxu0 }
0x14a5   :  { %v6642_v10 = vpop.f32.mrb[94].mxu0 }
0x14a6   :  { %v6655_v11 = vadd.f32 %v7649_v6, %v6646_v7  ;;  %v6647_v12 = vadd.f32 %v6642_v10, %v6582_v2  ;;  %v8365_v13 = vpop.f32.mrb[95].mxu0 }
0x14a8   :  { %v6657_v48 = vmax.f32 %v6655_v11, 0.0  ;;  %v6656_v14 = vadd.f32 %v7649_v6, %v6647_v12 }
0x14aa   :  { %v6658_v15 = vmax.f32 %v6656_v14, 0.0  ;;  %8367 = vmatpush3.msra.mxu1 %v6657_v48 }
0x14ab   :  { %8369 = vmatmul.mubr.msk.f32.vlgmr.msra.gmra.mrb[106].mxu1 %vm280_vm2, %v10031_v45  ;;  %8376 = vmatprep.subr.mxu1 %v9065_v0  ;;  %v8683_v45 = vld [vmem:[%s10523_s12] sm:$0xff]  }
0x14ac   :  { %v6941_v16 = vpack.c.bf16 %v6658_v15, %v6657_v48  ;;  %8372 = vmatpush3.msra.mxu0 %v6658_v15  ;;  %8377 = vmatpush3.msra.mxu1 %v6657_v48 }
0x14ad   :  { %8374 = vmatmul.mubr.msk.f32.vlgmr.msra.gmra.mrb[78].mxu0 %vm280_vm2, %v10042_v46  ;;  %8381 = vmatprep.subr.mxu0 %v9065_v0  ;;  %v8684_v46 = vld [vmem:[%s10523_s12 + $0x10] sm:$0xff]  }
0x14ae   :  { %8378 = vmatprep.mubr.msk.f32.mxu1 %vm9066_vm0, %v9065_v0  ;;  %8382 = vmatpush3.msra.mxu0 %v6658_v15 }
0x14af   :  { %8379 = vmatmul.mubr.msk.f32.vlgmr.msra.gmra.mrb[112].mxu1 %vm280_vm2, %v10056_v51  ;;  %8386 = vmatprep.subr.bf16.mxu1 %v9065_v0 }
0x14b0   :  { %8383 = vmatprep.mubr.msk.f32.mxu0 %vm9066_vm0, %v9065_v0  ;;  %8387 = vmatpush3.bf16.msra.mxu1 %v8682_v17 }
0x14b1   :  { %8384 = vmatmul.mubr.msk.f32.vlgmr.msra.gmra.mrb[96].mxu0 %vm280_vm2, %v10073_v3  ;;  %8388 = vmatprep.mubr.msk.bf16.mxu1 %vm9066_vm0, %v9065_v0 }
0x14b2   :  { %8392 = vmatprep.subr.bf16.mxu0 %v9065_v0  ;;  %8394 = vmatprep.mubr.msk.bf16.mxu0 %vm9066_vm0, %v9065_v0 }
0x14b3   :  { %8389 = vmatmul.mubr.msk.bf16.vlgmr.msra.gmra.mrb[116].mxu1 %vm1033_vm4, %v6941_v16  ;;  %8398 = vmatprep.subr.bf16.mxu1 %v9065_v0 }
0x14b4   :  { %8400 = vmatprep.mubr.msk.bf16.mxu1 %vm9066_vm0, %v9065_v0  ;;  %8393 = vmatpush3.bf16.msra.mxu0 %v8683_v45 }
0x14b5   :  { %8399 = vmatpush3.bf16.msra.mxu1 %v8684_v46 }
0x157e   :  { %v6725_v51 = vpop.f32.mrb[106].mxu1 }
0x157f   :  { %v8370_v3 = vpop.f32.mrb[107].mxu1 }
0x1580   :  { %v6795_v18 = vpop.f32.mrb[78].mxu0 }
0x1581   :  { %v6939_v19 = vpack.c.bf16 %v6795_v18, %v6725_v51  ;;  %v8375_v20 = vpop.f32.mrb[79].mxu0 }
0x1582   :  { %v6865_v21 = vpop.f32.mrb[112].mxu1 }
0x1583   :  { %8395 = vmatmul.mubr.msk.bf16.vlgmr.msra.gmra.mrb[100].mxu0 %vm1033_vm4, %v6939_v19  ;;  %v8380_v22 = vpop.f32.mrb[113].mxu1 }
0x1584   :  { %v6935_v0 = vpop.f32.mrb[96].mxu0 }
0x1585   :  { %v6940_v24 = vpack.c.bf16 %v6935_v0, %v6865_v21  ;;  %v8385_v25 = vpop.f32.mrb[97].mxu0 }
0x1586   :  { %v6990_v27 = vpop.f32.mrb[116].mxu1 }
0x1587   :  { %v8390_v28 = vpop.f32.mrb[117].mxu1  ;;  %8401 = vmatmul.mubr.msk.bf16.vlgmr.msra.gmra.mrb[120].mxu1 %vm1033_vm4, %v6940_v24 }
0x1588   :  { %v6993_v29 = vpop.f32.mrb[118].mxu1 }
0x1589   :  { %v8391_v30 = vpop.f32.mrb[119].mxu1 }
0x1656   :  { %v7040_v31 = vpop.f32.mrb[100].mxu0 }
0x1657   :  { %v7041_v32 = vadd.f32 %v7040_v31, %v6990_v27  ;;  %v8396_v33 = vpop.f32.mrb[101].mxu0 }
0x1658   :  { %v7043_v34 = vpop.f32.mrb[102].mxu0 }
0x1659   :  { %v7044_v35 = vadd.f32 %v7043_v34, %v6993_v29  ;;  %v8397_v36 = vpop.f32.mrb[103].mxu0 }
0x165a   :  { %v7093_v37 = vpop.f32.mrb[120].mxu1 }
0x165b   :  { %v7100_v39 = vadd.f32 %v7093_v37, %v7041_v32  ;;  %v8402_v40 = vpop.f32.mrb[121].mxu1 }
0x165c   :  { %v7096_v41 = vpop.f32.mrb[122].mxu1 }
0x165d   :  { %v7109_v42 = vadd.f32 %v7664_v38, %v7100_v39  ;;  %v7101_v43 = vadd.f32 %v7096_v41, %v7044_v35  ;;  %v8403_v44 = vpop.f32.mrb[123].mxu1 }
0x165f   :  { %8686 = vtanh.f32 %v7109_v42  ;;  %v7110_v54 = vadd.f32 %v7664_v38, %v7101_v43 }
0x1661   :  { %8688 = vtanh.f32 %v7110_v54 }
0x1669   :  { %v8687_v55 = vpop.eup %8686 }
0x166a   :  { %7113 = vst.msk [vmem:[%s10525_s27] sm:$0xff] %vm579_vm3, %v8687_v55 }
0x166b   :  { %v8689_v57 = vpop.eup %8688 }
0x166c   :  { %7114 = vst.msk [vmem:[%s10525_s27 + $0x8] sm:$0xff] %vm579_vm3, %v8689_v57 }
0x166d   :  { %7119 = vsyncpa [#allocation3], 1 }
0x166e   :  { %7120 = vsyncpa [#allocation5], 1 }
0x166f   :  { %7121 = vsyncpa [#allocation8], 1 }
0x1670   :  { %7122 = vsyncpa [#allocation11], 1 }
0x1671   :  { %7123 = vsyncpa [#allocation14], 1 }
0x1672   :  { %7124 = vsyncpa [#allocation17], 1 }
0x1673   :  { %7125 = vsyncpa [#allocation20], 1 }
0x1674   :  { %7126 = vsyncpa [#allocation23], 1 }

</bundles_post_ra>
